<compile_context>
chip_gen: v6e
topology: v6e:2x2x1
jax: 0.10.0
libtpu: 0.0.40
codegen_flags: <defaults>
</compile_context>

<pallas_src>
import functools

import jax
import jax.numpy as jnp
from jax.experimental import pallas as pl
from jax.experimental.pallas import tpu as pltpu


def _round_up(x, m):
    return ((x + m - 1) // m) * m


def _mlp_kernel(x_ref,
                w1_ref, b1_ref,
                w2_ref, b2_ref,
                w3_ref, b3_ref,
                w4_ref, b4_ref,
                o_ref):
    """Fused 4-layer MLP forward on one batch tile.

    Matmul operands are bf16 (MXU), accumulation is f32; bias add and ReLU are
    done in f32 (friendly to v5e's f32-only VPU)."""
    # fc1 + ReLU
    h = jnp.dot(x_ref[...].astype(jnp.bfloat16), w1_ref[...],
                preferred_element_type=jnp.float32) + b1_ref[...]
    h = jnp.maximum(h, 0.0)
    # fc2 + ReLU
    h = jnp.dot(h.astype(jnp.bfloat16), w2_ref[...],
                preferred_element_type=jnp.float32) + b2_ref[...]
    h = jnp.maximum(h, 0.0)
    # fc3 + ReLU
    h = jnp.dot(h.astype(jnp.bfloat16), w3_ref[...],
                preferred_element_type=jnp.float32) + b3_ref[...]
    h = jnp.maximum(h, 0.0)
    # fc4 (no activation); output tile is lane-padded to a 128-multiple.
    out = jnp.dot(h.astype(jnp.bfloat16), w4_ref[...],
                  preferred_element_type=jnp.float32) + b4_ref[...]
    o_ref[...] = out.astype(o_ref.dtype)


def prepare_params(params):
    """One-time conversion of f32 params into kernel-ready arrays.

    Call this ONCE (outside the per-step hot path): casts weights to bf16,
    biases to f32, and lane-pads the final layer to a multiple of 128."""
    out_classes = params["w4"].shape[1]
    out_pad = _round_up(out_classes, 128)

    w4 = jnp.zeros((params["w4"].shape[0], out_pad), jnp.bfloat16)
    w4 = w4.at[:, :out_classes].set(params["w4"].astype(jnp.bfloat16))
    b4 = jnp.zeros((1, out_pad), jnp.float32)
    b4 = b4.at[:, :out_classes].set(params["b4"].astype(jnp.float32))

    return {
        "w1": params["w1"].astype(jnp.bfloat16),
        "w2": params["w2"].astype(jnp.bfloat16),
        "w3": params["w3"].astype(jnp.bfloat16),
        "w4": w4,
        "b1": params["b1"].astype(jnp.float32),
        "b2": params["b2"].astype(jnp.float32),
        "b3": params["b3"].astype(jnp.float32),
        "b4": b4,
    }


def mlp_forward(x, prepared, *, out_classes, batch_tile=256):
    """x: (B, input_size) float32; prepared: output of prepare_params().

    Returns (B, out_classes) float32, matching the PyTorch module's forward
    (up to bf16 weight/operand quantization used for the matmuls)."""
    B, in_features = x.shape
    out_pad = prepared["w4"].shape[1]

    w1, w2, w3, w4 = (prepared[k] for k in ("w1", "w2", "w3", "w4"))
    b1, b2, b3, b4 = (prepared[k] for k in ("b1", "b2", "b3", "b4"))

    # Batch tiling.  Small batches: a single 16-row-aligned tile (bf16 packs
    # two rows per sublane).  Large batches: pick tb so num_tiles is even,
    # so the ("parallel",) grid axis lands work on both v7x TensorCores.
    if B <= batch_tile:
        tb = _round_up(max(B, 1), 16)
    else:
        tb = min(batch_tile, _round_up(-(-B // 2), 128))
    b_pad = _round_up(B, tb)
    if b_pad != B:
        # TODO(synk): for very large B a masked last tile would avoid this
        # extra HBM pass; at inference-scale batches the pad is negligible.
        x = jnp.pad(x, ((0, b_pad - B), (0, 0)))
    num_tiles = b_pad // tb

    # Weights/biases: full-array blocks, constant index maps -> DMA'd once and
    # resident in VMEM across all batch tiles.  Single-buffered: the second
    # pipeline buffer would never be used (indices never change).
    def const(arr):
        nd = arr.ndim
        return pl.BlockSpec(arr.shape, lambda i, _nd=nd: (0,) * _nd,
                            pipeline_mode=pl.Buffered(1))

    # Only bound VMEM explicitly when the caller requests big tiles (e.g. on
    # v6e); the default tile fits comfortably under every chip's scoped default.
    vmem_limit = (48 << 20) if tb >= 512 else None

    out = pl.pallas_call(
        _mlp_kernel,
        out_shape=jax.ShapeDtypeStruct((b_pad, out_pad), jnp.float32),
        grid_spec=pltpu.PrefetchScalarGridSpec(
            num_scalar_prefetch=0,
            grid=(num_tiles,),
            in_specs=[
                pl.BlockSpec((tb, in_features), lambda i: (i, 0)),
                const(w1), const(b1),
                const(w2), const(b2),
                const(w3), const(b3),
                const(w4), const(b4),
            ],
            out_specs=pl.BlockSpec((tb, out_pad), lambda i: (i, 0)),
        ),
        compiler_params=pltpu.CompilerParams(
            dimension_semantics=("parallel",),
            vmem_limit_bytes=vmem_limit),
    )(x, w1, b1, w2, b2, w3, b3, w4, b4)

    return out[:B, :out_classes]


def init_params(key, input_size, output_classes):
    """Deterministic init mimicking torch.nn.Linear's U(-1/sqrt(fan_in), +)."""
    dims = [(input_size, 1024), (1024, 1024), (1024, 512), (512, output_classes)]
    params = {}
    keys = jax.random.split(key, 2 * len(dims))
    for i, (fan_in, fan_out) in enumerate(dims):
        bound = 1.0 / (fan_in ** 0.5)
        w = jax.random.uniform(keys[2 * i], (fan_in, fan_out),
                               minval=-bound, maxval=bound, dtype=jnp.float32)
        b = jax.random.uniform(keys[2 * i + 1], (1, fan_out),
                               minval=-bound, maxval=bound, dtype=jnp.float32)
        params[f"w{i + 1}"] = w
        params[f"b{i + 1}"] = b
    return params


def reference(x, params):
    """Plain-JAX reference mirroring the kernel's bf16-operand / f32-accum math."""
    h = x
    for i in range(1, 5):
        w = params[f"w{i}"].astype(jnp.bfloat16)
        h = jnp.dot(h.astype(jnp.bfloat16), w,
                    preferred_element_type=jnp.float32) + params[f"b{i}"]
        if i < 4:
            h = jnp.maximum(h, 0.0)
    return h


if __name__ == "__main__":
    key = jax.random.PRNGKey(0)
    k_params, k_x = jax.random.split(key)

    batch = 8
    input_size = 32
    output_classes = 10

    params = init_params(k_params, input_size, output_classes)
    x = jax.random.normal(k_x, (batch, input_size), dtype=jnp.float32)

    # One-time weight prep (bf16 cast + lane padding) kept out of the hot path;
    # the forward itself is jit-compiled so repeated calls only run the kernel.
    prepared = prepare_params(params)
    forward = jax.jit(functools.partial(mlp_forward, out_classes=output_classes))

    out = forward(x, prepared)
    out = jax.block_until_ready(out)

    ref = reference(x, params)
    assert out.shape == (batch, output_classes), out.shape
    assert jnp.allclose(out, ref, atol=2e-3, rtol=2e-3), \
        float(jnp.max(jnp.abs(out - ref)))

    print("KERNEL_OK")
</pallas_src>

<mosaic_0001>
module attributes {stable_mosaic.version = 11 : i64} {
  func.func @_mlp_kernel(%arg0: i32, %arg1: memref<16x32xf32, #tpu.memory_space<vmem>>, %arg2: memref<32x1024xbf16, #tpu.memory_space<vmem>>, %arg3: memref<1x1024xf32, #tpu.memory_space<vmem>>, %arg4: memref<1024x1024xbf16, #tpu.memory_space<vmem>>, %arg5: memref<1x1024xf32, #tpu.memory_space<vmem>>, %arg6: memref<1024x512xbf16, #tpu.memory_space<vmem>>, %arg7: memref<1x512xf32, #tpu.memory_space<vmem>>, %arg8: memref<512x128xbf16, #tpu.memory_space<vmem>>, %arg9: memref<1x128xf32, #tpu.memory_space<vmem>>, %arg10: memref<16x128xf32, #tpu.memory_space<vmem>>) attributes {dimension_semantics = [#tpu.dimension_semantics<parallel>], iteration_bounds = array<i64: 1>, scalar_prefetch = 0 : i64, scratch_operands = 0 : i64, tpu.core_type = #tpu.core_type<tc>, window_params = [{transform_indices = @transform_0, window_bounds = array<i64: 16, 32>}, {pipeline_mode = #tpu.pipeline_mode<synchronous>, transform_indices = @transform_1, window_bounds = array<i64: 32, 1024>}, {pipeline_mode = #tpu.pipeline_mode<synchronous>, transform_indices = @transform_2, window_bounds = array<i64: 1, 1024>}, {pipeline_mode = #tpu.pipeline_mode<synchronous>, transform_indices = @transform_3, window_bounds = array<i64: 1024, 1024>}, {pipeline_mode = #tpu.pipeline_mode<synchronous>, transform_indices = @transform_4, window_bounds = array<i64: 1, 1024>}, {pipeline_mode = #tpu.pipeline_mode<synchronous>, transform_indices = @transform_5, window_bounds = array<i64: 1024, 512>}, {pipeline_mode = #tpu.pipeline_mode<synchronous>, transform_indices = @transform_6, window_bounds = array<i64: 1, 512>}, {pipeline_mode = #tpu.pipeline_mode<synchronous>, transform_indices = @transform_7, window_bounds = array<i64: 512, 128>}, {pipeline_mode = #tpu.pipeline_mode<synchronous>, transform_indices = @transform_8, window_bounds = array<i64: 1, 128>}, {transform_indices = @transform_9, window_bounds = array<i64: 16, 128>}]} {
    %c0 = arith.constant 0 : index
    %c0_0 = arith.constant 0 : index
    %0 = vector.load %arg1[%c0, %c0_0] : memref<16x32xf32, #tpu.memory_space<vmem>>, vector<16x32xf32>
    %1 = arith.truncf %0 : vector<16x32xf32> to vector<16x32xbf16>
    %c0_1 = arith.constant 0 : index
    %c0_2 = arith.constant 0 : index
    %2 = vector.load %arg2[%c0_1, %c0_2] : memref<32x1024xbf16, #tpu.memory_space<vmem>>, vector<32x1024xbf16>
    %cst = arith.constant dense<0.000000e+00> : vector<16x1024xf32>
    %3 = tpu.matmul %1, %2, %cst {dimension_numbers = #tpu.dot_dimension_numbers<[1], [0], [0], [1], [0, 0, 1, 1], [], []>} : vector<16x32xbf16>, vector<32x1024xbf16>, vector<16x1024xf32> -> vector<16x1024xf32>
    %c0_3 = arith.constant 0 : index
    %c0_4 = arith.constant 0 : index
    %4 = vector.load %arg3[%c0_3, %c0_4] : memref<1x1024xf32, #tpu.memory_space<vmem>>, vector<1x1024xf32>
    %5 = vector.broadcast %4 : vector<1x1024xf32> to vector<16x1024xf32>
    %6 = arith.addf %3, %5 : vector<16x1024xf32>
    %cst_5 = arith.constant 0.000000e+00 : f32
    %7 = vector.broadcast %cst_5 : f32 to vector<16x1024xf32>
    %8 = arith.maximumf %6, %7 : vector<16x1024xf32>
    %9 = arith.truncf %8 : vector<16x1024xf32> to vector<16x1024xbf16>
    %c0_6 = arith.constant 0 : index
    %c0_7 = arith.constant 0 : index
    %10 = vector.load %arg4[%c0_6, %c0_7] : memref<1024x1024xbf16, #tpu.memory_space<vmem>>, vector<1024x1024xbf16>
    %cst_8 = arith.constant dense<0.000000e+00> : vector<16x1024xf32>
    %11 = tpu.matmul %9, %10, %cst_8 {dimension_numbers = #tpu.dot_dimension_numbers<[1], [0], [0], [1], [0, 0, 1, 1], [], []>} : vector<16x1024xbf16>, vector<1024x1024xbf16>, vector<16x1024xf32> -> vector<16x1024xf32>
    %c0_9 = arith.constant 0 : index
    %c0_10 = arith.constant 0 : index
    %12 = vector.load %arg5[%c0_9, %c0_10] : memref<1x1024xf32, #tpu.memory_space<vmem>>, vector<1x1024xf32>
    %13 = vector.broadcast %12 : vector<1x1024xf32> to vector<16x1024xf32>
    %14 = arith.addf %11, %13 : vector<16x1024xf32>
    %cst_11 = arith.constant 0.000000e+00 : f32
    %15 = vector.broadcast %cst_11 : f32 to vector<16x1024xf32>
    %16 = arith.maximumf %14, %15 : vector<16x1024xf32>
    %17 = arith.truncf %16 : vector<16x1024xf32> to vector<16x1024xbf16>
    %c0_12 = arith.constant 0 : index
    %c0_13 = arith.constant 0 : index
    %18 = vector.load %arg6[%c0_12, %c0_13] : memref<1024x512xbf16, #tpu.memory_space<vmem>>, vector<1024x512xbf16>
    %cst_14 = arith.constant dense<0.000000e+00> : vector<16x512xf32>
    %19 = tpu.matmul %17, %18, %cst_14 {dimension_numbers = #tpu.dot_dimension_numbers<[1], [0], [0], [1], [0, 0, 1, 1], [], []>} : vector<16x1024xbf16>, vector<1024x512xbf16>, vector<16x512xf32> -> vector<16x512xf32>
    %c0_15 = arith.constant 0 : index
    %c0_16 = arith.constant 0 : index
    %20 = vector.load %arg7[%c0_15, %c0_16] : memref<1x512xf32, #tpu.memory_space<vmem>>, vector<1x512xf32>
    %21 = vector.broadcast %20 : vector<1x512xf32> to vector<16x512xf32>
    %22 = arith.addf %19, %21 : vector<16x512xf32>
    %cst_17 = arith.constant 0.000000e+00 : f32
    %23 = vector.broadcast %cst_17 : f32 to vector<16x512xf32>
    %24 = arith.maximumf %22, %23 : vector<16x512xf32>
    %25 = arith.truncf %24 : vector<16x512xf32> to vector<16x512xbf16>
    %c0_18 = arith.constant 0 : index
    %c0_19 = arith.constant 0 : index
    %26 = vector.load %arg8[%c0_18, %c0_19] : memref<512x128xbf16, #tpu.memory_space<vmem>>, vector<512x128xbf16>
    %cst_20 = arith.constant dense<0.000000e+00> : vector<16x128xf32>
    %27 = tpu.matmul %25, %26, %cst_20 {dimension_numbers = #tpu.dot_dimension_numbers<[1], [0], [0], [1], [0, 0, 1, 1], [], []>} : vector<16x512xbf16>, vector<512x128xbf16>, vector<16x128xf32> -> vector<16x128xf32>
    %c0_21 = arith.constant 0 : index
    %c0_22 = arith.constant 0 : index
    %28 = vector.load %arg9[%c0_21, %c0_22] : memref<1x128xf32, #tpu.memory_space<vmem>>, vector<1x128xf32>
    %29 = vector.broadcast %28 : vector<1x128xf32> to vector<16x128xf32>
    %30 = arith.addf %27, %29 : vector<16x128xf32>
    %c0_23 = arith.constant 0 : index
    %c0_24 = arith.constant 0 : index
    %31 = vector.load %arg10[%c0_23, %c0_24] : memref<16x128xf32, #tpu.memory_space<vmem>>, vector<16x128xf32>
    tpu.vector_store %arg10[%c0_23, %c0_24], %30 {strides = array<i32>} : memref<16x128xf32, #tpu.memory_space<vmem>>, vector<16x128xf32>,
    return
  }
  func.func @transform_0(%arg0: i32) -> (i32, i32) {
    %c0_i32 = arith.constant 0 : i32
    %c0_i32_0 = arith.constant 0 : i32
    return %arg0, %c0_i32 : i32, i32
  }
  func.func @transform_1(%arg0: i32) -> (i32, i32) {
    %c0_i32 = arith.constant 0 : i32
    %c0_i32_0 = arith.constant 0 : i32
    %c0_i32_1 = arith.constant 0 : i32
    return %c0_i32, %c0_i32_0 : i32, i32
  }
  func.func @transform_2(%arg0: i32) -> (i32, i32) {
    %c0_i32 = arith.constant 0 : i32
    %c0_i32_0 = arith.constant 0 : i32
    %c0_i32_1 = arith.constant 0 : i32
    return %c0_i32, %c0_i32_0 : i32, i32
  }
  func.func @transform_3(%arg0: i32) -> (i32, i32) {
    %c0_i32 = arith.constant 0 : i32
    %c0_i32_0 = arith.constant 0 : i32
    %c0_i32_1 = arith.constant 0 : i32
    return %c0_i32, %c0_i32_0 : i32, i32
  }
  func.func @transform_4(%arg0: i32) -> (i32, i32) {
    %c0_i32 = arith.constant 0 : i32
    %c0_i32_0 = arith.constant 0 : i32
    %c0_i32_1 = arith.constant 0 : i32
    return %c0_i32, %c0_i32_0 : i32, i32
  }
  func.func @transform_5(%arg0: i32) -> (i32, i32) {
    %c0_i32 = arith.constant 0 : i32
    %c0_i32_0 = arith.constant 0 : i32
    %c0_i32_1 = arith.constant 0 : i32
    return %c0_i32, %c0_i32_0 : i32, i32
  }
  func.func @transform_6(%arg0: i32) -> (i32, i32) {
    %c0_i32 = arith.constant 0 : i32
    %c0_i32_0 = arith.constant 0 : i32
    %c0_i32_1 = arith.constant 0 : i32
    return %c0_i32, %c0_i32_0 : i32, i32
  }
  func.func @transform_7(%arg0: i32) -> (i32, i32) {
    %c0_i32 = arith.constant 0 : i32
    %c0_i32_0 = arith.constant 0 : i32
    %c0_i32_1 = arith.constant 0 : i32
    return %c0_i32, %c0_i32_0 : i32, i32
  }
  func.func @transform_8(%arg0: i32) -> (i32, i32) {
    %c0_i32 = arith.constant 0 : i32
    %c0_i32_0 = arith.constant 0 : i32
    %c0_i32_1 = arith.constant 0 : i32
    return %c0_i32, %c0_i32_0 : i32, i32
  }
  func.func @transform_9(%arg0: i32) -> (i32, i32) {
    %c0_i32 = arith.constant 0 : i32
    %c0_i32_0 = arith.constant 0 : i32
    return %arg0, %c0_i32 : i32, i32
  }
}

</mosaic_0001>

<bundles_post_ra>
// kernel: mlp_forward.1
= control target key start
LH: loop header
LB: loop body
LE: loop exit
PB: predicated region body
PF: predicated region fallthrough
CT: control target
= control target key end

     0   :  { %14 = vsyncpa [#allocation3], 0  ;;  %s8407_s0 = inlined_call_operand.vmem [shape: f32[16,32], index: 0, kind: input, shape index: {}]   ;;  %s8408_s1 = inlined_call_operand.hbm [shape: bf16[32,1024], index: 1, kind: input, shape index: {}]   ;;  %s8409_s2 = inlined_call_operand.hbm [shape: f32[1,1024], index: 2, kind: input, shape index: {}]   ;;  %s8410_s3 = inlined_call_operand.hbm [shape: bf16[1024,1024], index: 3, kind: input, shape index: {}]   ;;  %s8411_s4 = inlined_call_operand.hbm [shape: f32[1,1024], index: 4, kind: input, shape index: {}]   ;;  %s8412_s5 = inlined_call_operand.hbm [shape: bf16[1024,512], index: 5, kind: input, shape index: {}]   ;;  %s8413_s6 = inlined_call_operand.hbm [shape: f32[1,512], index: 6, kind: input, shape index: {}]   ;;  %s8414_s7 = inlined_call_operand.hbm [shape: bf16[512,128], index: 7, kind: input, shape index: {}]   ;;  %s8415_s8 = inlined_call_operand.hbm [shape: f32[1,128], index: 8, kind: input, shape index: {}]   ;;  %s8416_s9 = inlined_call_operand.vmem [shape: f32[16,128], index: 9, kind: output, shape index: {}]  }
   0x1   :  { %15 = vsyncpa [#allocation5], 0 }
   0x2   :  { %16 = vsyncpa [#allocation8], 0 }
   0x3   :  { %17 = vsyncpa [#allocation11], 0 }
   0x4   :  { %18 = vsyncpa [#allocation14], 0  ;;  %s8038_s30 = smov [#allocation4]   ;;  %s8039_s11 = smov [#allocation7]  }
   0x5   :  { %s39_s10 = sshll.u32 %s8038_s30, 4  ;;  %s61_s12 = sshll.u32 %s8039_s11, 4  ;;  %s40_s10 = int_to_ptr.vmem [resolvable:$true] %s39_s10  ;;  %s62_s12 = int_to_ptr.vmem [resolvable:$true] %s61_s12 }
   0x6   :  { %s7876_s13 = scalar_lea.vmem %s40_s10, 128  ;;  %p7881_p1 = scmp.lt.s32.totalorder %s40_s10, %s40_s10 }
   0x7   :  { %p7877_p0 = scmp.ne.s32.totalorder %s40_s10, %s7876_s13  ;;  %p7882_p2 = scmp.lt.s32.totalorder %s7876_s13, %s7876_s13 }
   0x9   :  { %p7883_p3 = por %p7882_p2, %p7881_p1 }
   0xb   :  { %p7884_p4 = pnand %p7883_p3, %p7877_p0 }
   0xd   :  { %7887 = shalt.err (!%p7884_p4)
}
   0xe   :  { %42 = dma.hbm_to_vmem [thread:$0]  %s8409_s2, 128, %s40_s10, [#allocation5]  }
   0xf   :  { %s7896_s16 = scalar_lea.vmem %s62_s12, 128  ;;  %p7901_p6 = scmp.lt.s32.totalorder %s62_s12, %s62_s12 }
  0x10   :  { %p7897_p5 = scmp.ne.s32.totalorder %s62_s12, %s7896_s16  ;;  %p7902_p7 = scmp.lt.s32.totalorder %s7896_s16, %s7896_s16 }
  0x12   :  { %p7903_p8 = por %p7902_p7, %p7901_p6 }
  0x14   :  { %p7904_p9 = pnand %p7903_p8, %p7897_p5 }
  0x16   :  { %7907 = shalt.err (!%p7904_p9)
}
  0x17   :  { %64 = dma.hbm_to_vmem [thread:$0]  %s8411_s4, 128, %s62_s12, [#allocation8]  }
  0x18   :  { %s8040_s19 = smov [#allocation10]   ;;  %s8041_s21 = smov [#allocation2]  }
  0x19   :  { %s83_s20 = sshll.u32 %s8040_s19, 4  ;;  %s26_s22 = sshll.u32 %s8041_s21, 4  ;;  %s84_s20 = int_to_ptr.vmem [resolvable:$true] %s83_s20  ;;  %s27_s22 = int_to_ptr.vmem [resolvable:$true] %s26_s22 }
  0x1a   :  { %s7916_s23 = scalar_lea.vmem %s84_s20, 64  ;;  %p7921_p11 = scmp.lt.s32.totalorder %s84_s20, %s84_s20 }
  0x1b   :  { %p7917_p10 = scmp.ne.s32.totalorder %s84_s20, %s7916_s23  ;;  %p7922_p12 = scmp.lt.s32.totalorder %s7916_s23, %s7916_s23 }
  0x1d   :  { %p7923_p13 = por %p7922_p12, %p7921_p11 }
  0x1f   :  { %p7924_p0 = pnand %p7923_p13, %p7917_p10 }
  0x21   :  { %7927 = shalt.err (!%p7924_p0)
}
  0x22   :  { %86 = dma.hbm_to_vmem [thread:$0]  %s8413_s6, 64, %s84_s20, [#allocation11]  }
  0x23   :  { %s7936_s25 = scalar_lea.vmem %s27_s22, 2048  ;;  %p7941_p2 = scmp.lt.s32.totalorder %s27_s22, %s27_s22 }
  0x24   :  { %p7937_p1 = scmp.ne.s32.totalorder %s27_s22, %s7936_s25  ;;  %p7942_p3 = scmp.lt.s32.totalorder %s7936_s25, %s7936_s25 }
  0x26   :  { %p7943_p4 = por %p7942_p3, %p7941_p2 }
  0x28   :  { %p7944_p5 = pnand %p7943_p4, %p7937_p1 }
  0x2a   :  { %7947 = shalt.err (!%p7944_p5)
}
  0x2b   :  { %s8042_s4 = smov 512   ;;  %s8043_s26 = smov 32  }
  0x2c   :  { %32 = dma.hbm_to_vmem [thread:$0]  %s8408_s1, 2048, %s27_s22, [#allocation3], %s8042_s4, %s8042_s4, %s8043_s26  }
  0x2d   :  { %s8044_s29 = smov [#allocation6]   ;;  %s8045_s10 = smov [#allocation9]  }
  0x2e   :  { %s48_s30 = sshll.u32 %s8044_s29, 4  ;;  %s70_s11 = sshll.u32 %s8045_s10, 4  ;;  %s49_s30 = int_to_ptr.vmem [resolvable:$true] %s48_s30  ;;  %s71_s11 = int_to_ptr.vmem [resolvable:$true] %s70_s11 }
  0x2f   :  { %s7956_s6 = scalar_lea.vmem %s49_s30, 65536  ;;  %p7961_p7 = scmp.lt.s32.totalorder %s49_s30, %s49_s30 }
  0x30   :  { %p7957_p6 = scmp.ne.s32.totalorder %s49_s30, %s7956_s6  ;;  %p7962_p8 = scmp.lt.s32.totalorder %s7956_s6, %s7956_s6 }
  0x32   :  { %p7963_p9 = por %p7962_p8, %p7961_p7 }
  0x34   :  { %p7964_p10 = pnand %p7963_p9, %p7957_p6 }
  0x36   :  { %7967 = shalt.err (!%p7964_p10)
}
  0x37   :  { %54 = dma.hbm_to_vmem [thread:$0]  %s8410_s3, 65536, %s49_s30, [#allocation5], %s8042_s4, %s8042_s4, %s8043_s26  }
  0x38   :  { %s7976_s14 = scalar_lea.vmem %s71_s11, 32768  ;;  %p7981_p12 = scmp.lt.s32.totalorder %s71_s11, %s71_s11 }
  0x39   :  { %p7977_p11 = scmp.ne.s32.totalorder %s71_s11, %s7976_s14  ;;  %p7982_p13 = scmp.lt.s32.totalorder %s7976_s14, %s7976_s14 }
  0x3b   :  { %p7983_p0 = por %p7982_p13, %p7981_p12 }
  0x3d   :  { %p7984_p1 = pnand %p7983_p0, %p7977_p11 }
  0x3f   :  { %7987 = shalt.err (!%p7984_p1)
}
  0x40   :  { %s8046_s1 = smov 256   ;;  %s8047_s15 = smov 16  }
  0x41   :  { %76 = dma.hbm_to_vmem [thread:$0]  %s8412_s5, 32768, %s71_s11, [#allocation8], %s8046_s1, %s8046_s1, %s8047_s15  }
  0x42   :  { %s8048_s18 = smov [#allocation12]  }
  0x43   :  { %s92_s19 = sshll.u32 %s8048_s18, 4  ;;  %s93_s19 = int_to_ptr.vmem [resolvable:$true] %s92_s19 }
  0x44   :  { %s7996_s20 = scalar_lea.vmem %s93_s19, 4096  ;;  %p8001_p3 = scmp.lt.s32.totalorder %s93_s19, %s93_s19 }
  0x45   :  { %p7997_p2 = scmp.ne.s32.totalorder %s93_s19, %s7996_s20  ;;  %p8002_p4 = scmp.lt.s32.totalorder %s7996_s20, %s7996_s20 }
  0x47   :  { %p8003_p5 = por %p8002_p4, %p8001_p3 }
  0x49   :  { %p8004_p6 = pnand %p8003_p5, %p7997_p2 }
  0x4b   :  { %8007 = shalt.err (!%p8004_p6)
}
  0x4c   :  { %s8049_s3 = smov 64   ;;  %s8050_s21 = smov 4  }
  0x4d   :  { %98 = dma.hbm_to_vmem [thread:$0]  %s8414_s7, 4096, %s93_s19, [#allocation11], %s8049_s3, %s8049_s3, %s8050_s21  }
  0x4e   :  { %s8051_s2 = smov [#allocation13]  }
  0x4f   :  { %s105_s24 = sshll.u32 %s8051_s2, 4  ;;  %s106_s24 = int_to_ptr.vmem [resolvable:$true] %s105_s24 }
  0x50   :  { %s8016_s5 = scalar_lea.vmem %s106_s24, 16  ;;  %s8020_s25 = scalar_lea.vmem %s106_s24, 32 }
  0x51   :  { %p8017_p7 = scmp.ne.s32.totalorder %s106_s24, %s8016_s5  ;;  %p8021_p8 = scmp.lt.s32.totalorder %s106_s24, %s106_s24 }
  0x52   :  { %p8022_p9 = scmp.lt.s32.totalorder %s8020_s25, %s8016_s5 }
  0x54   :  { %p8023_p10 = por %p8022_p9, %p8021_p8 }
  0x56   :  { %p8024_p11 = pnand %p8023_p10, %p8017_p7 }
  0x58   :  { %8027 = shalt.err (!%p8024_p11)
}
  0x59   :  { %108 = dma.hbm_to_vmem [thread:$0]  %s8415_s8, 16, %s106_s24, [#allocation14]  }
  0x5a   :  { %8028 = dma.done.wait [#allocation3], 2048  }
  0x5b   :  { %8029 = vsyncadd [#allocation3], 4294965248 }
  0x5c   :  { %8030 = dma.done.wait [#allocation5], 65664  }
  0x5d   :  { %8031 = vsyncadd [#allocation5], 4294901632 }
  0x5e   :  { %8032 = dma.done.wait [#allocation8], 32896  }
  0x5f   :  { %8033 = vsyncadd [#allocation8], 4294934400 }
  0x60   :  { %8034 = dma.done.wait [#allocation11], 4160  }
  0x61   :  { %8035 = vsyncadd [#allocation11], 4294963136 }
  0x62   :  { %8036 = dma.done.wait [#allocation14], 16  }
  0x63   :  { %8037 = vsyncadd [#allocation14], 4294967280  ;;  %v8052_v0 = vmov 0   ;;  %v145_v1 = vld [vmem:[#allocation2 + $0x40] sm:$0xff]  ;;  %v146_v3 = vld [vmem:[#allocation2 + $0x48] sm:$0xff]  ;;  %vm275_vm0 = vcmask 261120  }
  0x64   :  { %311 = vmatprep.mubr.bf16.mxu0 %v8052_v0  ;;  %354 = vmatprep.mubr.bf16.mxu1 %v8052_v0  ;;  %v149_v2 = vld [vmem:[#allocation2 + $0x60] sm:$0xff]  ;;  %v150_v5 = vld [vmem:[#allocation2 + $0x68] sm:$0xff]  ;;  %v147_v16 = vld [vmem:[#allocation2 + $0x50] sm:$0xff] }
  0x65   :  { %v6580_v4 = vcombine.high %v145_v1, %v149_v2  ;;  %v6579_v6 = vcombine.low %v145_v1, %v149_v2  ;;  %v137_v7 = vld [vmem:[#allocation2] sm:$0xff]  ;;  %v6582_v9 = vcombine.high %v146_v3, %v150_v5  ;;  %v6581_v10 = vcombine.low %v146_v3, %v150_v5  ;;  %v138_v12 = vld [vmem:[#allocation2 + $0x8] sm:$0xff]  ;;  %v151_v17 = vld [vmem:[#allocation2 + $0x70] sm:$0xff] }
  0x66   :  { %v141_v8 = vld [vmem:[#allocation2 + $0x20] sm:$0xff]  ;;  %v142_v13 = vld [vmem:[#allocation2 + $0x28] sm:$0xff]  ;;  %v148_v20 = vld [vmem:[#allocation2 + $0x58] sm:$0xff]  ;;  %v6584_v23 = vcombine.high %v147_v16, %v151_v17  ;;  %v6583_v30 = vcombine.low %v147_v16, %v151_v17 }
  0x67   :  { %v6572_v11 = vcombine.high %v137_v7, %v141_v8  ;;  %291 = vmatprep.subr.bf16.mxu0 %v6580_v4  ;;  %v6574_v14 = vcombine.high %v138_v12, %v142_v13  ;;  %v134_v15 = vld [vmem:[%s8407_s0] sm:$0xff]  ;;  %334 = vmatprep.subr.bf16.mxu1 %v6582_v9  ;;  %v6571_v18 = vcombine.low %v137_v7, %v141_v8  ;;  %v135_v19 = vld [vmem:[%s8407_s0 + $0x8] sm:$0xff]  ;;  %v152_v21 = vld [vmem:[#allocation2 + $0x78] sm:$0xff] }
  0x68   :  { %292 = vmatpush1.bf16.msra.mxu0 %v6579_v6  ;;  %335 = vmatpush1.bf16.msra.mxu1 %v6581_v10  ;;  %v6573_v22 = vcombine.low %v138_v12, %v142_v13  ;;  %v6586_v24 = vcombine.high %v148_v20, %v152_v21  ;;  %v139_v25 = vld [vmem:[#allocation2 + $0x10] sm:$0xff]  ;;  %v136_v27 = vpack.c.bf16 %v135_v19, %v134_v15  ;;  %v140_v28 = vld [vmem:[#allocation2 + $0x18] sm:$0xff]  ;;  %v531_v34 = vld [vmem:[#allocation6 + $0x1c0] sm:$0xff] }
  0x69   :  { %293 = vmatprep.subr.bf16.mxu0 %v6572_v11  ;;  %336 = vmatprep.subr.bf16.mxu1 %v6574_v14  ;;  %v143_v26 = vld [vmem:[#allocation2 + $0x30] sm:$0xff]  ;;  %v144_v29 = vld [vmem:[#allocation2 + $0x38] sm:$0xff]  ;;  %v6585_v31 = vcombine.low %v148_v20, %v152_v21  ;;  %v535_v35 = vld [vmem:[#allocation6 + $0x1e0] sm:$0xff] }
  0x6a   :  { %v6576_v32 = vcombine.high %v139_v25, %v143_v26  ;;  %v6578_v33 = vcombine.high %v140_v28, %v144_v29  ;;  %v659_v36 = vld [vmem:[#allocation6 + $0x5c0] sm:$0xff]  ;;  %v6575_v38 = vcombine.low %v139_v25, %v143_v26  ;;  %v6577_v39 = vcombine.low %v140_v28, %v144_v29 }
  0x6b   :  { %v663_v37 = vld [vmem:[#allocation6 + $0x5e0] sm:$0xff]  ;;  %v6648_v40 = vcombine.high %v531_v34, %v535_v35  ;;  %v6647_v46 = vcombine.low %v531_v34, %v535_v35 }
  0x6c   :  { %294 = vmatpush1.bf16.msra.mxu0 %v6571_v18  ;;  %337 = vmatpush1.bf16.msra.mxu1 %v6573_v22  ;;  %v6776_v41 = vcombine.high %v659_v36, %v663_v37  ;;  %v523_v42 = vld [vmem:[#allocation6 + $0x180] sm:$0xff]  ;;  %v6775_v47 = vcombine.low %v659_v36, %v663_v37 }
  0x6d   :  { %377 = vmatprep.subr.bf16.mxu0 %v6584_v23  ;;  %420 = vmatprep.subr.bf16.mxu1 %v6586_v24  ;;  %v527_v43 = vld [vmem:[#allocation6 + $0x1a0] sm:$0xff] }
  0x6e   :  { %v651_v44 = vld [vmem:[#allocation6 + $0x580] sm:$0xff]  ;;  %v6640_v48 = vcombine.high %v523_v42, %v527_v43  ;;  %v6639_v54 = vcombine.low %v523_v42, %v527_v43 }
  0x6f   :  { %6587 = vmatmul.mubr.msk.bf16.vlgmr.msra.gmra.mxu0 %vm275_vm0, %v136_v27  ;;  %6588 = vmatmul.mubr.msk.bf16.vlgmr.msra.gmra.mxu1 %vm275_vm0, %v136_v27  ;;  %v655_v45 = vld [vmem:[#allocation6 + $0x5a0] sm:$0xff] }
  0x70   :  { %378 = vmatpush1.bf16.msra.mxu0 %v6583_v30  ;;  %421 = vmatpush1.bf16.msra.mxu1 %v6585_v31  ;;  %v6768_v49 = vcombine.high %v651_v44, %v655_v45  ;;  %v515_v50 = vld [vmem:[#allocation6 + $0x140] sm:$0xff]  ;;  %v6767_v55 = vcombine.low %v651_v44, %v655_v45 }
  0x71   :  { %379 = vmatprep.subr.bf16.mxu0 %v6576_v32  ;;  %422 = vmatprep.subr.bf16.mxu1 %v6578_v33  ;;  %v519_v51 = vld [vmem:[#allocation6 + $0x160] sm:$0xff] }
  0x72   :  { %397 = vmatprep.mubr.bf16.mxu0 %v8052_v0  ;;  %440 = vmatprep.mubr.bf16.mxu1 %v8052_v0  ;;  %v643_v52 = vld [vmem:[#allocation6 + $0x540] sm:$0xff]  ;;  %v6632_v56 = vcombine.high %v515_v50, %v519_v51  ;;  %v6631_v62 = vcombine.low %v515_v50, %v519_v51 }
  0x73   :  { %v647_v53 = vld [vmem:[#allocation6 + $0x560] sm:$0xff] }
  0x74   :  { %380 = vmatpush1.bf16.msra.mxu0 %v6575_v38  ;;  %423 = vmatpush1.bf16.msra.mxu1 %v6577_v39  ;;  %v6760_v57 = vcombine.high %v643_v52, %v647_v53  ;;  %v507_v58 = vld [vmem:[#allocation6 + $0x100] sm:$0xff]  ;;  %v6759_v1 = vcombine.low %v643_v52, %v647_v53 }
  0x75   :  { %3589 = vmatprep.subr.bf16.mxu0 %v6648_v40  ;;  %3632 = vmatprep.subr.bf16.mxu1 %v6776_v41  ;;  %v511_v59 = vld [vmem:[#allocation6 + $0x120] sm:$0xff] }
  0x76   :  { %v635_v60 = vld [vmem:[#allocation6 + $0x500] sm:$0xff]  ;;  %v6624_v2 = vcombine.high %v507_v58, %v511_v59  ;;  %v6623_v6 = vcombine.low %v507_v58, %v511_v59 }
  0x77   :  { %6589 = vmatmul.mubr.msk.bf16.vlgmr.msra.gmra.mxu0 %vm275_vm0, %v136_v27  ;;  %6590 = vmatmul.mubr.msk.bf16.vlgmr.msra.gmra.mxu1 %vm275_vm0, %v136_v27  ;;  %v639_v61 = vld [vmem:[#allocation6 + $0x520] sm:$0xff] }
  0x78   :  { %3590 = vmatpush1.bf16.msra.mxu0 %v6647_v46  ;;  %3633 = vmatpush1.bf16.msra.mxu1 %v6775_v47  ;;  %v499_v63 = vld [vmem:[#allocation6 + $0xc0] sm:$0xff]  ;;  %v6752_v5 = vcombine.high %v635_v60, %v639_v61  ;;  %v6751_v9 = vcombine.low %v635_v60, %v639_v61 }
  0x79   :  { %3591 = vmatprep.subr.bf16.mxu0 %v6640_v48  ;;  %3634 = vmatprep.subr.bf16.mxu1 %v6768_v49  ;;  %v503_v0 = vld [vmem:[#allocation6 + $0xe0] sm:$0xff] }
  0x7a   :  { %v627_v3 = vld [vmem:[#allocation6 + $0x4c0] sm:$0xff]  ;;  %v6616_v10 = vcombine.high %v499_v63, %v503_v0  ;;  %v6615_v14 = vcombine.low %v499_v63, %v503_v0 }
  0x7b   :  { %v631_v4 = vld [vmem:[#allocation6 + $0x4e0] sm:$0xff] }
  0x7c   :  { %3592 = vmatpush1.bf16.msra.mxu0 %v6639_v54  ;;  %3635 = vmatpush1.bf16.msra.mxu1 %v6767_v55  ;;  %v491_v7 = vld [vmem:[#allocation6 + $0x80] sm:$0xff]  ;;  %v6744_v13 = vcombine.high %v627_v3, %v631_v4  ;;  %v6743_v17 = vcombine.low %v627_v3, %v631_v4 }
  0x7d   :  { %3593 = vmatprep.subr.bf16.mxu0 %v6632_v56  ;;  %3636 = vmatprep.subr.bf16.mxu1 %v6760_v57  ;;  %v495_v8 = vld [vmem:[#allocation6 + $0xa0] sm:$0xff] }
  0x7e   :  { %v619_v11 = vld [vmem:[#allocation6 + $0x480] sm:$0xff]  ;;  %v6608_v18 = vcombine.high %v491_v7, %v495_v8  ;;  %v6607_v22 = vcombine.low %v491_v7, %v495_v8 }
  0x7f   :  { %v623_v12 = vld [vmem:[#allocation6 + $0x4a0] sm:$0xff] }
  0x80   :  { %3594 = vmatpush1.bf16.msra.mxu0 %v6631_v62  ;;  %3637 = vmatpush1.bf16.msra.mxu1 %v6759_v1  ;;  %v483_v15 = vld [vmem:[#allocation6 + $0x40] sm:$0xff]  ;;  %v6736_v21 = vcombine.high %v619_v11, %v623_v12  ;;  %v6735_v25 = vcombine.low %v619_v11, %v623_v12 }
  0x81   :  { %3595 = vmatprep.subr.bf16.mxu0 %v6624_v2  ;;  %3638 = vmatprep.subr.bf16.mxu1 %v6752_v5  ;;  %v487_v16 = vld [vmem:[#allocation6 + $0x60] sm:$0xff] }
  0x82   :  { %v611_v19 = vld [vmem:[#allocation6 + $0x440] sm:$0xff]  ;;  %v6600_v26 = vcombine.high %v483_v15, %v487_v16  ;;  %v6599_v30 = vcombine.low %v483_v15, %v487_v16 }
  0x83   :  { %v615_v20 = vld [vmem:[#allocation6 + $0x460] sm:$0xff] }
  0x84   :  { %3596 = vmatpush1.bf16.msra.mxu0 %v6623_v6  ;;  %3639 = vmatpush1.bf16.msra.mxu1 %v6751_v9  ;;  %v475_v23 = vld [vmem:[#allocation6] sm:$0xff]  ;;  %v6728_v29 = vcombine.high %v611_v19, %v615_v20  ;;  %v6727_v33 = vcombine.low %v611_v19, %v615_v20 }
  0x85   :  { %3597 = vmatprep.subr.bf16.mxu0 %v6616_v10  ;;  %3640 = vmatprep.subr.bf16.mxu1 %v6744_v13  ;;  %v479_v24 = vld [vmem:[#allocation6 + $0x20] sm:$0xff] }
  0x86   :  { %v603_v27 = vld [vmem:[#allocation6 + $0x400] sm:$0xff]  ;;  %v6592_v34 = vcombine.high %v475_v23, %v479_v24  ;;  %v6591_v38 = vcombine.low %v475_v23, %v479_v24 }
  0x87   :  { %v607_v28 = vld [vmem:[#allocation6 + $0x420] sm:$0xff] }
  0x88   :  { %3598 = vmatpush1.bf16.msra.mxu0 %v6615_v14  ;;  %3641 = vmatpush1.bf16.msra.mxu1 %v6743_v17  ;;  %v595_v31 = vld [vmem:[#allocation6 + $0x3c0] sm:$0xff]  ;;  %v6720_v37 = vcombine.high %v603_v27, %v607_v28  ;;  %v6719_v41 = vcombine.low %v603_v27, %v607_v28 }
  0x89   :  { %3599 = vmatprep.subr.bf16.mxu0 %v6608_v18  ;;  %3642 = vmatprep.subr.bf16.mxu1 %v6736_v21  ;;  %v599_v32 = vld [vmem:[#allocation6 + $0x3e0] sm:$0xff] }
  0x8a   :  { %v723_v35 = vld [vmem:[#allocation6 + $0x7c0] sm:$0xff]  ;;  %v6712_v42 = vcombine.high %v595_v31, %v599_v32  ;;  %v6711_v46 = vcombine.low %v595_v31, %v599_v32 }
  0x8b   :  { %v727_v36 = vld [vmem:[#allocation6 + $0x7e0] sm:$0xff] }
  0x8c   :  { %3600 = vmatpush1.bf16.msra.mxu0 %v6607_v22  ;;  %3643 = vmatpush1.bf16.msra.mxu1 %v6735_v25  ;;  %v587_v39 = vld [vmem:[#allocation6 + $0x380] sm:$0xff]  ;;  %v6840_v45 = vcombine.high %v723_v35, %v727_v36  ;;  %v6839_v49 = vcombine.low %v723_v35, %v727_v36 }
  0x8d   :  { %3601 = vmatprep.subr.bf16.mxu0 %v6600_v26  ;;  %3644 = vmatprep.subr.bf16.mxu1 %v6728_v29  ;;  %v591_v40 = vld [vmem:[#allocation6 + $0x3a0] sm:$0xff] }
  0x8e   :  { %v715_v43 = vld [vmem:[#allocation6 + $0x780] sm:$0xff]  ;;  %v6704_v50 = vcombine.high %v587_v39, %v591_v40  ;;  %v6703_v54 = vcombine.low %v587_v39, %v591_v40 }
  0x8f   :  { %v719_v44 = vld [vmem:[#allocation6 + $0x7a0] sm:$0xff] }
  0x90   :  { %3602 = vmatpush1.bf16.msra.mxu0 %v6599_v30  ;;  %3645 = vmatpush1.bf16.msra.mxu1 %v6727_v33  ;;  %v579_v47 = vld [vmem:[#allocation6 + $0x340] sm:$0xff]  ;;  %v6832_v53 = vcombine.high %v715_v43, %v719_v44  ;;  %v6831_v57 = vcombine.low %v715_v43, %v719_v44  ;;  %v155_v44 = vlaneseq }
  0x91   :  { %3603 = vmatprep.subr.bf16.mxu0 %v6592_v34  ;;  %3646 = vmatprep.subr.bf16.mxu1 %v6720_v37  ;;  %v583_v48 = vld [vmem:[#allocation6 + $0x360] sm:$0xff] }
  0x92   :  { %v707_v51 = vld [vmem:[#allocation6 + $0x740] sm:$0xff]  ;;  %v6696_v58 = vcombine.high %v579_v47, %v583_v48  ;;  %v6695_v62 = vcombine.low %v579_v47, %v583_v48 }
  0x93   :  { %v711_v52 = vld [vmem:[#allocation6 + $0x760] sm:$0xff] }
  0x94   :  { %3604 = vmatpush1.bf16.msra.mxu0 %v6591_v38  ;;  %3647 = vmatpush1.bf16.msra.mxu1 %v6719_v41  ;;  %v571_v55 = vld [vmem:[#allocation6 + $0x300] sm:$0xff]  ;;  %v6824_v61 = vcombine.high %v707_v51, %v711_v52  ;;  %v6823_v1 = vcombine.low %v707_v51, %v711_v52 }
  0x95   :  { %3605 = vmatprep.subr.bf16.mxu0 %v6712_v42  ;;  %3648 = vmatprep.subr.bf16.mxu1 %v6840_v45  ;;  %v575_v56 = vld [vmem:[#allocation6 + $0x320] sm:$0xff]  ;;  %v8157_v45 = vshrl.u32 %v155_v44, 7 }
  0x96   :  { %v699_v59 = vld [vmem:[#allocation6 + $0x700] sm:$0xff]  ;;  %v6688_v2 = vcombine.high %v571_v55, %v575_v56  ;;  %v6687_v6 = vcombine.low %v571_v55, %v575_v56 }
  0x97   :  { %v703_v60 = vld [vmem:[#allocation6 + $0x720] sm:$0xff]  ;;  %v8163_v47 = vsub.s32 0, %v8157_v45  ;;  %v8166_v48 = vsub.s32 3, %v8157_v45 }
  0x98   :  { %3606 = vmatpush2.bf16.msra.mxu0 %v6711_v46  ;;  %3649 = vmatpush2.bf16.msra.mxu1 %v6839_v49  ;;  %v563_v63 = vld [vmem:[#allocation6 + $0x2c0] sm:$0xff]  ;;  %v6816_v5 = vcombine.high %v699_v59, %v703_v60  ;;  %v6815_v7 = vcombine.low %v699_v59, %v703_v60  ;;  %v8160_v46 = vsub.s32 1, %v8157_v45  ;;  %v8168_v49 = vld [vmem:[#allocation4] sm:$0xff]  ;;  %v177_v59 = vsub.s32 5, %v8157_v45 }
  0x99   :  { %3607 = vmatprep.subr.bf16.mxu0 %v6704_v50  ;;  %3650 = vmatprep.subr.bf16.mxu1 %v6832_v53  ;;  %v567_v0 = vld [vmem:[#allocation6 + $0x2e0] sm:$0xff]  ;;  %v8171_v50 = vsub.s32 2, %v8157_v45  ;;  %v170_v56 = vrot.slane %v8168_v49, %v8166_v48 }
  0x9a   :  { %v691_v3 = vld [vmem:[#allocation6 + $0x6c0] sm:$0xff]  ;;  %v6680_v8 = vcombine.high %v563_v63, %v567_v0  ;;  %v6679_v10 = vcombine.low %v563_v63, %v567_v0  ;;  %v162_v53 = vrot.slane %v8168_v49, %v8160_v46 }
  0x9b   :  { %v695_v4 = vld [vmem:[#allocation6 + $0x6e0] sm:$0xff] }
  0x9c   :  { %3608 = vmatpush2.bf16.msra.mxu0 %v6703_v54  ;;  %3651 = vmatpush2.bf16.msra.mxu1 %v6831_v57  ;;  %v6808_v9 = vcombine.high %v691_v3, %v695_v4  ;;  %v6807_v11 = vcombine.low %v691_v3, %v695_v4  ;;  %v555_v12 = vld [vmem:[#allocation6 + $0x280] sm:$0xff]  ;;  %v158_v54 = vrot.slane %v8168_v49, %v8163_v47 }
  0x9d   :  { %3609 = vmatprep.subr.bf16.mxu0 %v6696_v58  ;;  %3652 = vmatprep.subr.bf16.mxu1 %v6824_v61  ;;  %v559_v13 = vld [vmem:[#allocation6 + $0x2a0] sm:$0xff]  ;;  %v166_v57 = vrot.slane %v8168_v49, %v8171_v50  ;;  %v185_v61 = vsub.s32 7, %v8157_v45 }
  0x9e   :  { %v683_v14 = vld [vmem:[#allocation6 + $0x680] sm:$0xff]  ;;  %v6672_v15 = vcombine.high %v555_v12, %v559_v13  ;;  %v6671_v17 = vcombine.low %v555_v12, %v559_v13 }
  0x9f   :  { %v687_v16 = vld [vmem:[#allocation6 + $0x6a0] sm:$0xff]  ;;  %v186_v12 = vrot.slane %v8168_v49, %v185_v61 }
  0xa0   :  { %3610 = vmatpush2.bf16.msra.mxu0 %v6695_v62  ;;  %3653 = vmatpush2.bf16.msra.mxu1 %v6823_v1  ;;  %v6799_v18 = vcombine.low %v683_v14, %v687_v16  ;;  %v6800_v19 = vcombine.high %v683_v14, %v687_v16  ;;  %v547_v20 = vld [vmem:[#allocation6 + $0x240] sm:$0xff] }
  0xa1   :  { %3611 = vmatprep.subr.bf16.mxu0 %v6688_v2  ;;  %3654 = vmatprep.subr.bf16.mxu1 %v6816_v5  ;;  %v551_v21 = vld [vmem:[#allocation6 + $0x260] sm:$0xff] }
  0xa2   :  { %v675_v22 = vld [vmem:[#allocation6 + $0x640] sm:$0xff]  ;;  %v6664_v23 = vcombine.high %v547_v20, %v551_v21  ;;  %v6663_v25 = vcombine.low %v547_v20, %v551_v21 }
  0xa3   :  { %v679_v24 = vld [vmem:[#allocation6 + $0x660] sm:$0xff] }
  0xa4   :  { %3612 = vmatpush2.bf16.msra.mxu0 %v6687_v6  ;;  %3655 = vmatpush2.bf16.msra.mxu1 %v6815_v7  ;;  %v6791_v26 = vcombine.low %v675_v22, %v679_v24  ;;  %v6792_v27 = vcombine.high %v675_v22, %v679_v24  ;;  %v539_v28 = vld [vmem:[#allocation6 + $0x200] sm:$0xff] }
  0xa5   :  { %3613 = vmatprep.subr.bf16.mxu0 %v6680_v8  ;;  %3656 = vmatprep.subr.bf16.mxu1 %v6808_v9  ;;  %v543_v29 = vld [vmem:[#allocation6 + $0x220] sm:$0xff]  ;;  %v178_v8 = vrot.slane %v8168_v49, %v177_v59 }
  0xa6   :  { %v667_v30 = vld [vmem:[#allocation6 + $0x600] sm:$0xff]  ;;  %v6656_v31 = vcombine.high %v539_v28, %v543_v29  ;;  %v6655_v33 = vcombine.low %v539_v28, %v543_v29 }
  0xa7   :  { %v671_v32 = vld [vmem:[#allocation6 + $0x620] sm:$0xff] }
  0xa8   :  { %3614 = vmatpush2.bf16.msra.mxu0 %v6679_v10  ;;  %3657 = vmatpush2.bf16.msra.mxu1 %v6807_v11  ;;  %v6783_v34 = vcombine.low %v667_v30, %v671_v32  ;;  %v6784_v35 = vcombine.high %v667_v30, %v671_v32  ;;  %v8141_v36 = vld [vmem:[#allocation6 + $0x9c0] sm:$0xff] }
  0xa9   :  { %3615 = vmatprep.subr.bf16.mxu0 %v6672_v15  ;;  %3658 = vmatprep.subr.bf16.mxu1 %v6800_v19  ;;  %v8143_v37 = vld [vmem:[#allocation6 + $0x9e0] sm:$0xff] }
  0xaa   :  { %v8145_v38 = vld [vmem:[#allocation6 + $0xdc0] sm:$0xff]  ;;  %v6904_v39 = vcombine.high %v8141_v36, %v8143_v37  ;;  %v6903_v41 = vcombine.low %v8141_v36, %v8143_v37 }
  0xab   :  { %v8149_v40 = vld [vmem:[#allocation6 + $0xde0] sm:$0xff] }
  0xac   :  { %3616 = vmatpush2.bf16.msra.mxu0 %v6671_v17  ;;  %3659 = vmatpush2.bf16.msra.mxu1 %v6799_v18  ;;  %v7031_v42 = vcombine.low %v8145_v38, %v8149_v40  ;;  %v7032_v43 = vcombine.high %v8145_v38, %v8149_v40  ;;  %v779_v16 = vld [vmem:[#allocation6 + $0x980] sm:$0xff] }
  0xad   :  { %3617 = vmatprep.subr.bf16.mxu0 %v6664_v23  ;;  %3660 = vmatprep.subr.bf16.mxu1 %v6792_v27  ;;  %v783_v17 = vld [vmem:[#allocation6 + $0x9a0] sm:$0xff] }
  0xae   :  { %v907_v22 = vld [vmem:[#allocation6 + $0xd80] sm:$0xff] }
  0xaf   :  { %v911_v23 = vld [vmem:[#allocation6 + $0xda0] sm:$0xff] }
  0xb0   :  { %3618 = vmatpush2.bf16.msra.mxu0 %v6663_v25  ;;  %3661 = vmatpush2.bf16.msra.mxu1 %v6791_v26  ;;  %v891_v36 = vld [vmem:[#allocation6 + $0xd00] sm:$0xff] }
  0xb1   :  { %3619 = vmatprep.subr.bf16.mxu0 %v6656_v31  ;;  %3662 = vmatprep.subr.bf16.mxu1 %v6784_v35  ;;  %v6896_v31 = vcombine.high %v779_v16, %v783_v17  ;;  %v7024_v35 = vcombine.high %v907_v22, %v911_v23  ;;  %v895_v37 = vld [vmem:[#allocation6 + $0xd20] sm:$0xff] }
  0xb4   :  { %3620 = vmatpush2.bf16.msra.mxu0 %v6655_v33  ;;  %3663 = vmatpush2.bf16.msra.mxu1 %v6783_v34 }
  0xb5   :  { %3675 = vmatprep.subr.bf16.mxu0 %v6904_v39  ;;  %3718 = vmatprep.subr.bf16.mxu1 %v7032_v43  ;;  %v771_v39 = vld [vmem:[#allocation6 + $0x940] sm:$0xff] }
  0xb6   :  { %v775_v43 = vld [vmem:[#allocation6 + $0x960] sm:$0xff] }
 0x12f   :  { %v313_v51 = vpop.f32.mrf.mxu0  ;;  %v356_v52 = vpop.f32.mrf.mxu1 }
 0x130   :  { %v314_v1 = vadd.f32 %v313_v51, %v158_v54  ;;  %v357_v5 = vadd.f32 %v356_v52, %v166_v57  ;;  %v899_v51 = vld [vmem:[#allocation6 + $0xd40] sm:$0xff] }
 0x131   :  { %v315_v55 = vpop.f32.mrf.mxu0  ;;  %v358_v58 = vpop.f32.mrf.mxu1  ;;  %v903_v52 = vld [vmem:[#allocation6 + $0xd60] sm:$0xff] }
 0x132   :  { %v316_v62 = vadd.f32 %v315_v55, %v162_v53  ;;  %v359_v2 = vadd.f32 %v358_v58, %v170_v56  ;;  %v451_v19 = vmax.f32 %v314_v1, 0.0  ;;  %v453_v25 = vmax.f32 %v357_v5, 0.0  ;;  %v763_v1 = vld [vmem:[#allocation6 + $0x900] sm:$0xff] }
 0x133   :  { %v317_v60 = vpop.f32.mrf.mxu0  ;;  %v360_v0 = vpop.f32.mrf.mxu1  ;;  %v7023_v58 = vcombine.low %v907_v22, %v911_v23  ;;  %v7015_v38 = vcombine.low %v899_v51, %v903_v52 }
 0x134   :  { %v318_v63 = vadd.f32 %v317_v60, %v158_v54  ;;  %v361_v3 = vadd.f32 %v360_v0, %v166_v57  ;;  %v452_v13 = vmax.f32 %v316_v62, 0.0  ;;  %v454_v20 = vmax.f32 %v359_v2, 0.0  ;;  %v767_v2 = vld [vmem:[#allocation6 + $0x920] sm:$0xff] }
 0x135   :  { %v319_v4 = vpop.f32.mrf.mxu0  ;;  %v362_v7 = vpop.f32.mrf.mxu1  ;;  %v6895_v54 = vcombine.low %v779_v16, %v783_v17  ;;  %v6888_v60 = vcombine.high %v771_v39, %v775_v43  ;;  %v7016_v0 = vcombine.high %v899_v51, %v903_v52  ;;  %v6880_v40 = vcombine.high %v763_v1, %v767_v2  ;;  %v747_v16 = vld [vmem:[#allocation6 + $0x880] sm:$0xff] }
 0x136   :  { %v320_v6 = vadd.f32 %v319_v4, %v162_v53  ;;  %v459_v9 = vmax.f32 %v318_v63, 0.0  ;;  %v363_v10 = vadd.f32 %v362_v7, %v170_v56  ;;  %v461_v14 = vmax.f32 %v361_v3, 0.0  ;;  %v755_v7 = vld [vmem:[#allocation6 + $0x8c0] sm:$0xff] }
 0x137   :  { %v8186_v11 = vpop.f32.mrf.mxu0  ;;  %v8191_v18 = vpop.f32.mrf.mxu1  ;;  %v6887_v4 = vcombine.low %v771_v39, %v775_v43  ;;  %v751_v17 = vld [vmem:[#allocation6 + $0x8a0] sm:$0xff] }
 0x138   :  { %v460_v15 = vmax.f32 %v320_v6, 0.0  ;;  %v462_v21 = vmax.f32 %v363_v10, 0.0  ;;  %v8195_v29 = vpack.c.bf16 %v459_v9, %v451_v19  ;;  %v8201_v34 = vpack.c.bf16 %v461_v14, %v453_v25  ;;  %v883_v9 = vld [vmem:[#allocation6 + $0xcc0] sm:$0xff] }
 0x139   :  { %v401_v24 = vpop.f32.mrf.mxu0  ;;  %v444_v28 = vpop.f32.mrf.mxu1  ;;  %v7008_v6 = vcombine.high %v891_v36, %v895_v37  ;;  %v887_v10 = vld [vmem:[#allocation6 + $0xce0] sm:$0xff]  ;;  %v6864_v23 = vcombine.high %v747_v16, %v751_v17 }
 0x13a   :  { %v8193_v26 = vpack.c.bf16 %v460_v15, %v452_v13  ;;  %v402_v27 = vadd.f32 %v401_v24, %v178_v8  ;;  %v8197_v30 = vpack.c.bf16 %v462_v21, %v454_v20  ;;  %v445_v33 = vadd.f32 %v444_v28, %v186_v12  ;;  %v875_v19 = vld [vmem:[#allocation6 + $0xc80] sm:$0xff] }
 0x13b   :  { %v8199_v32 = vpop.f32.mrf.mxu0  ;;  %v8204_v44 = vpop.f32.mrf.mxu1  ;;  %v7007_v13 = vcombine.low %v891_v36, %v895_v37  ;;  %v7000_v15 = vcombine.high %v883_v9, %v887_v10  ;;  %v879_v20 = vld [vmem:[#allocation6 + $0xca0] sm:$0xff]  ;;  %v6999_v22 = vcombine.low %v883_v9, %v887_v10 }
 0x13c   :  { %3621 = vmatprep.mubr.bf16.mxu0 %v8193_v26  ;;  %3664 = vmatprep.mubr.bf16.mxu1 %v8197_v30  ;;  %v456_v55 = vmax.f32 %v402_v27, 0.0  ;;  %v458_v62 = vmax.f32 %v445_v33, 0.0  ;;  %v6992_v24 = vcombine.high %v875_v19, %v879_v20  ;;  %v739_v25 = vld [vmem:[#allocation6 + $0x840] sm:$0xff]  ;;  %v6863_v33 = vcombine.low %v747_v16, %v751_v17 }
 0x13d   :  { %3622 = vmatmul.mubr.bf16.vlgmr.msra.gmra.mxu0 %v8195_v29  ;;  %v405_v53 = vpop.f32.mrf.mxu0  ;;  %3665 = vmatmul.mubr.bf16.vlgmr.msra.gmra.mxu1 %v8201_v34  ;;  %v448_v57 = vpop.f32.mrf.mxu1  ;;  %v743_v27 = vld [vmem:[#allocation6 + $0x860] sm:$0xff] }
 0x13e   :  { %3676 = vmatpush1.bf16.msra.mxu0 %v6903_v41  ;;  %v406_v56 = vadd.f32 %v405_v53, %v178_v8  ;;  %3719 = vmatpush1.bf16.msra.mxu1 %v7031_v42  ;;  %v449_v63 = vadd.f32 %v448_v57, %v186_v12  ;;  %v759_v8 = vld [vmem:[#allocation6 + $0x8e0] sm:$0xff]  ;;  %v6879_v12 = vcombine.low %v763_v1, %v767_v2 }
 0x13f   :  { %3677 = vmatprep.subr.bf16.mxu0 %v6896_v31  ;;  %3720 = vmatprep.subr.bf16.mxu1 %v7024_v35  ;;  %v6872_v14 = vcombine.high %v755_v7, %v759_v8  ;;  %v6871_v21 = vcombine.low %v755_v7, %v759_v8  ;;  %v867_v28 = vld [vmem:[#allocation6 + $0xc40] sm:$0xff]  ;;  %v6991_v35 = vcombine.low %v875_v19, %v879_v20 }
 0x140   :  { %v464_v3 = vmax.f32 %v406_v56, 0.0  ;;  %v466_v41 = vmax.f32 %v449_v63, 0.0  ;;  %v871_v31 = vld [vmem:[#allocation6 + $0xc60] sm:$0xff]  ;;  %v6856_v39 = vcombine.high %v739_v25, %v743_v27 }
 0x141   :  { %v6984_v43 = vcombine.high %v867_v28, %v871_v31  ;;  %v731_v51 = vld [vmem:[#allocation6 + $0x800] sm:$0xff]  ;;  %v6983_v56 = vcombine.low %v867_v28, %v871_v31 }
 0x142   :  { %3678 = vmatpush1.bf16.msra.mxu0 %v6895_v54  ;;  %v8215_v5 = vpack.c.bf16 %v464_v3, %v456_v55  ;;  %3721 = vmatpush1.bf16.msra.mxu1 %v7023_v58  ;;  %v8217_v42 = vpack.c.bf16 %v466_v41, %v458_v62  ;;  %v735_v52 = vld [vmem:[#allocation6 + $0x820] sm:$0xff]  ;;  %v6855_v55 = vcombine.low %v739_v25, %v743_v27 }
 0x143   :  { %3679 = vmatprep.subr.bf16.mxu0 %v6888_v60  ;;  %3722 = vmatprep.subr.bf16.mxu1 %v7016_v0  ;;  %v859_v53 = vld [vmem:[#allocation6 + $0xc00] sm:$0xff]  ;;  %v6848_v57 = vcombine.high %v731_v51, %v735_v52  ;;  %v6847_v1 = vcombine.low %v731_v51, %v735_v52 }
 0x144   :  { %3707 = vmatprep.mubr.bf16.mxu0 %v8215_v5  ;;  %3750 = vmatprep.mubr.bf16.mxu1 %v8217_v42  ;;  %v863_v54 = vld [vmem:[#allocation6 + $0xc20] sm:$0xff] }
 0x145   :  { %v6976_v58 = vcombine.high %v859_v53, %v863_v54  ;;  %v851_v60 = vld [vmem:[#allocation6 + $0xbc0] sm:$0xff]  ;;  %v6975_v2 = vcombine.low %v859_v53, %v863_v54 }
 0x146   :  { %3680 = vmatpush1.bf16.msra.mxu0 %v6887_v4  ;;  %3723 = vmatpush1.bf16.msra.mxu1 %v7015_v38  ;;  %v855_v62 = vld [vmem:[#allocation6 + $0xbe0] sm:$0xff] }
 0x147   :  { %3681 = vmatprep.subr.bf16.mxu0 %v6880_v40  ;;  %3724 = vmatprep.subr.bf16.mxu1 %v7008_v6  ;;  %v979_v63 = vld [vmem:[#allocation6 + $0xfc0] sm:$0xff]  ;;  %v6968_v3 = vcombine.high %v851_v60, %v855_v62  ;;  %v6967_v40 = vcombine.low %v851_v60, %v855_v62 }
 0x148   :  { %v983_v0 = vld [vmem:[#allocation6 + $0xfe0] sm:$0xff] }
 0x149   :  { %v7096_v36 = vcombine.high %v979_v63, %v983_v0  ;;  %v843_v37 = vld [vmem:[#allocation6 + $0xb80] sm:$0xff]  ;;  %v7095_v6 = vcombine.low %v979_v63, %v983_v0  ;;  %v181_v63 = vsub.s32 6, %v8157_v45 }
 0x14a   :  { %3682 = vmatpush1.bf16.msra.mxu0 %v6879_v12  ;;  %3725 = vmatpush1.bf16.msra.mxu1 %v7007_v13  ;;  %v847_v41 = vld [vmem:[#allocation6 + $0xba0] sm:$0xff] }
 0x14b   :  { %3683 = vmatprep.subr.bf16.mxu0 %v6872_v14  ;;  %3726 = vmatprep.subr.bf16.mxu1 %v7000_v15  ;;  %v971_v4 = vld [vmem:[#allocation6 + $0xf80] sm:$0xff]  ;;  %v6960_v7 = vcombine.high %v843_v37, %v847_v41  ;;  %v6959_v14 = vcombine.low %v843_v37, %v847_v41 }
 0x14c   :  { %v975_v38 = vld [vmem:[#allocation6 + $0xfa0] sm:$0xff] }
 0x14d   :  { %v7088_v8 = vcombine.high %v971_v4, %v975_v38  ;;  %v835_v9 = vld [vmem:[#allocation6 + $0xb40] sm:$0xff]  ;;  %v7087_v15 = vcombine.low %v971_v4, %v975_v38 }
 0x14e   :  { %3684 = vmatpush1.bf16.msra.mxu0 %v6871_v21  ;;  %3727 = vmatpush1.bf16.msra.mxu1 %v6999_v22  ;;  %v839_v10 = vld [vmem:[#allocation6 + $0xb60] sm:$0xff] }
 0x14f   :  { %3685 = vmatprep.subr.bf16.mxu0 %v6864_v23  ;;  %3728 = vmatprep.subr.bf16.mxu1 %v6992_v24  ;;  %v963_v12 = vld [vmem:[#allocation6 + $0xf40] sm:$0xff]  ;;  %v6952_v16 = vcombine.high %v835_v9, %v839_v10  ;;  %v6951_v23 = vcombine.low %v835_v9, %v839_v10 }
 0x150   :  { %v967_v13 = vld [vmem:[#allocation6 + $0xf60] sm:$0xff] }
 0x151   :  { %v7080_v17 = vcombine.high %v963_v12, %v967_v13  ;;  %v827_v19 = vld [vmem:[#allocation6 + $0xb00] sm:$0xff]  ;;  %v7079_v24 = vcombine.low %v963_v12, %v967_v13 }
 0x152   :  { %3686 = vmatpush1.bf16.msra.mxu0 %v6863_v33  ;;  %3729 = vmatpush1.bf16.msra.mxu1 %v6991_v35  ;;  %v831_v20 = vld [vmem:[#allocation6 + $0xb20] sm:$0xff] }
 0x153   :  { %3687 = vmatprep.subr.bf16.mxu0 %v6856_v39  ;;  %3730 = vmatprep.subr.bf16.mxu1 %v6984_v43  ;;  %v955_v21 = vld [vmem:[#allocation6 + $0xf00] sm:$0xff]  ;;  %v6944_v25 = vcombine.high %v827_v19, %v831_v20  ;;  %v6943_v39 = vcombine.low %v827_v19, %v831_v20  ;;  %v532_v20 = vld [vmem:[#allocation6 + $0x1c8] sm:$0xff] }
 0x154   :  { %v959_v22 = vld [vmem:[#allocation6 + $0xf20] sm:$0xff] }
 0x155   :  { %v7072_v27 = vcombine.high %v955_v21, %v959_v22  ;;  %v819_v28 = vld [vmem:[#allocation6 + $0xac0] sm:$0xff]  ;;  %v7071_v43 = vcombine.low %v955_v21, %v959_v22  ;;  %v536_v21 = vld [vmem:[#allocation6 + $0x1e8] sm:$0xff] }
 0x156   :  { %3688 = vmatpush1.bf16.msra.mxu0 %v6855_v55  ;;  %3731 = vmatpush1.bf16.msra.mxu1 %v6983_v56  ;;  %v823_v31 = vld [vmem:[#allocation6 + $0xae0] sm:$0xff]  ;;  %v660_v22 = vld [vmem:[#allocation6 + $0x5c8] sm:$0xff] }
 0x157   :  { %3689 = vmatprep.subr.bf16.mxu0 %v6848_v57  ;;  %3732 = vmatprep.subr.bf16.mxu1 %v6976_v58  ;;  %v947_v33 = vld [vmem:[#allocation6 + $0xec0] sm:$0xff]  ;;  %v6936_v51 = vcombine.high %v819_v28, %v823_v31  ;;  %v6935_v57 = vcombine.low %v819_v28, %v823_v31  ;;  %v173_v58 = vsub.s32 4, %v8157_v45 }
 0x158   :  { %v951_v35 = vld [vmem:[#allocation6 + $0xee0] sm:$0xff] }
 0x159   :  { %v7064_v52 = vcombine.high %v947_v33, %v951_v35  ;;  %v811_v53 = vld [vmem:[#allocation6 + $0xa80] sm:$0xff]  ;;  %v7063_v60 = vcombine.low %v947_v33, %v951_v35  ;;  %v174_v41 = vrot.slane %v8168_v49, %v173_v58  ;;  %v524_v33 = vld [vmem:[#allocation6 + $0x188] sm:$0xff]  ;;  %v6649_v35 = vcombine.low %v532_v20, %v536_v21 }
 0x15a   :  { %3690 = vmatpush1.bf16.msra.mxu0 %v6847_v1  ;;  %3733 = vmatpush1.bf16.msra.mxu1 %v6975_v2  ;;  %v815_v54 = vld [vmem:[#allocation6 + $0xaa0] sm:$0xff] }
 0x15b   :  { %3691 = vmatprep.subr.bf16.mxu0 %v6968_v3  ;;  %3734 = vmatprep.subr.bf16.mxu1 %v7096_v36  ;;  %v939_v55 = vld [vmem:[#allocation6 + $0xe80] sm:$0xff]  ;;  %v6928_v62 = vcombine.high %v811_v53, %v815_v54  ;;  %v6927_v37 = vcombine.low %v811_v53, %v815_v54 }
 0x15c   :  { %v943_v56 = vld [vmem:[#allocation6 + $0xea0] sm:$0xff] }
 0x15d   :  { %v7056_v0 = vcombine.high %v939_v55, %v943_v56  ;;  %v803_v1 = vld [vmem:[#allocation6 + $0xa40] sm:$0xff]  ;;  %v7055_v4 = vcombine.low %v939_v55, %v943_v56  ;;  %v516_v55 = vld [vmem:[#allocation6 + $0x148] sm:$0xff] }
 0x15e   :  { %3692 = vmatpush2.bf16.msra.mxu0 %v6967_v40  ;;  %3735 = vmatpush2.bf16.msra.mxu1 %v7095_v6  ;;  %v807_v2 = vld [vmem:[#allocation6 + $0xa60] sm:$0xff]  ;;  %v182_v40 = vrot.slane %v8168_v49, %v181_v63  ;;  %v520_v56 = vld [vmem:[#allocation6 + $0x168] sm:$0xff] }
 0x15f   :  { %3693 = vmatprep.subr.bf16.mxu0 %v6960_v7  ;;  %3736 = vmatprep.subr.bf16.mxu1 %v7088_v8  ;;  %v931_v3 = vld [vmem:[#allocation6 + $0xe40] sm:$0xff]  ;;  %v6920_v38 = vcombine.high %v803_v1, %v807_v2  ;;  %v6919_v12 = vcombine.low %v803_v1, %v807_v2  ;;  %v6634_v2 = vcombine.high %v516_v55, %v520_v56 }
 0x160   :  { %v935_v36 = vld [vmem:[#allocation6 + $0xe60] sm:$0xff]  ;;  %v447_v49 = vadd.f32 %v8204_v44, %v182_v40  ;;  %v528_v44 = vld [vmem:[#allocation6 + $0x1a8] sm:$0xff] }
 0x161   :  { %v7048_v6 = vcombine.high %v931_v3, %v935_v36  ;;  %v795_v7 = vld [vmem:[#allocation6 + $0xa00] sm:$0xff]  ;;  %v7047_v13 = vcombine.low %v931_v3, %v935_v36  ;;  %v6642_v54 = vcombine.high %v524_v33, %v528_v44  ;;  %v508_v36 = vld [vmem:[#allocation6 + $0x108] sm:$0xff] }
 0x162   :  { %3694 = vmatpush2.bf16.msra.mxu0 %v6959_v14  ;;  %3737 = vmatpush2.bf16.msra.mxu1 %v7087_v15  ;;  %v799_v8 = vld [vmem:[#allocation6 + $0xa20] sm:$0xff]  ;;  %v400_v14 = vadd.f32 %v8186_v11, %v174_v41  ;;  %v404_v15 = vadd.f32 %v8199_v32, %v174_v41  ;;  %v6650_v32 = vcombine.high %v532_v20, %v536_v21  ;;  %v465_v31 = vmax.f32 %v447_v49, 0.0  ;;  %v636_v41 = vld [vmem:[#allocation6 + $0x508] sm:$0xff] }
 0x163   :  { %3695 = vmatprep.subr.bf16.mxu0 %v6952_v16  ;;  %3738 = vmatprep.subr.bf16.mxu1 %v7080_v17  ;;  %v923_v9 = vld [vmem:[#allocation6 + $0xe00] sm:$0xff]  ;;  %v6912_v16 = vcombine.high %v795_v7, %v799_v8  ;;  %v443_v17 = vadd.f32 %v8191_v18, %v182_v40  ;;  %v496_v49 = vld [vmem:[#allocation6 + $0xa8] sm:$0xff] }
 0x164   :  { %v927_v10 = vld [vmem:[#allocation6 + $0xe20] sm:$0xff]  ;;  %v624_v20 = vld [vmem:[#allocation6 + $0x4a8] sm:$0xff] }
 0x165   :  { %v7040_v19 = vcombine.high %v923_v9, %v927_v10  ;;  %v7039_v11 = vcombine.low %v923_v9, %v927_v10  ;;  %v457_v28 = vmax.f32 %v443_v17, 0.0  ;;  %v504_v9 = vld [vmem:[#allocation6 + $0xe8] sm:$0xff] }
 0x166   :  { %3696 = vmatpush2.bf16.msra.mxu0 %v6951_v23  ;;  %3739 = vmatpush2.bf16.msra.mxu1 %v7079_v24  ;;  %v664_v23 = vld [vmem:[#allocation6 + $0x5e8] sm:$0xff]  ;;  %v6911_v24 = vcombine.low %v795_v7, %v799_v8 }
 0x167   :  { %3697 = vmatprep.subr.bf16.mxu0 %v6944_v25  ;;  %3740 = vmatprep.subr.bf16.mxu1 %v7072_v27  ;;  %v455_v25 = vmax.f32 %v400_v14, 0.0  ;;  %v463_v27 = vmax.f32 %v404_v15, 0.0  ;;  %v6778_v18 = vcombine.high %v660_v22, %v664_v23  ;;  %v8235_v53 = vpack.c.bf16 %v465_v31, %v457_v28  ;;  %v500_v8 = vld [vmem:[#allocation6 + $0xc8] sm:$0xff] }
 0x168   :  { %v628_v10 = vld [vmem:[#allocation6 + $0x4c8] sm:$0xff]  ;;  %v6618_v15 = vcombine.high %v500_v8, %v504_v9  ;;  %v6617_v21 = vcombine.low %v500_v8, %v504_v9 }
 0x169   :  { %v492_v17 = vld [vmem:[#allocation6 + $0x88] sm:$0xff] }
 0x16a   :  { %3698 = vmatpush2.bf16.msra.mxu0 %v6943_v39  ;;  %3741 = vmatpush2.bf16.msra.mxu1 %v7071_v43  ;;  %v652_v39 = vld [vmem:[#allocation6 + $0x588] sm:$0xff]  ;;  %v6609_v28 = vcombine.low %v492_v17, %v496_v49 }
 0x16b   :  { %3699 = vmatprep.subr.bf16.mxu0 %v6936_v51  ;;  %3742 = vmatprep.subr.bf16.mxu1 %v7064_v52  ;;  %v656_v43 = vld [vmem:[#allocation6 + $0x5a8] sm:$0xff]  ;;  %v8233_v51 = vpack.c.bf16 %v463_v27, %v455_v25  ;;  %v6777_v52 = vcombine.low %v660_v22, %v664_v23  ;;  %v6610_v23 = vcombine.high %v492_v17, %v496_v49 }
 0x16c   :  { %v6769_v1 = vcombine.low %v652_v39, %v656_v43  ;;  %v484_v25 = vld [vmem:[#allocation6 + $0x48] sm:$0xff] }
 0x16d   :  { %v488_v27 = vld [vmem:[#allocation6 + $0x68] sm:$0xff] }
 0x16e   :  { %3700 = vmatpush2.bf16.msra.mxu0 %v6935_v57  ;;  %3743 = vmatpush2.bf16.msra.mxu1 %v7063_v60  ;;  %v6770_v57 = vcombine.high %v652_v39, %v656_v43  ;;  %v644_v60 = vld [vmem:[#allocation6 + $0x548] sm:$0xff] }
 0x16f   :  { %3701 = vmatprep.subr.bf16.mxu0 %v6928_v62  ;;  %3744 = vmatprep.subr.bf16.mxu1 %v7056_v0  ;;  %v648_v62 = vld [vmem:[#allocation6 + $0x568] sm:$0xff]  ;;  %v6641_v0 = vcombine.low %v524_v33, %v528_v44 }
 0x170   :  { %v6762_v3 = vcombine.high %v644_v60, %v648_v62  ;;  %v6761_v40 = vcombine.low %v644_v60, %v648_v62  ;;  %v476_v44 = vld [vmem:[#allocation6 + $0x8] sm:$0xff] }
 0x171   :  { %v604_v39 = vld [vmem:[#allocation6 + $0x408] sm:$0xff] }
 0x172   :  { %3702 = vmatpush2.bf16.msra.mxu0 %v6927_v37  ;;  %3745 = vmatpush2.bf16.msra.mxu1 %v7055_v4  ;;  %v512_v37 = vld [vmem:[#allocation6 + $0x128] sm:$0xff] }
 0x173   :  { %3703 = vmatprep.subr.bf16.mxu0 %v6920_v38  ;;  %3746 = vmatprep.subr.bf16.mxu1 %v7048_v6  ;;  %v640_v4 = vld [vmem:[#allocation6 + $0x528] sm:$0xff]  ;;  %v6633_v38 = vcombine.low %v516_v55, %v520_v56  ;;  %v6626_v6 = vcombine.high %v508_v36, %v512_v37 }
 0x174   :  { %v6754_v7 = vcombine.high %v636_v41, %v640_v4  ;;  %v6753_v14 = vcombine.low %v636_v41, %v640_v4  ;;  %v608_v43 = vld [vmem:[#allocation6 + $0x428] sm:$0xff] }
 0x175   :  { %v6722_v56 = vcombine.high %v604_v39, %v608_v43  ;;  %v600_v60 = vld [vmem:[#allocation6 + $0x3e8] sm:$0xff] }
 0x176   :  { %3704 = vmatpush2.bf16.msra.mxu0 %v6919_v12  ;;  %3747 = vmatpush2.bf16.msra.mxu1 %v7047_v13  ;;  %v632_v12 = vld [vmem:[#allocation6 + $0x4e8] sm:$0xff]  ;;  %v6625_v13 = vcombine.low %v508_v36, %v512_v37 }
 0x177   :  { %3705 = vmatprep.subr.bf16.mxu0 %v6912_v16  ;;  %3748 = vmatprep.subr.bf16.mxu1 %v7040_v19  ;;  %v6746_v16 = vcombine.high %v628_v10, %v632_v12  ;;  %v620_v19 = vld [vmem:[#allocation6 + $0x488] sm:$0xff]  ;;  %v6745_v22 = vcombine.low %v628_v10, %v632_v12 }
 0x178   :  { %v6737_v31 = vcombine.low %v620_v19, %v624_v20  ;;  %v724_v62 = vld [vmem:[#allocation6 + $0x7c8] sm:$0xff] }
 0x179   :  { %v588_v37 = vld [vmem:[#allocation6 + $0x388] sm:$0xff] }
 0x17a   :  { %3706 = vmatpush2.bf16.msra.mxu0 %v6911_v24  ;;  %3749 = vmatpush2.bf16.msra.mxu1 %v7039_v11  ;;  %v6738_v24 = vcombine.high %v620_v19, %v624_v20  ;;  %v612_v11 = vld [vmem:[#allocation6 + $0x448] sm:$0xff] }
 0x17b   :  { %3761 = vmatprep.subr.bf16.mxu0 %v6650_v32  ;;  %3804 = vmatprep.subr.bf16.mxu1 %v6778_v18  ;;  %v616_v32 = vld [vmem:[#allocation6 + $0x468] sm:$0xff]  ;;  %v6602_v18 = vcombine.high %v484_v25, %v488_v27 }
 0x17c   :  { %v6730_v33 = vcombine.high %v612_v11, %v616_v32  ;;  %v592_v41 = vld [vmem:[#allocation6 + $0x3a8] sm:$0xff] }
 0x17d   :  { %3708 = vmatmul.mubr.bf16.vlgmr.msra.gmra.mxu0 %v8233_v51  ;;  %3751 = vmatmul.mubr.bf16.vlgmr.msra.gmra.mxu1 %v8235_v53  ;;  %v716_v4 = vld [vmem:[#allocation6 + $0x788] sm:$0xff] }
 0x17e   :  { %3762 = vmatpush1.bf16.msra.mxu0 %v6649_v35  ;;  %3793 = vmatprep.mubr.bf16.mxu0 %v8193_v26  ;;  %v480_v35 = vld [vmem:[#allocation6 + $0x28] sm:$0xff] }
 0x17f   :  { %3805 = vmatpush1.bf16.msra.mxu1 %v6777_v52  ;;  %3836 = vmatprep.mubr.bf16.mxu1 %v8197_v30  ;;  %v6601_v52 = vcombine.low %v484_v25, %v488_v27  ;;  %v6594_v55 = vcombine.high %v476_v44, %v480_v35  ;;  %v580_v9 = vld [vmem:[#allocation6 + $0x348] sm:$0xff] }
 0x180   :  { %3763 = vmatprep.subr.bf16.mxu0 %v6642_v54  ;;  %3806 = vmatprep.subr.bf16.mxu1 %v6770_v57  ;;  %v6729_v54 = vcombine.low %v612_v11, %v616_v32  ;;  %v596_v57 = vld [vmem:[#allocation6 + $0x3c8] sm:$0xff] }
 0x181   :  { %v584_v10 = vld [vmem:[#allocation6 + $0x368] sm:$0xff] }
 0x182   :  { %3764 = vmatpush1.bf16.msra.mxu0 %v6641_v0  ;;  %v728_v0 = vld [vmem:[#allocation6 + $0x7e8] sm:$0xff] }
 0x183   :  { %3807 = vmatpush1.bf16.msra.mxu1 %v6769_v1  ;;  %3765 = vmatprep.subr.bf16.mxu0 %v6634_v2  ;;  %v6593_v1 = vcombine.low %v476_v44, %v480_v35  ;;  %v6721_v2 = vcombine.low %v604_v39, %v608_v43  ;;  %v6842_v36 = vcombine.high %v724_v62, %v728_v0  ;;  %v708_v12 = vld [vmem:[#allocation6 + $0x748] sm:$0xff] }
 0x184   :  { %3808 = vmatprep.subr.bf16.mxu1 %v6762_v3  ;;  %v6714_v3 = vcombine.high %v596_v57, %v600_v60  ;;  %v572_v49 = vld [vmem:[#allocation6 + $0x308] sm:$0xff] }
 0x185   :  { %v576_v19 = vld [vmem:[#allocation6 + $0x328] sm:$0xff] }
 0x186   :  { %3766 = vmatpush1.bf16.msra.mxu0 %v6633_v38  ;;  %v720_v38 = vld [vmem:[#allocation6 + $0x7a8] sm:$0xff] }
 0x187   :  { %3809 = vmatpush1.bf16.msra.mxu1 %v6761_v40  ;;  %3767 = vmatprep.subr.bf16.mxu0 %v6626_v6  ;;  %v6713_v40 = vcombine.low %v596_v57, %v600_v60  ;;  %v6841_v6 = vcombine.low %v724_v62, %v728_v0  ;;  %v6834_v8 = vcombine.high %v716_v4, %v720_v38  ;;  %v700_v20 = vld [vmem:[#allocation6 + $0x708] sm:$0xff] }
 0x188   :  { %3810 = vmatprep.subr.bf16.mxu1 %v6754_v7  ;;  %v6706_v7 = vcombine.high %v588_v37, %v592_v41  ;;  %v564_v27 = vld [vmem:[#allocation6 + $0x2c8] sm:$0xff] }
 0x189   :  { %v568_v11 = vld [vmem:[#allocation6 + $0x2e8] sm:$0xff] }
 0x18a   :  { %3768 = vmatpush1.bf16.msra.mxu0 %v6625_v13  ;;  %v712_v13 = vld [vmem:[#allocation6 + $0x768] sm:$0xff] }
 0x18b   :  { %3811 = vmatpush1.bf16.msra.mxu1 %v6753_v14  ;;  %3769 = vmatprep.subr.bf16.mxu0 %v6618_v15  ;;  %v6705_v14 = vcombine.low %v588_v37, %v592_v41  ;;  %v6833_v15 = vcombine.low %v716_v4, %v720_v38  ;;  %v6826_v17 = vcombine.high %v708_v12, %v712_v13  ;;  %v692_v32 = vld [vmem:[#allocation6 + $0x6c8] sm:$0xff] }
 0x18c   :  { %3812 = vmatprep.subr.bf16.mxu1 %v6746_v16  ;;  %v6698_v16 = vcombine.high %v580_v9, %v584_v10  ;;  %v556_v35 = vld [vmem:[#allocation6 + $0x288] sm:$0xff] }
 0x18d   :  { %v560_v39 = vld [vmem:[#allocation6 + $0x2a8] sm:$0xff] }
 0x18e   :  { %3770 = vmatpush1.bf16.msra.mxu0 %v6617_v21  ;;  %v704_v21 = vld [vmem:[#allocation6 + $0x728] sm:$0xff] }
 0x18f   :  { %3813 = vmatpush1.bf16.msra.mxu1 %v6745_v22  ;;  %3771 = vmatprep.subr.bf16.mxu0 %v6610_v23  ;;  %v6697_v22 = vcombine.low %v580_v9, %v584_v10  ;;  %v6825_v23 = vcombine.low %v708_v12, %v712_v13  ;;  %v6818_v25 = vcombine.high %v700_v20, %v704_v21  ;;  %v684_v43 = vld [vmem:[#allocation6 + $0x688] sm:$0xff] }
 0x190   :  { %3814 = vmatprep.subr.bf16.mxu1 %v6738_v24  ;;  %v6690_v24 = vcombine.high %v572_v49, %v576_v19  ;;  %v548_v60 = vld [vmem:[#allocation6 + $0x248] sm:$0xff] }
 0x191   :  { %v552_v62 = vld [vmem:[#allocation6 + $0x268] sm:$0xff] }
 0x192   :  { %3772 = vmatpush1.bf16.msra.mxu0 %v6609_v28  ;;  %v696_v28 = vld [vmem:[#allocation6 + $0x6e8] sm:$0xff] }
 0x193   :  { %3815 = vmatpush1.bf16.msra.mxu1 %v6737_v31  ;;  %3773 = vmatprep.subr.bf16.mxu0 %v6602_v18  ;;  %v6689_v31 = vcombine.low %v572_v49, %v576_v19  ;;  %v6817_v18 = vcombine.low %v700_v20, %v704_v21  ;;  %v6810_v44 = vcombine.high %v692_v32, %v696_v28  ;;  %v676_v0 = vld [vmem:[#allocation6 + $0x648] sm:$0xff] }
 0x194   :  { %3816 = vmatprep.subr.bf16.mxu1 %v6730_v33  ;;  %v6682_v33 = vcombine.high %v564_v27, %v568_v11  ;;  %v540_v41 = vld [vmem:[#allocation6 + $0x208] sm:$0xff] }
 0x195   :  { %v544_v4 = vld [vmem:[#allocation6 + $0x228] sm:$0xff] }
 0x196   :  { %3774 = vmatpush1.bf16.msra.mxu0 %v6601_v52  ;;  %v688_v52 = vld [vmem:[#allocation6 + $0x6a8] sm:$0xff] }
 0x197   :  { %3817 = vmatpush1.bf16.msra.mxu1 %v6729_v54  ;;  %3775 = vmatprep.subr.bf16.mxu0 %v6594_v55  ;;  %v6681_v54 = vcombine.low %v564_v27, %v568_v11  ;;  %v6809_v55 = vcombine.low %v692_v32, %v696_v28  ;;  %v6802_v57 = vcombine.high %v684_v43, %v688_v52  ;;  %v668_v38 = vld [vmem:[#allocation6 + $0x608] sm:$0xff] }
 0x198   :  { %3818 = vmatprep.subr.bf16.mxu1 %v6722_v56  ;;  %v6674_v56 = vcombine.high %v556_v35, %v560_v39  ;;  %v788_v10 = vld [vmem:[#allocation6 + $0x9c8] sm:$0xff] }
 0x199   :  { %v792_v12 = vld [vmem:[#allocation6 + $0x9e8] sm:$0xff] }
 0x19a   :  { %3776 = vmatpush1.bf16.msra.mxu0 %v6593_v1  ;;  %v680_v1 = vld [vmem:[#allocation6 + $0x668] sm:$0xff]  ;;  %v6905_v21 = vcombine.low %v788_v10, %v792_v12 }
 0x19b   :  { %3819 = vmatpush1.bf16.msra.mxu1 %v6721_v2  ;;  %3777 = vmatprep.subr.bf16.mxu0 %v6714_v3  ;;  %v6673_v2 = vcombine.low %v556_v35, %v560_v39  ;;  %v6801_v3 = vcombine.low %v684_v43, %v688_v52  ;;  %v6794_v37 = vcombine.high %v676_v0, %v680_v1  ;;  %v916_v13 = vld [vmem:[#allocation6 + $0xdc8] sm:$0xff] }
 0x19c   :  { %3820 = vmatprep.subr.bf16.mxu1 %v6842_v36  ;;  %v6666_v36 = vcombine.high %v548_v60, %v552_v62  ;;  %v780_v19 = vld [vmem:[#allocation6 + $0x988] sm:$0xff] }
 0x19d   :  { %v784_v20 = vld [vmem:[#allocation6 + $0x9a8] sm:$0xff] }
 0x19e   :  { %3778 = vmatpush2.bf16.msra.mxu0 %v6713_v40  ;;  %v672_v40 = vld [vmem:[#allocation6 + $0x628] sm:$0xff] }
 0x19f   :  { %3821 = vmatpush2.bf16.msra.mxu1 %v6841_v6  ;;  %3779 = vmatprep.subr.bf16.mxu0 %v6706_v7  ;;  %v6665_v6 = vcombine.low %v548_v60, %v552_v62  ;;  %v6793_v7 = vcombine.low %v676_v0, %v680_v1  ;;  %v6786_v9 = vcombine.high %v668_v38, %v672_v40  ;;  %v772_v27 = vld [vmem:[#allocation6 + $0x948] sm:$0xff] }
 0x1a0   :  { %3822 = vmatprep.subr.bf16.mxu1 %v6834_v8  ;;  %v6658_v8 = vcombine.high %v540_v41, %v544_v4  ;;  %v776_v11 = vld [vmem:[#allocation6 + $0x968] sm:$0xff] }
 0x1a1   :  { %v900_v28 = vld [vmem:[#allocation6 + $0xd48] sm:$0xff] }
 0x1a2   :  { %3780 = vmatpush2.bf16.msra.mxu0 %v6705_v14  ;;  %v920_v14 = vld [vmem:[#allocation6 + $0xde8] sm:$0xff] }
 0x1a3   :  { %3823 = vmatpush2.bf16.msra.mxu1 %v6833_v15  ;;  %3781 = vmatprep.subr.bf16.mxu0 %v6698_v16  ;;  %v6657_v15 = vcombine.low %v540_v41, %v544_v4  ;;  %v6785_v16 = vcombine.low %v668_v38, %v672_v40  ;;  %v7034_v49 = vcombine.high %v916_v13, %v920_v14  ;;  %v764_v39 = vld [vmem:[#allocation6 + $0x908] sm:$0xff] }
 0x1a4   :  { %3824 = vmatprep.subr.bf16.mxu1 %v6826_v17  ;;  %v6906_v17 = vcombine.high %v788_v10, %v792_v12  ;;  %v768_v43 = vld [vmem:[#allocation6 + $0x928] sm:$0xff] }
 0x1a5   :  { %v892_v52 = vld [vmem:[#allocation6 + $0xd08] sm:$0xff] }
 0x1a6   :  { %3782 = vmatpush2.bf16.msra.mxu0 %v6697_v22  ;;  %v908_v22 = vld [vmem:[#allocation6 + $0xd88] sm:$0xff] }
 0x1a7   :  { %3825 = vmatpush2.bf16.msra.mxu1 %v6825_v23  ;;  %3783 = vmatprep.subr.bf16.mxu0 %v6690_v24  ;;  %v912_v23 = vld [vmem:[#allocation6 + $0xda8] sm:$0xff]  ;;  %v7033_v24 = vcombine.low %v916_v13, %v920_v14 }
 0x1a8   :  { %3826 = vmatprep.subr.bf16.mxu1 %v6818_v25  ;;  %v6898_v25 = vcombine.high %v780_v19, %v784_v20  ;;  %v7026_v32 = vcombine.high %v908_v22, %v912_v23  ;;  %v756_v62 = vld [vmem:[#allocation6 + $0x8c8] sm:$0xff] }
 0x1a9   :  { %v760_v0 = vld [vmem:[#allocation6 + $0x8e8] sm:$0xff] }
 0x1aa   :  { %3784 = vmatpush2.bf16.msra.mxu0 %v6689_v31  ;;  %v904_v31 = vld [vmem:[#allocation6 + $0xd68] sm:$0xff] }
 0x1ab   :  { %3827 = vmatpush2.bf16.msra.mxu1 %v6817_v18  ;;  %3785 = vmatprep.subr.bf16.mxu0 %v6682_v33  ;;  %v6897_v18 = vcombine.low %v780_v19, %v784_v20  ;;  %v7025_v33 = vcombine.low %v908_v22, %v912_v23  ;;  %v7018_v35 = vcombine.high %v900_v28, %v904_v31  ;;  %v884_v1 = vld [vmem:[#allocation6 + $0xcc8] sm:$0xff] }
 0x1ac   :  { %3828 = vmatprep.subr.bf16.mxu1 %v6810_v44  ;;  %v6890_v44 = vcombine.high %v772_v27, %v776_v11  ;;  %v748_v4 = vld [vmem:[#allocation6 + $0x888] sm:$0xff] }
 0x1ad   :  { %v752_v38 = vld [vmem:[#allocation6 + $0x8a8] sm:$0xff] }
 0x1ae   :  { %3786 = vmatpush2.bf16.msra.mxu0 %v6681_v54  ;;  %v896_v54 = vld [vmem:[#allocation6 + $0xd28] sm:$0xff] }
 0x1af   :  { %3829 = vmatpush2.bf16.msra.mxu1 %v6809_v55  ;;  %3787 = vmatprep.subr.bf16.mxu0 %v6674_v56  ;;  %v6889_v55 = vcombine.low %v772_v27, %v776_v11  ;;  %v7017_v56 = vcombine.low %v900_v28, %v904_v31  ;;  %v7010_v60 = vcombine.high %v892_v52, %v896_v54  ;;  %v876_v40 = vld [vmem:[#allocation6 + $0xc88] sm:$0xff] }
 0x1b0   :  { %3830 = vmatprep.subr.bf16.mxu1 %v6802_v57  ;;  %v6882_v57 = vcombine.high %v764_v39, %v768_v43  ;;  %v740_v12 = vld [vmem:[#allocation6 + $0x848] sm:$0xff] }
 0x1b1   :  { %v744_v13 = vld [vmem:[#allocation6 + $0x868] sm:$0xff] }
 0x1b2   :  { %3788 = vmatpush2.bf16.msra.mxu0 %v6673_v2  ;;  %v888_v2 = vld [vmem:[#allocation6 + $0xce8] sm:$0xff] }
 0x1b3   :  { %3831 = vmatpush2.bf16.msra.mxu1 %v6801_v3  ;;  %3789 = vmatprep.subr.bf16.mxu0 %v6666_v36  ;;  %v6881_v3 = vcombine.low %v764_v39, %v768_v43  ;;  %v7009_v36 = vcombine.low %v892_v52, %v896_v54  ;;  %v7002_v41 = vcombine.high %v884_v1, %v888_v2  ;;  %v868_v14 = vld [vmem:[#allocation6 + $0xc48] sm:$0xff] }
 0x1b4   :  { %3832 = vmatprep.subr.bf16.mxu1 %v6794_v37  ;;  %v6874_v37 = vcombine.high %v756_v62, %v760_v0  ;;  %v732_v20 = vld [vmem:[#allocation6 + $0x808] sm:$0xff] }
 0x1b5   :  { %v860_v22 = vld [vmem:[#allocation6 + $0xc08] sm:$0xff] }
 0x1b6   :  { %3790 = vmatpush2.bf16.msra.mxu0 %v6665_v6  ;;  %v880_v6 = vld [vmem:[#allocation6 + $0xca8] sm:$0xff] }
 0x1b7   :  { %3833 = vmatpush2.bf16.msra.mxu1 %v6793_v7  ;;  %3791 = vmatprep.subr.bf16.mxu0 %v6658_v8  ;;  %v6873_v7 = vcombine.low %v756_v62, %v760_v0  ;;  %v7001_v8 = vcombine.low %v884_v1, %v888_v2  ;;  %v6994_v10 = vcombine.high %v876_v40, %v880_v6  ;;  %v864_v23 = vld [vmem:[#allocation6 + $0xc28] sm:$0xff] }
 0x1b8   :  { %3834 = vmatprep.subr.bf16.mxu1 %v6786_v9  ;;  %v6866_v9 = vcombine.high %v748_v4, %v752_v38  ;;  %v6978_v11 = vcombine.high %v860_v22, %v864_v23  ;;  %v856_v28 = vld [vmem:[#allocation6 + $0xbe8] sm:$0xff] }
 0x1b9   :  { %v980_v31 = vld [vmem:[#allocation6 + $0xfc8] sm:$0xff] }
 0x1ba   :  { %3792 = vmatpush2.bf16.msra.mxu0 %v6657_v15  ;;  %v872_v15 = vld [vmem:[#allocation6 + $0xc68] sm:$0xff] }
 0x1bb   :  { %3835 = vmatpush2.bf16.msra.mxu1 %v6785_v16  ;;  %3847 = vmatprep.subr.bf16.mxu0 %v6906_v17  ;;  %v6865_v16 = vcombine.low %v748_v4, %v752_v38  ;;  %v6993_v17 = vcombine.low %v876_v40, %v880_v6  ;;  %v6986_v19 = vcombine.high %v868_v14, %v872_v15  ;;  %v844_v43 = vld [vmem:[#allocation6 + $0xb88] sm:$0xff] }
 0x1bc   :  { %3890 = vmatprep.subr.bf16.mxu1 %v7034_v49  ;;  %v6858_v49 = vcombine.high %v740_v12, %v744_v13  ;;  %v848_v52 = vld [vmem:[#allocation6 + $0xba8] sm:$0xff] }
 0x1bd   :  { %3794 = vmatmul.mubr.bf16.vlgmr.msra.gmra.mxu0 %v8195_v29  ;;  %v972_v54 = vld [vmem:[#allocation6 + $0xf88] sm:$0xff] }
 0x1be   :  { %3837 = vmatmul.mubr.bf16.vlgmr.msra.gmra.mxu1 %v8201_v34  ;;  %3848 = vmatpush1.bf16.msra.mxu0 %v6905_v21  ;;  %v736_v21 = vld [vmem:[#allocation6 + $0x828] sm:$0xff] }
 0x1bf   :  { %3879 = vmatprep.mubr.bf16.mxu0 %v8215_v5  ;;  %3891 = vmatpush1.bf16.msra.mxu1 %v7033_v24  ;;  %v6857_v24 = vcombine.low %v740_v12, %v744_v13  ;;  %v6850_v27 = vcombine.high %v732_v20, %v736_v21  ;;  %v836_v0 = vld [vmem:[#allocation6 + $0xb48] sm:$0xff] }
 0x1c0   :  { %3922 = vmatprep.mubr.bf16.mxu1 %v8217_v42  ;;  %3849 = vmatprep.subr.bf16.mxu0 %v6898_v25  ;;  %v6985_v25 = vcombine.low %v868_v14, %v872_v15  ;;  %v840_v1 = vld [vmem:[#allocation6 + $0xb68] sm:$0xff] }
 0x1c1   :  { %3892 = vmatprep.subr.bf16.mxu1 %v7026_v32  ;;  %v852_v32 = vld [vmem:[#allocation6 + $0xbc8] sm:$0xff] }
 0x1c2   :  { %3850 = vmatpush1.bf16.msra.mxu0 %v6897_v18  ;;  %v984_v18 = vld [vmem:[#allocation6 + $0xfe8] sm:$0xff] }
 0x1c3   :  { %3893 = vmatpush1.bf16.msra.mxu1 %v7025_v33  ;;  %3851 = vmatprep.subr.bf16.mxu0 %v6890_v44  ;;  %v6849_v33 = vcombine.low %v732_v20, %v736_v21  ;;  %v6977_v44 = vcombine.low %v860_v22, %v864_v23  ;;  %v7098_v39 = vcombine.high %v980_v31, %v984_v18  ;;  %v964_v2 = vld [vmem:[#allocation6 + $0xf48] sm:$0xff] }
 0x1c4   :  { %3894 = vmatprep.subr.bf16.mxu1 %v7018_v35  ;;  %v6970_v35 = vcombine.high %v852_v32, %v856_v28  ;;  %v828_v38 = vld [vmem:[#allocation6 + $0xb08] sm:$0xff] }
 0x1c5   :  { %v832_v40 = vld [vmem:[#allocation6 + $0xb28] sm:$0xff] }
 0x1c6   :  { %3852 = vmatpush1.bf16.msra.mxu0 %v6889_v55  ;;  %v976_v55 = vld [vmem:[#allocation6 + $0xfa8] sm:$0xff] }
 0x1c7   :  { %3895 = vmatpush1.bf16.msra.mxu1 %v7017_v56  ;;  %3853 = vmatprep.subr.bf16.mxu0 %v6882_v57  ;;  %v6969_v56 = vcombine.low %v852_v32, %v856_v28  ;;  %v7097_v57 = vcombine.low %v980_v31, %v984_v18  ;;  %v7090_v62 = vcombine.high %v972_v54, %v976_v55  ;;  %v956_v6 = vld [vmem:[#allocation6 + $0xf08] sm:$0xff] }
 0x1c8   :  { %3896 = vmatprep.subr.bf16.mxu1 %v7010_v60  ;;  %v6962_v60 = vcombine.high %v844_v43, %v848_v52  ;;  %v820_v13 = vld [vmem:[#allocation6 + $0xac8] sm:$0xff] }
 0x1c9   :  { %v824_v14 = vld [vmem:[#allocation6 + $0xae8] sm:$0xff] }
 0x1ca   :  { %3854 = vmatpush1.bf16.msra.mxu0 %v6881_v3  ;;  %v968_v3 = vld [vmem:[#allocation6 + $0xf68] sm:$0xff] }
 0x1cb   :  { %3897 = vmatpush1.bf16.msra.mxu1 %v7009_v36  ;;  %3855 = vmatprep.subr.bf16.mxu0 %v6874_v37  ;;  %v6961_v36 = vcombine.low %v844_v43, %v848_v52  ;;  %v7089_v37 = vcombine.low %v972_v54, %v976_v55  ;;  %v7082_v4 = vcombine.high %v964_v2, %v968_v3  ;;  %v948_v15 = vld [vmem:[#allocation6 + $0xec8] sm:$0xff] }
 0x1cc   :  { %3898 = vmatprep.subr.bf16.mxu1 %v7002_v41  ;;  %v6954_v41 = vcombine.high %v836_v0, %v840_v1  ;;  %v812_v21 = vld [vmem:[#allocation6 + $0xa88] sm:$0xff] }
 0x1cd   :  { %v816_v22 = vld [vmem:[#allocation6 + $0xaa8] sm:$0xff] }
 0x1ce   :  { %3856 = vmatpush1.bf16.msra.mxu0 %v6873_v7  ;;  %v960_v7 = vld [vmem:[#allocation6 + $0xf28] sm:$0xff] }
 0x1cf   :  { %3899 = vmatpush1.bf16.msra.mxu1 %v7001_v8  ;;  %3857 = vmatprep.subr.bf16.mxu0 %v6866_v9  ;;  %v6953_v8 = vcombine.low %v836_v0, %v840_v1  ;;  %v7081_v9 = vcombine.low %v964_v2, %v968_v3  ;;  %v7074_v12 = vcombine.high %v956_v6, %v960_v7  ;;  %v940_v23 = vld [vmem:[#allocation6 + $0xe88] sm:$0xff]  ;;  %v533_v1 = vld [vmem:[#allocation6 + $0x1d0] sm:$0xff] }
 0x1d0   :  { %3900 = vmatprep.subr.bf16.mxu1 %v6994_v10  ;;  %v6946_v10 = vcombine.high %v828_v38, %v832_v40  ;;  %v804_v28 = vld [vmem:[#allocation6 + $0xa48] sm:$0xff]  ;;  %v537_v2 = vld [vmem:[#allocation6 + $0x1f0] sm:$0xff] }
 0x1d1   :  { %v808_v31 = vld [vmem:[#allocation6 + $0xa68] sm:$0xff]  ;;  %v661_v3 = vld [vmem:[#allocation6 + $0x5d0] sm:$0xff] }
 0x1d2   :  { %3858 = vmatpush1.bf16.msra.mxu0 %v6865_v16  ;;  %v952_v16 = vld [vmem:[#allocation6 + $0xee8] sm:$0xff] }
 0x1d3   :  { %3901 = vmatpush1.bf16.msra.mxu1 %v6993_v17  ;;  %3859 = vmatprep.subr.bf16.mxu0 %v6858_v49  ;;  %v6945_v17 = vcombine.low %v828_v38, %v832_v40  ;;  %v7073_v49 = vcombine.low %v956_v6, %v960_v7  ;;  %v7066_v20 = vcombine.high %v948_v15, %v952_v16  ;;  %v932_v18 = vld [vmem:[#allocation6 + $0xe48] sm:$0xff]  ;;  %v8245_v38 = vld [vmem:[#allocation7] sm:$0xff]  ;;  %v525_v6 = vld [vmem:[#allocation6 + $0x190] sm:$0xff] }
 0x1d4   :  { %3902 = vmatprep.subr.bf16.mxu1 %v6986_v19  ;;  %v6938_v19 = vcombine.high %v820_v13, %v824_v14  ;;  %v796_v52 = vld [vmem:[#allocation6 + $0xa08] sm:$0xff]  ;;  %v529_v7 = vld [vmem:[#allocation6 + $0x1b0] sm:$0xff] }
 0x1d5   :  { %v800_v54 = vld [vmem:[#allocation6 + $0xa28] sm:$0xff] }
 0x1d6   :  { %3860 = vmatpush1.bf16.msra.mxu0 %v6857_v24  ;;  %v944_v24 = vld [vmem:[#allocation6 + $0xea8] sm:$0xff] }
 0x1d7   :  { %3903 = vmatpush1.bf16.msra.mxu1 %v6985_v25  ;;  %3861 = vmatprep.subr.bf16.mxu0 %v6850_v27  ;;  %v6937_v25 = vcombine.low %v820_v13, %v824_v14  ;;  %v7065_v27 = vcombine.low %v948_v15, %v952_v16  ;;  %v7058_v32 = vcombine.high %v940_v23, %v944_v24  ;;  %v924_v55 = vld [vmem:[#allocation6 + $0xe08] sm:$0xff]  ;;  %v517_v15 = vld [vmem:[#allocation6 + $0x150] sm:$0xff] }
 0x1d8   :  { %3904 = vmatprep.subr.bf16.mxu1 %v6978_v11  ;;  %v6930_v11 = vcombine.high %v812_v21, %v816_v22  ;;  %v6644_v14 = vcombine.high %v525_v6, %v529_v7  ;;  %v521_v16 = vld [vmem:[#allocation6 + $0x170] sm:$0xff] }
 0x1da   :  { %3862 = vmatpush1.bf16.msra.mxu0 %v6849_v33  ;;  %v936_v33 = vld [vmem:[#allocation6 + $0xe68] sm:$0xff] }
 0x1db   :  { %3905 = vmatpush1.bf16.msra.mxu1 %v6977_v44  ;;  %3863 = vmatprep.subr.bf16.mxu0 %v6970_v35  ;;  %v6929_v44 = vcombine.low %v812_v21, %v816_v22  ;;  %v7057_v35 = vcombine.low %v940_v23, %v944_v24  ;;  %v7050_v43 = vcombine.high %v932_v18, %v936_v33 }
 0x1dc   :  { %3906 = vmatprep.subr.bf16.mxu1 %v7098_v39  ;;  %v6922_v39 = vcombine.high %v804_v28, %v808_v31  ;;  %v6643_v23 = vcombine.low %v525_v6, %v529_v7  ;;  %v625_v6 = vld [vmem:[#allocation6 + $0x4b0] sm:$0xff] }
 0x1de   :  { %3864 = vmatpush2.bf16.msra.mxu0 %v6969_v56  ;;  %v928_v56 = vld [vmem:[#allocation6 + $0xe28] sm:$0xff] }
 0x1df   :  { %3907 = vmatpush2.bf16.msra.mxu1 %v7097_v57  ;;  %3865 = vmatprep.subr.bf16.mxu0 %v6962_v60  ;;  %v6921_v57 = vcombine.low %v804_v28, %v808_v31  ;;  %v7049_v60 = vcombine.low %v932_v18, %v936_v33  ;;  %v7042_v0 = vcombine.high %v924_v55, %v928_v56  ;;  %v509_v31 = vld [vmem:[#allocation6 + $0x110] sm:$0xff] }
 0x1e0   :  { %3908 = vmatprep.subr.bf16.mxu1 %v7090_v62  ;;  %v6914_v62 = vcombine.high %v796_v52, %v800_v54  ;;  %v513_v18 = vld [vmem:[#allocation6 + $0x130] sm:$0xff] }
 0x1e2   :  { %3866 = vmatpush2.bf16.msra.mxu0 %v6961_v36  ;;  %v665_v36 = vld [vmem:[#allocation6 + $0x5f0] sm:$0xff] }
 0x1e3   :  { %3909 = vmatpush2.bf16.msra.mxu1 %v7089_v37  ;;  %3867 = vmatprep.subr.bf16.mxu0 %v6954_v41  ;;  %v6913_v37 = vcombine.low %v796_v52, %v800_v54  ;;  %v7041_v41 = vcombine.low %v924_v55, %v928_v56  ;;  %v6780_v40 = vcombine.high %v661_v3, %v665_v36 }
 0x1e4   :  { %3910 = vmatprep.subr.bf16.mxu1 %v7082_v4  ;;  %v6652_v4 = vcombine.high %v533_v1, %v537_v2  ;;  %v6779_v13 = vcombine.low %v661_v3, %v665_v36  ;;  %v6628_v55 = vcombine.high %v509_v31, %v513_v18 }
 0x1e6   :  { %3868 = vmatpush2.bf16.msra.mxu0 %v6953_v8  ;;  %v6651_v8 = vcombine.low %v533_v1, %v537_v2  ;;  %v633_v1 = vld [vmem:[#allocation6 + $0x4f0] sm:$0xff]  ;;  %v6627_v2 = vcombine.low %v509_v31, %v513_v18 }
 0x1e7   :  { %3911 = vmatpush2.bf16.msra.mxu1 %v7081_v9  ;;  %3869 = vmatprep.subr.bf16.mxu0 %v6946_v10  ;;  %v992_v9 = vrot.slane %v8245_v38, %v8163_v47  ;;  %v653_v10 = vld [vmem:[#allocation6 + $0x590] sm:$0xff] }
 0x1e8   :  { %3912 = vmatprep.subr.bf16.mxu1 %v7074_v12  ;;  %v657_v12 = vld [vmem:[#allocation6 + $0x5b0] sm:$0xff] }
 0x1e9   :  { %v597_v18 = vld [vmem:[#allocation6 + $0x3d0] sm:$0xff] }
 0x1ea   :  { %3870 = vmatpush2.bf16.msra.mxu0 %v6945_v17 }
 0x1eb   :  { %3913 = vmatpush2.bf16.msra.mxu1 %v7073_v49  ;;  %3871 = vmatprep.subr.bf16.mxu0 %v6938_v19  ;;  %v6772_v49 = vcombine.high %v653_v10, %v657_v12  ;;  %v645_v19 = vld [vmem:[#allocation6 + $0x550] sm:$0xff] }
 0x1ec   :  { %3914 = vmatprep.subr.bf16.mxu1 %v7066_v20  ;;  %v649_v20 = vld [vmem:[#allocation6 + $0x570] sm:$0xff] }
 0x1ed   :  { %v6764_v28 = vcombine.high %v645_v19, %v649_v20  ;;  %v6763_v54 = vcombine.low %v645_v19, %v649_v20  ;;  %v477_v20 = vld [vmem:[#allocation6 + $0x10] sm:$0xff] }
 0x1ee   :  { %3872 = vmatpush2.bf16.msra.mxu0 %v6937_v25  ;;  %v6771_v25 = vcombine.low %v653_v10, %v657_v12  ;;  %v485_v12 = vld [vmem:[#allocation6 + $0x50] sm:$0xff] }
 0x1ef   :  { %3915 = vmatpush2.bf16.msra.mxu1 %v7065_v27  ;;  %3873 = vmatprep.subr.bf16.mxu0 %v6930_v11  ;;  %v6636_v27 = vcombine.high %v517_v15, %v521_v16 }
 0x1f0   :  { %3916 = vmatprep.subr.bf16.mxu1 %v7058_v32 }
 0x1f2   :  { %3874 = vmatpush2.bf16.msra.mxu0 %v6929_v44  ;;  %v637_v44 = vld [vmem:[#allocation6 + $0x510] sm:$0xff] }
 0x1f3   :  { %3917 = vmatpush2.bf16.msra.mxu1 %v7057_v35  ;;  %3875 = vmatprep.subr.bf16.mxu0 %v6922_v39  ;;  %v641_v35 = vld [vmem:[#allocation6 + $0x530] sm:$0xff] }
 0x1f4   :  { %3918 = vmatprep.subr.bf16.mxu1 %v7050_v43  ;;  %v6635_v43 = vcombine.low %v517_v15, %v521_v16  ;;  %v6755_v3 = vcombine.low %v637_v44, %v641_v35  ;;  %v617_v15 = vld [vmem:[#allocation6 + $0x470] sm:$0xff] }
 0x1f6   :  { %3876 = vmatpush2.bf16.msra.mxu0 %v6921_v57  ;;  %v6756_v57 = vcombine.high %v637_v44, %v641_v35  ;;  %v725_v44 = vld [vmem:[#allocation6 + $0x7d0] sm:$0xff] }
 0x1f7   :  { %3919 = vmatpush2.bf16.msra.mxu1 %v7049_v60  ;;  %3877 = vmatprep.subr.bf16.mxu0 %v6914_v62  ;;  %v501_v60 = vld [vmem:[#allocation6 + $0xd0] sm:$0xff] }
 0x1f8   :  { %3920 = vmatprep.subr.bf16.mxu1 %v7042_v0  ;;  %v505_v62 = vld [vmem:[#allocation6 + $0xf0] sm:$0xff] }
 0x1f9   :  { %v629_v0 = vld [vmem:[#allocation6 + $0x4d0] sm:$0xff]  ;;  %v6620_v36 = vcombine.high %v501_v60, %v505_v62  ;;  %v6619_v7 = vcombine.low %v501_v60, %v505_v62 }
 0x1fa   :  { %3878 = vmatpush2.bf16.msra.mxu0 %v6913_v37  ;;  %v6748_v37 = vcombine.high %v629_v0, %v633_v1  ;;  %v729_v35 = vld [vmem:[#allocation6 + $0x7f0] sm:$0xff] }
 0x1fb   :  { %3921 = vmatpush2.bf16.msra.mxu1 %v7041_v41  ;;  %3933 = vmatprep.subr.bf16.mxu0 %v6652_v4  ;;  %v493_v41 = vld [vmem:[#allocation6 + $0x90] sm:$0xff] }
 0x1fc   :  { %3976 = vmatprep.subr.bf16.mxu1 %v6780_v40  ;;  %v497_v4 = vld [vmem:[#allocation6 + $0xb0] sm:$0xff] }
 0x1fd   :  { %3880 = vmatmul.mubr.bf16.vlgmr.msra.gmra.mxu0 %v8233_v51  ;;  %v3623_v17 = vpop.f32.mrf.mxu0  ;;  %v3666_v22 = vpop.f32.mrf.mxu1  ;;  %v621_v40 = vld [vmem:[#allocation6 + $0x490] sm:$0xff]  ;;  %v6611_v16 = vcombine.low %v493_v41, %v497_v4 }
 0x1fe   :  { %3923 = vmatmul.mubr.bf16.vlgmr.msra.gmra.mxu1 %v8235_v53  ;;  %v3624_v21 = vadd.f32 %v3623_v17, %v992_v9  ;;  %3934 = vmatpush1.bf16.msra.mxu0 %v6651_v8  ;;  %v6747_v8 = vcombine.low %v629_v0, %v633_v1  ;;  %v6740_v10 = vcombine.high %v621_v40, %v625_v6  ;;  %v717_v60 = vld [vmem:[#allocation6 + $0x790] sm:$0xff] }
 0x1ff   :  { %3965 = vmatprep.mubr.bf16.mxu0 %v8193_v26  ;;  %3977 = vmatpush1.bf16.msra.mxu1 %v6779_v13  ;;  %v8252_v24 = vpop.f32.mrf.mxu0  ;;  %v8257_v32 = vpop.f32.mrf.mxu1  ;;  %v489_v13 = vld [vmem:[#allocation6 + $0x70] sm:$0xff]  ;;  %v6739_v17 = vcombine.low %v621_v40, %v625_v6  ;;  %v6843_v1 = vcombine.low %v725_v44, %v729_v35 }
 0x200   :  { %v8254_v11 = vadd.f32 %v3666_v22, %v3624_v21  ;;  %4008 = vmatprep.mubr.bf16.mxu1 %v8197_v30  ;;  %3935 = vmatprep.subr.bf16.mxu0 %v6644_v14  ;;  %v613_v14 = vld [vmem:[#allocation6 + $0x450] sm:$0xff] }
 0x201   :  { %3978 = vmatprep.subr.bf16.mxu1 %v6772_v49  ;;  %v3627_v33 = vpop.f32.mrf.mxu0  ;;  %v3670_v52 = vpop.f32.mrf.mxu1  ;;  %v6604_v49 = vcombine.high %v485_v12, %v489_v13  ;;  %v6732_v19 = vcombine.high %v613_v14, %v617_v15  ;;  %v481_v21 = vld [vmem:[#allocation6 + $0x30] sm:$0xff] }
 0x202   :  { %v3628_v39 = vadd.f32 %v3627_v33, %v992_v9  ;;  %3936 = vmatpush1.bf16.msra.mxu0 %v6643_v23  ;;  %v6612_v9 = vcombine.high %v493_v41, %v497_v4  ;;  %v605_v22 = vld [vmem:[#allocation6 + $0x410] sm:$0xff] }
 0x203   :  { %3979 = vmatpush1.bf16.msra.mxu1 %v6771_v25  ;;  %3937 = vmatprep.subr.bf16.mxu0 %v6636_v27  ;;  %v609_v23 = vld [vmem:[#allocation6 + $0x430] sm:$0xff]  ;;  %v6603_v25 = vcombine.low %v485_v12, %v489_v13  ;;  %v6731_v27 = vcombine.low %v613_v14, %v617_v15 }
 0x204   :  { %v8259_v56 = vadd.f32 %v3670_v52, %v3628_v39  ;;  %3980 = vmatprep.subr.bf16.mxu1 %v6764_v28  ;;  %v6596_v28 = vcombine.high %v477_v20, %v481_v21  ;;  %v6724_v31 = vcombine.high %v605_v22, %v609_v23  ;;  %v601_v33 = vld [vmem:[#allocation6 + $0x3f0] sm:$0xff]  ;;  %v6595_v39 = vcombine.low %v477_v20, %v481_v21 }
 0x205   :  { %v6716_v52 = vcombine.high %v597_v18, %v601_v33  ;;  %v721_v62 = vld [vmem:[#allocation6 + $0x7b0] sm:$0xff]  ;;  %v6715_v0 = vcombine.low %v597_v18, %v601_v33 }
 0x206   :  { %3938 = vmatpush1.bf16.msra.mxu0 %v6635_v43  ;;  %v6723_v43 = vcombine.low %v605_v22, %v609_v23  ;;  %v709_v41 = vld [vmem:[#allocation6 + $0x750] sm:$0xff]  ;;  %v6835_v6 = vcombine.low %v717_v60, %v721_v62 }
 0x207   :  { %3981 = vmatpush1.bf16.msra.mxu1 %v6763_v54  ;;  %3939 = vmatprep.subr.bf16.mxu0 %v6628_v55  ;;  %v6844_v54 = vcombine.high %v725_v44, %v729_v35  ;;  %v589_v55 = vld [vmem:[#allocation6 + $0x390] sm:$0xff] }
 0x208   :  { %3982 = vmatprep.subr.bf16.mxu1 %v6756_v57  ;;  %v593_v57 = vld [vmem:[#allocation6 + $0x3b0] sm:$0xff] }
 0x209   :  { %v713_v4 = vld [vmem:[#allocation6 + $0x770] sm:$0xff]  ;;  %v6707_v40 = vcombine.low %v589_v55, %v593_v57 }
 0x20a   :  { %3940 = vmatpush1.bf16.msra.mxu0 %v6627_v2  ;;  %v6708_v2 = vcombine.high %v589_v55, %v593_v57  ;;  %v701_v12 = vld [vmem:[#allocation6 + $0x710] sm:$0xff]  ;;  %v6827_v15 = vcombine.low %v709_v41, %v713_v4 }
 0x20b   :  { %3983 = vmatpush1.bf16.msra.mxu1 %v6755_v3  ;;  %3941 = vmatprep.subr.bf16.mxu0 %v6620_v36  ;;  %v6836_v3 = vcombine.high %v717_v60, %v721_v62  ;;  %v581_v36 = vld [vmem:[#allocation6 + $0x350] sm:$0xff] }
 0x20c   :  { %3984 = vmatprep.subr.bf16.mxu1 %v6748_v37  ;;  %v585_v37 = vld [vmem:[#allocation6 + $0x370] sm:$0xff] }
 0x20d   :  { %v705_v13 = vld [vmem:[#allocation6 + $0x730] sm:$0xff]  ;;  %v6699_v14 = vcombine.low %v581_v36, %v585_v37 }
 0x20e   :  { %3942 = vmatpush1.bf16.msra.mxu0 %v6619_v7  ;;  %v6700_v7 = vcombine.high %v581_v36, %v585_v37  ;;  %v693_v20 = vld [vmem:[#allocation6 + $0x6d0] sm:$0xff]  ;;  %v6819_v23 = vcombine.low %v701_v12, %v705_v13 }
 0x20f   :  { %3985 = vmatpush1.bf16.msra.mxu1 %v6747_v8  ;;  %3943 = vmatprep.subr.bf16.mxu0 %v6612_v9  ;;  %v6828_v8 = vcombine.high %v709_v41, %v713_v4  ;;  %v573_v9 = vld [vmem:[#allocation6 + $0x310] sm:$0xff] }
 0x210   :  { %3986 = vmatprep.subr.bf16.mxu1 %v6740_v10  ;;  %v577_v10 = vld [vmem:[#allocation6 + $0x330] sm:$0xff] }
 0x211   :  { %v697_v21 = vld [vmem:[#allocation6 + $0x6f0] sm:$0xff]  ;;  %v6691_v22 = vcombine.low %v573_v9, %v577_v10 }
 0x212   :  { %3944 = vmatpush1.bf16.msra.mxu0 %v6611_v16  ;;  %v6692_v16 = vcombine.high %v573_v9, %v577_v10  ;;  %v685_v18 = vld [vmem:[#allocation6 + $0x690] sm:$0xff]  ;;  %v6811_v35 = vcombine.low %v693_v20, %v697_v21 }
 0x213   :  { %3987 = vmatpush1.bf16.msra.mxu1 %v6739_v17  ;;  %3945 = vmatprep.subr.bf16.mxu0 %v6604_v49  ;;  %v6820_v17 = vcombine.high %v701_v12, %v705_v13  ;;  %v565_v49 = vld [vmem:[#allocation6 + $0x2d0] sm:$0xff] }
 0x214   :  { %3988 = vmatprep.subr.bf16.mxu1 %v6732_v19  ;;  %v569_v19 = vld [vmem:[#allocation6 + $0x2f0] sm:$0xff] }
 0x215   :  { %v689_v33 = vld [vmem:[#allocation6 + $0x6b0] sm:$0xff]  ;;  %v6683_v44 = vcombine.low %v565_v49, %v569_v19 }
 0x216   :  { %3946 = vmatpush1.bf16.msra.mxu0 %v6603_v25  ;;  %v6684_v25 = vcombine.high %v565_v49, %v569_v19  ;;  %v677_v55 = vld [vmem:[#allocation6 + $0x650] sm:$0xff]  ;;  %v6803_v62 = vcombine.low %v685_v18, %v689_v33 }
 0x217   :  { %3989 = vmatpush1.bf16.msra.mxu1 %v6731_v27  ;;  %3947 = vmatprep.subr.bf16.mxu0 %v6596_v28  ;;  %v6812_v27 = vcombine.high %v693_v20, %v697_v21  ;;  %v557_v28 = vld [vmem:[#allocation6 + $0x290] sm:$0xff]  ;;  %v8261_v21 = vpop.f32.mrf.mxu0 }
 0x218   :  { %3990 = vmatprep.subr.bf16.mxu1 %v6724_v31  ;;  %v561_v31 = vld [vmem:[#allocation6 + $0x2b0] sm:$0xff] }
 0x219   :  { %v681_v57 = vld [vmem:[#allocation6 + $0x670] sm:$0xff]  ;;  %v6675_v60 = vcombine.low %v557_v28, %v561_v31 }
 0x21a   :  { %3948 = vmatpush1.bf16.msra.mxu0 %v6595_v39  ;;  %v6676_v39 = vcombine.high %v557_v28, %v561_v31  ;;  %v669_v36 = vld [vmem:[#allocation6 + $0x610] sm:$0xff]  ;;  %v6795_v4 = vcombine.low %v677_v55, %v681_v57 }
 0x21b   :  { %3991 = vmatpush1.bf16.msra.mxu1 %v6723_v43  ;;  %3949 = vmatprep.subr.bf16.mxu0 %v6716_v52  ;;  %v6804_v43 = vcombine.high %v685_v18, %v689_v33  ;;  %v549_v52 = vld [vmem:[#allocation6 + $0x250] sm:$0xff] }
 0x21c   :  { %3992 = vmatprep.subr.bf16.mxu1 %v6844_v54  ;;  %v553_v54 = vld [vmem:[#allocation6 + $0x270] sm:$0xff] }
 0x21d   :  { %v673_v37 = vld [vmem:[#allocation6 + $0x630] sm:$0xff]  ;;  %v6667_v41 = vcombine.low %v549_v52, %v553_v54 }
 0x21e   :  { %3950 = vmatpush2.bf16.msra.mxu0 %v6715_v0  ;;  %v6668_v0 = vcombine.high %v549_v52, %v553_v54  ;;  %v917_v9 = vld [vmem:[#allocation6 + $0xdd0] sm:$0xff]  ;;  %v6787_v13 = vcombine.low %v669_v36, %v673_v37 }
 0x21f   :  { %3993 = vmatpush2.bf16.msra.mxu1 %v6843_v1  ;;  %3951 = vmatprep.subr.bf16.mxu0 %v6708_v2  ;;  %v6796_v1 = vcombine.high %v677_v55, %v681_v57  ;;  %v541_v2 = vld [vmem:[#allocation6 + $0x210] sm:$0xff] }
 0x220   :  { %3994 = vmatprep.subr.bf16.mxu1 %v6836_v3  ;;  %v545_v3 = vld [vmem:[#allocation6 + $0x230] sm:$0xff] }
 0x221   :  { %v921_v10 = vld [vmem:[#allocation6 + $0xdf0] sm:$0xff]  ;;  %v6659_v12 = vcombine.low %v541_v2, %v545_v3 }
 0x222   :  { %3952 = vmatpush2.bf16.msra.mxu0 %v6707_v40  ;;  %v6660_v40 = vcombine.high %v541_v2, %v545_v3  ;;  %v909_v19 = vld [vmem:[#allocation6 + $0xd90] sm:$0xff] }
 0x223   :  { %3995 = vmatpush2.bf16.msra.mxu1 %v6835_v6  ;;  %3953 = vmatprep.subr.bf16.mxu0 %v6700_v7  ;;  %v6788_v6 = vcombine.high %v669_v36, %v673_v37  ;;  %v789_v7 = vld [vmem:[#allocation6 + $0x9d0] sm:$0xff] }
 0x224   :  { %3996 = vmatprep.subr.bf16.mxu1 %v6828_v8  ;;  %v793_v8 = vld [vmem:[#allocation6 + $0x9f0] sm:$0xff] }
 0x225   :  { %v6907_v49 = vcombine.low %v789_v7, %v793_v8  ;;  %v913_v20 = vld [vmem:[#allocation6 + $0xdb0] sm:$0xff] }
 0x226   :  { %3954 = vmatpush2.bf16.msra.mxu0 %v6699_v14  ;;  %v6908_v14 = vcombine.high %v789_v7, %v793_v8  ;;  %v777_v28 = vld [vmem:[#allocation6 + $0x970] sm:$0xff]  ;;  %v7028_v18 = vcombine.high %v909_v19, %v913_v20  ;;  %v7027_v54 = vcombine.low %v909_v19, %v913_v20 }
 0x227   :  { %3997 = vmatpush2.bf16.msra.mxu1 %v6827_v15  ;;  %3955 = vmatprep.subr.bf16.mxu0 %v6692_v16  ;;  %v7036_v15 = vcombine.high %v917_v9, %v921_v10  ;;  %v781_v16 = vld [vmem:[#allocation6 + $0x990] sm:$0xff] }
 0x228   :  { %3998 = vmatprep.subr.bf16.mxu1 %v6820_v17  ;;  %v785_v17 = vld [vmem:[#allocation6 + $0x9b0] sm:$0xff] }
 0x229   :  { %v901_v33 = vld [vmem:[#allocation6 + $0xd50] sm:$0xff] }
 0x22a   :  { %3956 = vmatpush2.bf16.msra.mxu0 %v6691_v22  ;;  %v7035_v22 = vcombine.low %v917_v9, %v921_v10  ;;  %v893_v2 = vld [vmem:[#allocation6 + $0xd10] sm:$0xff] }
 0x22b   :  { %3999 = vmatpush2.bf16.msra.mxu1 %v6819_v23  ;;  %3957 = vmatprep.subr.bf16.mxu0 %v6684_v25  ;;  %v8263_v23 = vpop.f32.mrf.mxu1  ;;  %v6900_v25 = vcombine.high %v781_v16, %v785_v17  ;;  %v897_v3 = vld [vmem:[#allocation6 + $0xd30] sm:$0xff] }
 0x22c   :  { %4000 = vmatprep.subr.bf16.mxu1 %v6812_v27  ;;  %v773_v27 = vld [vmem:[#allocation6 + $0x950] sm:$0xff]  ;;  %v7012_v7 = vcombine.high %v893_v2, %v897_v3 }
 0x22d   :  { %v6892_v55 = vcombine.high %v773_v27, %v777_v28  ;;  %v6891_v37 = vcombine.low %v773_v27, %v777_v28  ;;  %v757_v8 = vld [vmem:[#allocation6 + $0x8d0] sm:$0xff] }
 0x22e   :  { %3958 = vmatpush2.bf16.msra.mxu0 %v6683_v44  ;;  %v905_v44 = vld [vmem:[#allocation6 + $0xd70] sm:$0xff] }
 0x22f   :  { %4001 = vmatpush2.bf16.msra.mxu1 %v6811_v35  ;;  %3959 = vmatprep.subr.bf16.mxu0 %v6676_v39  ;;  %v761_v9 = vld [vmem:[#allocation6 + $0x8f0] sm:$0xff] }
 0x230   :  { %4002 = vmatprep.subr.bf16.mxu1 %v6804_v43  ;;  %v6899_v43 = vcombine.low %v781_v16, %v785_v17  ;;  %v885_v10 = vld [vmem:[#allocation6 + $0xcd0] sm:$0xff]  ;;  %v6876_v16 = vcombine.high %v757_v8, %v761_v9  ;;  %v6875_v27 = vcombine.low %v757_v8, %v761_v9 }
 0x231   :  { %v749_v19 = vld [vmem:[#allocation6 + $0x890] sm:$0xff] }
 0x232   :  { %3960 = vmatpush2.bf16.msra.mxu0 %v6675_v60  ;;  %v753_v20 = vld [vmem:[#allocation6 + $0x8b0] sm:$0xff] }
 0x233   :  { %4003 = vmatpush2.bf16.msra.mxu1 %v6803_v62  ;;  %3961 = vmatprep.subr.bf16.mxu0 %v6668_v0  ;;  %v7020_v62 = vcombine.high %v901_v33, %v905_v44  ;;  %v769_v0 = vld [vmem:[#allocation6 + $0x930] sm:$0xff] }
 0x234   :  { %4004 = vmatprep.subr.bf16.mxu1 %v6796_v1 }
 0x236   :  { %3962 = vmatpush2.bf16.msra.mxu0 %v6667_v41 }
 0x237   :  { %4005 = vmatpush2.bf16.msra.mxu1 %v6795_v4  ;;  %3963 = vmatprep.subr.bf16.mxu0 %v6660_v40  ;;  %v7019_v4 = vcombine.low %v901_v33, %v905_v44  ;;  %v741_v33 = vld [vmem:[#allocation6 + $0x850] sm:$0xff] }
 0x238   :  { %4006 = vmatprep.subr.bf16.mxu1 %v6788_v6  ;;  %v745_v44 = vld [vmem:[#allocation6 + $0x870] sm:$0xff] }
 0x23a   :  { %3964 = vmatpush2.bf16.msra.mxu0 %v6659_v12  ;;  %v889_v12 = vld [vmem:[#allocation6 + $0xcf0] sm:$0xff] }
 0x23b   :  { %4007 = vmatpush2.bf16.msra.mxu1 %v6787_v13  ;;  %4019 = vmatprep.subr.bf16.mxu0 %v6908_v14  ;;  %v7003_v28 = vcombine.low %v885_v10, %v889_v12 }
 0x23c   :  { %4062 = vmatprep.subr.bf16.mxu1 %v7036_v15 }
 0x23d   :  { %v3709_v31 = vpop.f32.mrf.mxu0  ;;  %3966 = vmatmul.mubr.bf16.vlgmr.msra.gmra.mxu0 %v8195_v29  ;;  %v3752_v39 = vpop.f32.mrf.mxu1 }
 0x23e   :  { %v3710_v35 = vadd.f32 %v3709_v31, %v8254_v11  ;;  %4009 = vmatmul.mubr.bf16.vlgmr.msra.gmra.mxu1 %v8201_v34  ;;  %4020 = vmatpush1.bf16.msra.mxu0 %v6907_v49  ;;  %v765_v11 = vld [vmem:[#allocation6 + $0x910] sm:$0xff]  ;;  %v7004_v49 = vcombine.high %v885_v10, %v889_v12  ;;  %v6868_v31 = vcombine.high %v749_v19, %v753_v20 }
 0x23f   :  { %4051 = vmatprep.mubr.bf16.mxu0 %v8215_v5  ;;  %4063 = vmatpush1.bf16.msra.mxu1 %v7035_v22  ;;  %v8269_v52 = vpop.f32.mrf.mxu0  ;;  %v8272_v60 = vpop.f32.mrf.mxu1  ;;  %v6884_v40 = vcombine.high %v765_v11, %v769_v0  ;;  %v6883_v15 = vcombine.low %v765_v11, %v769_v0  ;;  %v877_v22 = vld [vmem:[#allocation6 + $0xc90] sm:$0xff] }
 0x240   :  { %v3753_v57 = vadd.f32 %v3752_v39, %v3710_v35  ;;  %4094 = vmatprep.mubr.bf16.mxu1 %v8217_v42  ;;  %4021 = vmatprep.subr.bf16.mxu0 %v6900_v25  ;;  %v881_v25 = vld [vmem:[#allocation6 + $0xcb0] sm:$0xff] }
 0x241   :  { %v3713_v1 = vpop.f32.mrf.mxu0  ;;  %4064 = vmatprep.subr.bf16.mxu1 %v7028_v18  ;;  %v3756_v41 = vpop.f32.mrf.mxu1  ;;  %v6996_v18 = vcombine.high %v877_v22, %v881_v25  ;;  %v869_v35 = vld [vmem:[#allocation6 + $0xc50] sm:$0xff] }
 0x242   :  { %v3714_v36 = vadd.f32 %v3713_v1, %v8259_v56  ;;  %4022 = vmatpush1.bf16.msra.mxu0 %v6899_v43  ;;  %v4277_v13 = vmax.f32 %v3753_v57, 0.0  ;;  %v7011_v56 = vcombine.low %v893_v2, %v897_v3  ;;  %v873_v39 = vld [vmem:[#allocation6 + $0xc70] sm:$0xff]  ;;  %v6867_v43 = vcombine.low %v749_v19, %v753_v20 }
 0x243   :  { %4065 = vmatpush1.bf16.msra.mxu1 %v7027_v54  ;;  %4023 = vmatprep.subr.bf16.mxu0 %v6892_v55  ;;  %v6995_v54 = vcombine.low %v877_v22, %v881_v25  ;;  %v6860_v55 = vcombine.high %v741_v33, %v745_v44  ;;  %v6988_v57 = vcombine.high %v869_v35, %v873_v39  ;;  %v737_v11 = vld [vmem:[#allocation6 + $0x830] sm:$0xff] }
 0x244   :  { %v3757_v6 = vadd.f32 %v3756_v41, %v3714_v36  ;;  %4066 = vmatprep.subr.bf16.mxu1 %v7020_v62  ;;  %v733_v62 = vld [vmem:[#allocation6 + $0x810] sm:$0xff]  ;;  %v6859_v2 = vcombine.low %v741_v33, %v745_v44  ;;  %v6987_v3 = vcombine.low %v869_v35, %v873_v39 }
 0x245   :  { %v861_v0 = vld [vmem:[#allocation6 + $0xc10] sm:$0xff]  ;;  %v6852_v36 = vcombine.high %v733_v62, %v737_v11 }
 0x246   :  { %v4285_v14 = vmax.f32 %v3757_v6, 0.0  ;;  %4024 = vmatpush1.bf16.msra.mxu0 %v6891_v37  ;;  %v865_v1 = vld [vmem:[#allocation6 + $0xc30] sm:$0xff] }
 0x247   :  { %4067 = vmatpush1.bf16.msra.mxu1 %v7019_v4  ;;  %4025 = vmatprep.subr.bf16.mxu0 %v6884_v40  ;;  %v6980_v37 = vcombine.high %v861_v0, %v865_v1  ;;  %v853_v41 = vld [vmem:[#allocation6 + $0xbd0] sm:$0xff]  ;;  %v6979_v8 = vcombine.low %v861_v0, %v865_v1 }
 0x248   :  { %v8275_v17 = vpack.c.bf16 %v4285_v14, %v4277_v13  ;;  %4068 = vmatprep.subr.bf16.mxu1 %v7012_v7  ;;  %v857_v4 = vld [vmem:[#allocation6 + $0xbf0] sm:$0xff]  ;;  %v6851_v7 = vcombine.low %v733_v62, %v737_v11 }
 0x249   :  { %v981_v40 = vld [vmem:[#allocation6 + $0xfd0] sm:$0xff]  ;;  %v6972_v9 = vcombine.high %v853_v41, %v857_v4 }
 0x24a   :  { %4026 = vmatpush1.bf16.msra.mxu0 %v6883_v15  ;;  %v985_v6 = vld [vmem:[#allocation6 + $0xff0] sm:$0xff] }
 0x24b   :  { %4069 = vmatpush1.bf16.msra.mxu1 %v7011_v56  ;;  %4027 = vmatprep.subr.bf16.mxu0 %v6876_v16  ;;  %v7100_v10 = vcombine.high %v981_v40, %v985_v6  ;;  %v845_v12 = vld [vmem:[#allocation6 + $0xb90] sm:$0xff]  ;;  %v6971_v56 = vcombine.low %v853_v41, %v857_v4  ;;  %v7099_v16 = vcombine.low %v981_v40, %v985_v6 }
 0x24c   :  { %4070 = vmatprep.subr.bf16.mxu1 %v7004_v49  ;;  %v849_v13 = vld [vmem:[#allocation6 + $0xbb0] sm:$0xff] }
 0x24d   :  { %v973_v14 = vld [vmem:[#allocation6 + $0xf90] sm:$0xff]  ;;  %v6964_v49 = vcombine.high %v845_v12, %v849_v13 }
 0x24e   :  { %4028 = vmatpush1.bf16.msra.mxu0 %v6875_v27  ;;  %v977_v15 = vld [vmem:[#allocation6 + $0xfb0] sm:$0xff] }
 0x24f   :  { %4071 = vmatpush1.bf16.msra.mxu1 %v7003_v28  ;;  %4029 = vmatprep.subr.bf16.mxu0 %v6868_v31  ;;  %v7092_v19 = vcombine.high %v973_v14, %v977_v15  ;;  %v837_v20 = vld [vmem:[#allocation6 + $0xb50] sm:$0xff]  ;;  %v6963_v28 = vcombine.low %v845_v12, %v849_v13  ;;  %v7091_v31 = vcombine.low %v973_v14, %v977_v15 }
 0x250   :  { %4072 = vmatprep.subr.bf16.mxu1 %v6996_v18  ;;  %v841_v22 = vld [vmem:[#allocation6 + $0xb70] sm:$0xff] }
 0x251   :  { %v965_v25 = vld [vmem:[#allocation6 + $0xf50] sm:$0xff]  ;;  %v6956_v18 = vcombine.high %v837_v20, %v841_v22 }
 0x252   :  { %4030 = vmatpush1.bf16.msra.mxu0 %v6867_v43  ;;  %v969_v27 = vld [vmem:[#allocation6 + $0xf70] sm:$0xff] }
 0x253   :  { %4073 = vmatpush1.bf16.msra.mxu1 %v6995_v54  ;;  %4031 = vmatprep.subr.bf16.mxu0 %v6860_v55  ;;  %v7084_v33 = vcombine.high %v965_v25, %v969_v27  ;;  %v829_v44 = vld [vmem:[#allocation6 + $0xb10] sm:$0xff]  ;;  %v6955_v54 = vcombine.low %v837_v20, %v841_v22  ;;  %v7083_v55 = vcombine.low %v965_v25, %v969_v27 }
 0x254   :  { %4074 = vmatprep.subr.bf16.mxu1 %v6988_v57  ;;  %v833_v35 = vld [vmem:[#allocation6 + $0xb30] sm:$0xff] }
 0x255   :  { %v957_v39 = vld [vmem:[#allocation6 + $0xf10] sm:$0xff]  ;;  %v6948_v57 = vcombine.high %v829_v44, %v833_v35 }
 0x256   :  { %4032 = vmatpush1.bf16.msra.mxu0 %v6859_v2  ;;  %v961_v43 = vld [vmem:[#allocation6 + $0xf30] sm:$0xff] }
 0x257   :  { %4075 = vmatpush1.bf16.msra.mxu1 %v6987_v3  ;;  %4033 = vmatprep.subr.bf16.mxu0 %v6852_v36  ;;  %v7076_v62 = vcombine.high %v957_v39, %v961_v43  ;;  %v821_v11 = vld [vmem:[#allocation6 + $0xad0] sm:$0xff]  ;;  %v6947_v3 = vcombine.low %v829_v44, %v833_v35  ;;  %v7075_v36 = vcombine.low %v957_v39, %v961_v43  ;;  %v534_v35 = vld [vmem:[#allocation6 + $0x1d8] sm:$0xff] }
 0x258   :  { %4076 = vmatprep.subr.bf16.mxu1 %v6980_v37  ;;  %v825_v0 = vld [vmem:[#allocation6 + $0xaf0] sm:$0xff]  ;;  %v538_v39 = vld [vmem:[#allocation6 + $0x1f8] sm:$0xff] }
 0x259   :  { %v949_v1 = vld [vmem:[#allocation6 + $0xed0] sm:$0xff]  ;;  %v6940_v37 = vcombine.high %v821_v11, %v825_v0  ;;  %v662_v43 = vld [vmem:[#allocation6 + $0x5d8] sm:$0xff] }
 0x25a   :  { %4034 = vmatpush1.bf16.msra.mxu0 %v6851_v7  ;;  %v953_v2 = vld [vmem:[#allocation6 + $0xef0] sm:$0xff] }
 0x25b   :  { %4077 = vmatpush1.bf16.msra.mxu1 %v6979_v8  ;;  %4035 = vmatprep.subr.bf16.mxu0 %v6972_v9  ;;  %v7068_v41 = vcombine.high %v949_v1, %v953_v2  ;;  %v813_v4 = vld [vmem:[#allocation6 + $0xa90] sm:$0xff]  ;;  %v6939_v8 = vcombine.low %v821_v11, %v825_v0  ;;  %v7067_v9 = vcombine.low %v949_v1, %v953_v2  ;;  %v526_v0 = vld [vmem:[#allocation6 + $0x198] sm:$0xff] }
 0x25c   :  { %4078 = vmatprep.subr.bf16.mxu1 %v7100_v10  ;;  %v817_v40 = vld [vmem:[#allocation6 + $0xab0] sm:$0xff]  ;;  %v530_v1 = vld [vmem:[#allocation6 + $0x1b8] sm:$0xff]  ;;  %v1000_v2 = vrot.slane %v8245_v38, %v8171_v50 }
 0x25d   :  { %v941_v6 = vld [vmem:[#allocation6 + $0xe90] sm:$0xff]  ;;  %v6932_v10 = vcombine.high %v813_v4, %v817_v40  ;;  %v650_v38 = vld [vmem:[#allocation6 + $0x578] sm:$0xff] }
 0x25e   :  { %4036 = vmatpush2.bf16.msra.mxu0 %v6971_v56  ;;  %v945_v7 = vld [vmem:[#allocation6 + $0xeb0] sm:$0xff] }
 0x25f   :  { %4079 = vmatpush2.bf16.msra.mxu1 %v7099_v16  ;;  %4037 = vmatprep.subr.bf16.mxu0 %v6964_v49  ;;  %v7060_v12 = vcombine.high %v941_v6, %v945_v7  ;;  %v805_v13 = vld [vmem:[#allocation6 + $0xa50] sm:$0xff]  ;;  %v6931_v16 = vcombine.low %v813_v4, %v817_v40  ;;  %v7059_v49 = vcombine.low %v941_v6, %v945_v7  ;;  %v8281_v40 = vpop.f32.mrf.mxu1  ;;  %v518_v7 = vld [vmem:[#allocation6 + $0x158] sm:$0xff] }
 0x260   :  { %4080 = vmatprep.subr.bf16.mxu1 %v7092_v19  ;;  %v809_v14 = vld [vmem:[#allocation6 + $0xa70] sm:$0xff]  ;;  %v6646_v6 = vcombine.high %v526_v0, %v530_v1 }
 0x261   :  { %v933_v15 = vld [vmem:[#allocation6 + $0xe50] sm:$0xff]  ;;  %v6924_v19 = vcombine.high %v805_v13, %v809_v14 }
 0x262   :  { %4038 = vmatpush2.bf16.msra.mxu0 %v6963_v28  ;;  %v937_v56 = vld [vmem:[#allocation6 + $0xe70] sm:$0xff] }
 0x263   :  { %4081 = vmatpush2.bf16.msra.mxu1 %v7091_v31  ;;  %4039 = vmatprep.subr.bf16.mxu0 %v6956_v18  ;;  %v7052_v20 = vcombine.high %v933_v15, %v937_v56  ;;  %v797_v22 = vld [vmem:[#allocation6 + $0xa10] sm:$0xff]  ;;  %v6923_v31 = vcombine.low %v805_v13, %v809_v14  ;;  %v7051_v18 = vcombine.low %v933_v15, %v937_v56 }
 0x264   :  { %4082 = vmatprep.subr.bf16.mxu1 %v7084_v33  ;;  %v801_v25 = vld [vmem:[#allocation6 + $0xa30] sm:$0xff]  ;;  %v6645_v15 = vcombine.low %v526_v0, %v530_v1 }
 0x265   :  { %v925_v27 = vld [vmem:[#allocation6 + $0xe10] sm:$0xff]  ;;  %v6916_v33 = vcombine.high %v797_v22, %v801_v25 }
 0x266   :  { %4040 = vmatpush2.bf16.msra.mxu0 %v6955_v54  ;;  %v929_v28 = vld [vmem:[#allocation6 + $0xe30] sm:$0xff]  ;;  %v666_v54 = vld [vmem:[#allocation6 + $0x5f8] sm:$0xff] }
 0x267   :  { %4083 = vmatpush2.bf16.msra.mxu1 %v7083_v55  ;;  %4041 = vmatprep.subr.bf16.mxu0 %v6948_v57  ;;  %v7044_v44 = vcombine.high %v925_v27, %v929_v28  ;;  %v6915_v55 = vcombine.low %v797_v22, %v801_v25  ;;  %v7043_v57 = vcombine.low %v925_v27, %v929_v28  ;;  %v510_v25 = vld [vmem:[#allocation6 + $0x118] sm:$0xff] }
 0x268   :  { %4084 = vmatprep.subr.bf16.mxu1 %v7076_v62  ;;  %v6654_v62 = vcombine.high %v534_v35, %v538_v39  ;;  %v6782_v11 = vcombine.high %v662_v43, %v666_v54  ;;  %v6781_v4 = vcombine.low %v662_v43, %v666_v54  ;;  %v514_v27 = vld [vmem:[#allocation6 + $0x138] sm:$0xff] }
 0x269   :  { %v502_v54 = vld [vmem:[#allocation6 + $0xd8] sm:$0xff] }
 0x26a   :  { %4042 = vmatpush2.bf16.msra.mxu0 %v6947_v3  ;;  %v6653_v3 = vcombine.low %v534_v35, %v538_v39  ;;  %v6630_v39 = vcombine.high %v510_v25, %v514_v27 }
 0x26b   :  { %4085 = vmatpush2.bf16.msra.mxu1 %v7075_v36  ;;  %4043 = vmatprep.subr.bf16.mxu0 %v6940_v37  ;;  %v654_v36 = vld [vmem:[#allocation6 + $0x598] sm:$0xff] }
 0x26c   :  { %4086 = vmatprep.subr.bf16.mxu1 %v7068_v41  ;;  %v658_v37 = vld [vmem:[#allocation6 + $0x5b8] sm:$0xff]  ;;  %v8279_v41 = vpop.f32.mrf.mxu0 }
 0x26e   :  { %4044 = vmatpush2.bf16.msra.mxu0 %v6939_v8  ;;  %v522_v8 = vld [vmem:[#allocation6 + $0x178] sm:$0xff] }
 0x26f   :  { %4087 = vmatpush2.bf16.msra.mxu1 %v7067_v9  ;;  %4045 = vmatprep.subr.bf16.mxu0 %v6932_v10  ;;  %v6774_v10 = vcombine.high %v654_v36, %v658_v37 }
 0x270   :  { %4088 = vmatprep.subr.bf16.mxu1 %v7060_v12  ;;  %v646_v12 = vld [vmem:[#allocation6 + $0x558] sm:$0xff] }
 0x271   :  { %v6766_v22 = vcombine.high %v646_v12, %v650_v38  ;;  %v6765_v35 = vcombine.low %v646_v12, %v650_v38  ;;  %v490_v12 = vld [vmem:[#allocation6 + $0x78] sm:$0xff] }
 0x272   :  { %4046 = vmatpush2.bf16.msra.mxu0 %v6931_v16  ;;  %v6773_v16 = vcombine.low %v654_v36, %v658_v37  ;;  %v498_v36 = vld [vmem:[#allocation6 + $0xb8] sm:$0xff] }
 0x273   :  { %4089 = vmatpush2.bf16.msra.mxu1 %v7059_v49  ;;  %4047 = vmatprep.subr.bf16.mxu0 %v6924_v19  ;;  %v6638_v49 = vcombine.high %v518_v7, %v522_v8  ;;  %v622_v37 = vld [vmem:[#allocation6 + $0x498] sm:$0xff] }
 0x274   :  { %4090 = vmatprep.subr.bf16.mxu1 %v7052_v20  ;;  %v614_v38 = vld [vmem:[#allocation6 + $0x458] sm:$0xff] }
 0x276   :  { %4048 = vmatpush2.bf16.msra.mxu0 %v6923_v31  ;;  %v638_v31 = vld [vmem:[#allocation6 + $0x518] sm:$0xff] }
 0x277   :  { %4091 = vmatpush2.bf16.msra.mxu1 %v7051_v18  ;;  %4049 = vmatprep.subr.bf16.mxu0 %v6916_v33  ;;  %v642_v18 = vld [vmem:[#allocation6 + $0x538] sm:$0xff]  ;;  %v6637_v33 = vcombine.low %v518_v7, %v522_v8 }
 0x278   :  { %4092 = vmatprep.subr.bf16.mxu1 %v7044_v44  ;;  %v6757_v0 = vcombine.low %v638_v31, %v642_v18 }
 0x27a   :  { %4050 = vmatpush2.bf16.msra.mxu0 %v6915_v55  ;;  %v506_v55 = vld [vmem:[#allocation6 + $0xf8] sm:$0xff] }
 0x27b   :  { %4093 = vmatpush2.bf16.msra.mxu1 %v7043_v57  ;;  %4105 = vmatprep.subr.bf16.mxu0 %v6654_v62  ;;  %v630_v57 = vld [vmem:[#allocation6 + $0x4d8] sm:$0xff]  ;;  %v6622_v1 = vcombine.high %v502_v54, %v506_v55 }
 0x27c   :  { %4148 = vmatprep.subr.bf16.mxu1 %v6782_v11  ;;  %v634_v62 = vld [vmem:[#allocation6 + $0x4f8] sm:$0xff]  ;;  %v6629_v11 = vcombine.low %v510_v25, %v514_v27 }
 0x27d   :  { %v3795_v9 = vpop.f32.mrf.mxu0  ;;  %4052 = vmatmul.mubr.bf16.vlgmr.msra.gmra.mxu0 %v8233_v51  ;;  %v6749_v7 = vcombine.low %v630_v57, %v634_v62  ;;  %v482_v25 = vld [vmem:[#allocation6 + $0x38] sm:$0xff] }
 0x27e   :  { %v3796_v13 = vadd.f32 %v3795_v9, %v1000_v2  ;;  %v3838_v14 = vpop.f32.mrf.mxu1  ;;  %4095 = vmatmul.mubr.bf16.vlgmr.msra.gmra.mxu1 %v8235_v53  ;;  %4106 = vmatpush1.bf16.msra.mxu0 %v6653_v3  ;;  %v494_v3 = vld [vmem:[#allocation6 + $0x98] sm:$0xff] }
 0x27f   :  { %4137 = vmatprep.mubr.bf16.mxu0 %v8193_v26  ;;  %4149 = vmatpush1.bf16.msra.mxu1 %v6781_v4  ;;  %v8286_v56 = vpop.f32.mrf.mxu0  ;;  %v626_v4 = vld [vmem:[#allocation6 + $0x4b8] sm:$0xff]  ;;  %v6614_v8 = vcombine.high %v494_v3, %v498_v36 }
 0x280   :  { %v8288_v19 = vadd.f32 %v3838_v14, %v3796_v13  ;;  %4180 = vmatprep.mubr.bf16.mxu1 %v8197_v30  ;;  %v8291_v20 = vpop.f32.mrf.mxu1  ;;  %4107 = vmatprep.subr.bf16.mxu0 %v6646_v6  ;;  %v6758_v30 = vcombine.high %v638_v31, %v642_v18  ;;  %v6621_v6 = vcombine.low %v502_v54, %v506_v55  ;;  %v618_v13 = vld [vmem:[#allocation6 + $0x478] sm:$0xff] }
 0x281   :  { %v3799_v28 = vpop.f32.mrf.mxu0  ;;  %4150 = vmatprep.subr.bf16.mxu1 %v6774_v10  ;;  %v6742_v9 = vcombine.high %v622_v37, %v626_v4  ;;  %v486_v10 = vld [vmem:[#allocation6 + $0x58] sm:$0xff]  ;;  %v6613_v14 = vcombine.low %v494_v3, %v498_v36  ;;  %v6733_v18 = vcombine.low %v614_v38, %v618_v13 }
 0x282   :  { %v3800_v26 = vadd.f32 %v3799_v28, %v1000_v2  ;;  %4108 = vmatpush1.bf16.msra.mxu0 %v6645_v15  ;;  %v3842_v44 = vpop.f32.mrf.mxu1  ;;  %v6750_v2 = vcombine.high %v630_v57, %v634_v62  ;;  %v6741_v15 = vcombine.low %v622_v37, %v626_v4  ;;  %v606_v27 = vld [vmem:[#allocation6 + $0x418] sm:$0xff]  ;;  %v6605_v31 = vcombine.low %v486_v10, %v490_v12 }
 0x283   :  { %4151 = vmatpush1.bf16.msra.mxu1 %v6773_v16  ;;  %4109 = vmatprep.subr.bf16.mxu0 %v6638_v49  ;;  %v6606_v16 = vcombine.high %v486_v10, %v490_v12  ;;  %v6734_v49 = vcombine.high %v614_v38, %v618_v13  ;;  %v610_v28 = vld [vmem:[#allocation6 + $0x438] sm:$0xff] }
 0x284   :  { %v8293_v43 = vadd.f32 %v3842_v44, %v3800_v26  ;;  %4152 = vmatprep.subr.bf16.mxu1 %v6766_v22  ;;  %v478_v22 = vld [vmem:[#allocation6 + $0x18] sm:$0xff]  ;;  %v6725_v55 = vcombine.low %v606_v27, %v610_v28 }
 0x285   :  { %v6598_v26 = vcombine.high %v478_v22, %v482_v25  ;;  %v598_v44 = vld [vmem:[#allocation6 + $0x3d8] sm:$0xff]  ;;  %v6597_v54 = vcombine.low %v478_v22, %v482_v25 }
 0x286   :  { %4110 = vmatpush1.bf16.msra.mxu0 %v6637_v33  ;;  %v6726_v33 = vcombine.high %v606_v27, %v610_v28 }
 0x287   :  { %4153 = vmatpush1.bf16.msra.mxu1 %v6765_v35  ;;  %4111 = vmatprep.subr.bf16.mxu0 %v6630_v39  ;;  %v602_v35 = vld [vmem:[#allocation6 + $0x3f8] sm:$0xff] }
 0x288   :  { %4154 = vmatprep.subr.bf16.mxu1 %v6758_v30  ;;  %v726_v39 = vld [vmem:[#allocation6 + $0x7d8] sm:$0xff]  ;;  %v6718_v57 = vcombine.high %v598_v44, %v602_v35  ;;  %v6717_v3 = vcombine.low %v598_v44, %v602_v35 }
 0x289   :  { %v730_v30 = vld [vmem:[#allocation6 + $0x7f8] sm:$0xff] }
 0x28a   :  { %4112 = vmatpush1.bf16.msra.mxu0 %v6629_v11  ;;  %v6846_v62 = vcombine.high %v726_v39, %v730_v30  ;;  %v590_v11 = vld [vmem:[#allocation6 + $0x398] sm:$0xff]  ;;  %v6845_v36 = vcombine.low %v726_v39, %v730_v30 }
 0x28b   :  { %4155 = vmatpush1.bf16.msra.mxu1 %v6757_v0  ;;  %4113 = vmatprep.subr.bf16.mxu0 %v6622_v1  ;;  %v594_v0 = vld [vmem:[#allocation6 + $0x3b8] sm:$0xff] }
 0x28c   :  { %4156 = vmatprep.subr.bf16.mxu1 %v6750_v2  ;;  %v718_v1 = vld [vmem:[#allocation6 + $0x798] sm:$0xff]  ;;  %v6710_v37 = vcombine.high %v590_v11, %v594_v0  ;;  %v6709_v10 = vcombine.low %v590_v11, %v594_v0 }
 0x28d   :  { %v722_v2 = vld [vmem:[#allocation6 + $0x7b8] sm:$0xff] }
 0x28e   :  { %4114 = vmatpush1.bf16.msra.mxu0 %v6621_v6  ;;  %v6838_v4 = vcombine.high %v718_v1, %v722_v2  ;;  %v582_v6 = vld [vmem:[#allocation6 + $0x358] sm:$0xff]  ;;  %v6837_v12 = vcombine.low %v718_v1, %v722_v2 }
 0x28f   :  { %4157 = vmatpush1.bf16.msra.mxu1 %v6749_v7  ;;  %4115 = vmatprep.subr.bf16.mxu0 %v6614_v8  ;;  %v586_v7 = vld [vmem:[#allocation6 + $0x378] sm:$0xff] }
 0x290   :  { %4158 = vmatprep.subr.bf16.mxu1 %v6742_v9  ;;  %v710_v8 = vld [vmem:[#allocation6 + $0x758] sm:$0xff]  ;;  %v6702_v38 = vcombine.high %v582_v6, %v586_v7  ;;  %v6701_v22 = vcombine.low %v582_v6, %v586_v7 }
 0x291   :  { %v714_v9 = vld [vmem:[#allocation6 + $0x778] sm:$0xff] }
 0x292   :  { %4116 = vmatpush1.bf16.msra.mxu0 %v6613_v14  ;;  %v6830_v13 = vcombine.high %v710_v8, %v714_v9  ;;  %v574_v14 = vld [vmem:[#allocation6 + $0x318] sm:$0xff]  ;;  %v6829_v25 = vcombine.low %v710_v8, %v714_v9 }
 0x293   :  { %4159 = vmatpush1.bf16.msra.mxu1 %v6741_v15  ;;  %4117 = vmatprep.subr.bf16.mxu0 %v6606_v16  ;;  %v578_v15 = vld [vmem:[#allocation6 + $0x338] sm:$0xff] }
 0x294   :  { %4160 = vmatprep.subr.bf16.mxu1 %v6734_v49  ;;  %v702_v16 = vld [vmem:[#allocation6 + $0x718] sm:$0xff]  ;;  %v6694_v27 = vcombine.high %v574_v14, %v578_v15  ;;  %v6693_v44 = vcombine.low %v574_v14, %v578_v15 }
 0x295   :  { %v706_v49 = vld [vmem:[#allocation6 + $0x738] sm:$0xff] }
 0x296   :  { %4118 = vmatpush1.bf16.msra.mxu0 %v6605_v31  ;;  %v6822_v28 = vcombine.high %v702_v16, %v706_v49  ;;  %v566_v31 = vld [vmem:[#allocation6 + $0x2d8] sm:$0xff]  ;;  %v6821_v35 = vcombine.low %v702_v16, %v706_v49 }
 0x297   :  { %4161 = vmatpush1.bf16.msra.mxu1 %v6733_v18  ;;  %4119 = vmatprep.subr.bf16.mxu0 %v6598_v26  ;;  %v570_v18 = vld [vmem:[#allocation6 + $0x2f8] sm:$0xff] }
 0x298   :  { %4162 = vmatprep.subr.bf16.mxu1 %v6726_v33  ;;  %v694_v26 = vld [vmem:[#allocation6 + $0x6d8] sm:$0xff]  ;;  %v6686_v39 = vcombine.high %v566_v31, %v570_v18  ;;  %v6685_v11 = vcombine.low %v566_v31, %v570_v18 }
 0x299   :  { %v698_v33 = vld [vmem:[#allocation6 + $0x6f8] sm:$0xff] }
 0x29a   :  { %4120 = vmatpush1.bf16.msra.mxu0 %v6597_v54  ;;  %v6814_v30 = vcombine.high %v694_v26, %v698_v33  ;;  %v558_v54 = vld [vmem:[#allocation6 + $0x298] sm:$0xff]  ;;  %v6813_v0 = vcombine.low %v694_v26, %v698_v33 }
 0x29b   :  { %4163 = vmatpush1.bf16.msra.mxu1 %v6725_v55  ;;  %4121 = vmatprep.subr.bf16.mxu0 %v6718_v57  ;;  %v562_v55 = vld [vmem:[#allocation6 + $0x2b8] sm:$0xff] }
 0x29c   :  { %4164 = vmatprep.subr.bf16.mxu1 %v6846_v62  ;;  %v686_v57 = vld [vmem:[#allocation6 + $0x698] sm:$0xff]  ;;  %v6678_v1 = vcombine.high %v558_v54, %v562_v55  ;;  %v6677_v6 = vcombine.low %v558_v54, %v562_v55  ;;  %v8295_v55 = vpop.f32.mrf.mxu0 }
 0x29d   :  { %v690_v62 = vld [vmem:[#allocation6 + $0x6b8] sm:$0xff] }
 0x29e   :  { %4122 = vmatpush2.bf16.msra.mxu0 %v6717_v3  ;;  %v6806_v2 = vcombine.high %v686_v57, %v690_v62  ;;  %v550_v3 = vld [vmem:[#allocation6 + $0x258] sm:$0xff]  ;;  %v6805_v7 = vcombine.low %v686_v57, %v690_v62  ;;  %v8297_v62 = vpop.f32.mrf.mxu1 }
 0x29f   :  { %4165 = vmatpush2.bf16.msra.mxu1 %v6845_v36  ;;  %4123 = vmatprep.subr.bf16.mxu0 %v6710_v37  ;;  %v554_v36 = vld [vmem:[#allocation6 + $0x278] sm:$0xff] }
 0x2a0   :  { %4166 = vmatprep.subr.bf16.mxu1 %v6838_v4  ;;  %v678_v37 = vld [vmem:[#allocation6 + $0x658] sm:$0xff]  ;;  %v6670_v8 = vcombine.high %v550_v3, %v554_v36  ;;  %v6669_v14 = vcombine.low %v550_v3, %v554_v36 }
 0x2a1   :  { %v682_v4 = vld [vmem:[#allocation6 + $0x678] sm:$0xff] }
 0x2a2   :  { %4124 = vmatpush2.bf16.msra.mxu0 %v6709_v10  ;;  %v6798_v9 = vcombine.high %v678_v37, %v682_v4  ;;  %v542_v10 = vld [vmem:[#allocation6 + $0x218] sm:$0xff]  ;;  %v6797_v15 = vcombine.low %v678_v37, %v682_v4 }
 0x2a3   :  { %4167 = vmatpush2.bf16.msra.mxu1 %v6837_v12  ;;  %4125 = vmatprep.subr.bf16.mxu0 %v6702_v38  ;;  %v546_v12 = vld [vmem:[#allocation6 + $0x238] sm:$0xff] }
 0x2a4   :  { %4168 = vmatprep.subr.bf16.mxu1 %v6830_v13  ;;  %v670_v38 = vld [vmem:[#allocation6 + $0x618] sm:$0xff]  ;;  %v6662_v16 = vcombine.high %v542_v10, %v546_v12  ;;  %v6661_v31 = vcombine.low %v542_v10, %v546_v12 }
 0x2a5   :  { %v674_v13 = vld [vmem:[#allocation6 + $0x638] sm:$0xff] }
 0x2a6   :  { %4126 = vmatpush2.bf16.msra.mxu0 %v6701_v22  ;;  %v6790_v49 = vcombine.high %v670_v38, %v674_v13  ;;  %v790_v22 = vld [vmem:[#allocation6 + $0x9d8] sm:$0xff]  ;;  %v6789_v18 = vcombine.low %v670_v38, %v674_v13 }
 0x2a7   :  { %4169 = vmatpush2.bf16.msra.mxu1 %v6829_v25  ;;  %4127 = vmatprep.subr.bf16.mxu0 %v6694_v27  ;;  %v794_v25 = vld [vmem:[#allocation6 + $0x9f8] sm:$0xff] }
 0x2a8   :  { %4170 = vmatprep.subr.bf16.mxu1 %v6822_v28  ;;  %v918_v27 = vld [vmem:[#allocation6 + $0xdd8] sm:$0xff]  ;;  %v6910_v26 = vcombine.high %v790_v22, %v794_v25 }
 0x2a9   :  { %v922_v28 = vld [vmem:[#allocation6 + $0xdf8] sm:$0xff] }
 0x2aa   :  { %4128 = vmatpush2.bf16.msra.mxu0 %v6693_v44  ;;  %v7038_v33 = vcombine.high %v918_v27, %v922_v28  ;;  %v782_v44 = vld [vmem:[#allocation6 + $0x998] sm:$0xff]  ;;  %v7037_v57 = vcombine.low %v918_v27, %v922_v28 }
 0x2ab   :  { %4171 = vmatpush2.bf16.msra.mxu1 %v6821_v35  ;;  %4129 = vmatprep.subr.bf16.mxu0 %v6686_v39  ;;  %v786_v35 = vld [vmem:[#allocation6 + $0x9b8] sm:$0xff]  ;;  %v6909_v39 = vcombine.low %v790_v22, %v794_v25 }
 0x2ac   :  { %4172 = vmatprep.subr.bf16.mxu1 %v6814_v30  ;;  %v910_v30 = vld [vmem:[#allocation6 + $0xd98] sm:$0xff] }
 0x2ad   :  { %v914_v54 = vld [vmem:[#allocation6 + $0xdb8] sm:$0xff] }
 0x2ae   :  { %4130 = vmatpush2.bf16.msra.mxu0 %v6685_v11  ;;  %v6902_v11 = vcombine.high %v782_v44, %v786_v35  ;;  %v7030_v3 = vcombine.high %v910_v30, %v914_v54  ;;  %v902_v36 = vld [vmem:[#allocation6 + $0xd58] sm:$0xff] }
 0x2af   :  { %4173 = vmatpush2.bf16.msra.mxu1 %v6813_v0  ;;  %4131 = vmatprep.subr.bf16.mxu0 %v6678_v1  ;;  %v774_v0 = vld [vmem:[#allocation6 + $0x958] sm:$0xff] }
 0x2b0   :  { %4174 = vmatprep.subr.bf16.mxu1 %v6806_v2  ;;  %v778_v1 = vld [vmem:[#allocation6 + $0x978] sm:$0xff] }
 0x2b1   :  { %v906_v37 = vld [vmem:[#allocation6 + $0xd78] sm:$0xff]  ;;  %v6894_v10 = vcombine.high %v774_v0, %v778_v1 }
 0x2b2   :  { %4132 = vmatpush2.bf16.msra.mxu0 %v6677_v6  ;;  %v7022_v38 = vcombine.high %v902_v36, %v906_v37  ;;  %v770_v13 = vld [vmem:[#allocation6 + $0x938] sm:$0xff]  ;;  %v7021_v22 = vcombine.low %v902_v36, %v906_v37 }
 0x2b3   :  { %4175 = vmatpush2.bf16.msra.mxu1 %v6805_v7  ;;  %4133 = vmatprep.subr.bf16.mxu0 %v6670_v8  ;;  %v6901_v7 = vcombine.low %v782_v44, %v786_v35  ;;  %v758_v28 = vld [vmem:[#allocation6 + $0x8d8] sm:$0xff] }
 0x2b4   :  { %4176 = vmatprep.subr.bf16.mxu1 %v6798_v9  ;;  %v7029_v9 = vcombine.low %v910_v30, %v914_v54 }
 0x2b6   :  { %4134 = vmatpush2.bf16.msra.mxu0 %v6669_v14 }
 0x2b7   :  { %4177 = vmatpush2.bf16.msra.mxu1 %v6797_v15  ;;  %4135 = vmatprep.subr.bf16.mxu0 %v6662_v16  ;;  %v898_v15 = vld [vmem:[#allocation6 + $0xd38] sm:$0xff]  ;;  %v6893_v16 = vcombine.low %v774_v0, %v778_v1 }
 0x2b8   :  { %4178 = vmatprep.subr.bf16.mxu1 %v6790_v49  ;;  %v878_v0 = vld [vmem:[#allocation6 + $0xc98] sm:$0xff] }
 0x2b9   :  { %v882_v1 = vld [vmem:[#allocation6 + $0xcb8] sm:$0xff] }
 0x2ba   :  { %4136 = vmatpush2.bf16.msra.mxu0 %v6661_v31  ;;  %v762_v31 = vld [vmem:[#allocation6 + $0x8f8] sm:$0xff]  ;;  %v6998_v37 = vcombine.high %v878_v0, %v882_v1 }
 0x2bb   :  { %4179 = vmatpush2.bf16.msra.mxu1 %v6789_v18  ;;  %4191 = vmatprep.subr.bf16.mxu0 %v6910_v26  ;;  %v886_v18 = vld [vmem:[#allocation6 + $0xcd8] sm:$0xff] }
 0x2bc   :  { %4234 = vmatprep.subr.bf16.mxu1 %v7038_v33  ;;  %v890_v26 = vld [vmem:[#allocation6 + $0xcf8] sm:$0xff] }
 0x2bd   :  { %v3881_v2 = vpop.f32.mrf.mxu0  ;;  %4138 = vmatmul.mubr.bf16.vlgmr.msra.gmra.mxu0 %v8195_v29  ;;  %v7006_v54 = vcombine.high %v886_v18, %v890_v26 }
 0x2be   :  { %v3882_v4 = vadd.f32 %v3881_v2, %v8288_v19  ;;  %v3924_v6 = vpop.f32.mrf.mxu1  ;;  %4181 = vmatmul.mubr.bf16.vlgmr.msra.gmra.mxu1 %v8201_v34  ;;  %4192 = vmatpush1.bf16.msra.mxu0 %v6909_v39  ;;  %v766_v19 = vld [vmem:[#allocation6 + $0x918] sm:$0xff]  ;;  %v6878_v39 = vcombine.high %v758_v28, %v762_v31  ;;  %v6877_v2 = vcombine.low %v758_v28, %v762_v31 }
 0x2bf   :  { %4223 = vmatprep.mubr.bf16.mxu0 %v8215_v5  ;;  %4235 = vmatpush1.bf16.msra.mxu1 %v7037_v57  ;;  %v8303_v8 = vpop.f32.mrf.mxu0  ;;  %v894_v34 = vld [vmem:[#allocation6 + $0xd18] sm:$0xff]  ;;  %v6886_v25 = vcombine.high %v766_v19, %v770_v13  ;;  %v6885_v35 = vcombine.low %v766_v19, %v770_v13 }
 0x2c0   :  { %v3925_v12 = vadd.f32 %v3924_v6, %v3882_v4  ;;  %4266 = vmatprep.mubr.bf16.mxu1 %v8217_v42  ;;  %v8306_v29 = vpop.f32.mrf.mxu1  ;;  %4193 = vmatprep.subr.bf16.mxu0 %v6902_v11  ;;  %v7014_v27 = vcombine.high %v894_v34, %v898_v15  ;;  %v750_v57 = vld [vmem:[#allocation6 + $0x898] sm:$0xff] }
 0x2c1   :  { %v3885_v14 = vpop.f32.mrf.mxu0  ;;  %4236 = vmatprep.subr.bf16.mxu1 %v7030_v3  ;;  %v754_v11 = vld [vmem:[#allocation6 + $0x8b8] sm:$0xff]  ;;  %v7005_v3 = vcombine.low %v886_v18, %v890_v26 }
 0x2c2   :  { %v3886_v5 = vadd.f32 %v3885_v14, %v8293_v43  ;;  %4194 = vmatpush1.bf16.msra.mxu0 %v6901_v7  ;;  %v3928_v49 = vpop.f32.mrf.mxu1  ;;  %v4279_v33 = vmax.f32 %v3925_v12, 0.0  ;;  %v7013_v43 = vcombine.low %v894_v34, %v898_v15  ;;  %v6870_v36 = vcombine.high %v750_v57, %v754_v11  ;;  %v742_v4 = vld [vmem:[#allocation6 + $0x858] sm:$0xff] }
 0x2c3   :  { %4237 = vmatpush1.bf16.msra.mxu1 %v7029_v9  ;;  %4195 = vmatprep.subr.bf16.mxu0 %v6894_v10  ;;  %v746_v6 = vld [vmem:[#allocation6 + $0x878] sm:$0xff]  ;;  %v6869_v10 = vcombine.low %v750_v57, %v754_v11  ;;  %v6997_v12 = vcombine.low %v878_v0, %v882_v1 }
 0x2c4   :  { %v3929_v42 = vadd.f32 %v3928_v49, %v3886_v5  ;;  %4238 = vmatprep.subr.bf16.mxu1 %v7022_v38  ;;  %v870_v7 = vld [vmem:[#allocation6 + $0xc58] sm:$0xff]  ;;  %v6862_v38 = vcombine.high %v742_v4, %v746_v6  ;;  %v6861_v5 = vcombine.low %v742_v4, %v746_v6 }
 0x2c5   :  { %v874_v9 = vld [vmem:[#allocation6 + $0xc78] sm:$0xff] }
 0x2c6   :  { %v4287_v44 = vmax.f32 %v3929_v42, 0.0  ;;  %4196 = vmatpush1.bf16.msra.mxu0 %v6893_v16  ;;  %v6990_v19 = vcombine.high %v870_v7, %v874_v9  ;;  %v734_v13 = vld [vmem:[#allocation6 + $0x818] sm:$0xff]  ;;  %v6989_v16 = vcombine.low %v870_v7, %v874_v9 }
 0x2c7   :  { %4239 = vmatpush1.bf16.msra.mxu1 %v7021_v22  ;;  %4197 = vmatprep.subr.bf16.mxu0 %v6886_v25  ;;  %v738_v14 = vld [vmem:[#allocation6 + $0x838] sm:$0xff] }
 0x2c8   :  { %v8309_v30 = vpack.c.bf16 %v4287_v44, %v4279_v33  ;;  %4240 = vmatprep.subr.bf16.mxu1 %v7014_v27  ;;  %v862_v34 = vld [vmem:[#allocation6 + $0xc18] sm:$0xff]  ;;  %v6854_v49 = vcombine.high %v734_v13, %v738_v14  ;;  %v6853_v31 = vcombine.low %v734_v13, %v738_v14 }
 0x2c9   :  { %v866_v15 = vld [vmem:[#allocation6 + $0xc38] sm:$0xff] }
 0x2ca   :  { %4198 = vmatpush1.bf16.msra.mxu0 %v6885_v35  ;;  %v6982_v22 = vcombine.high %v862_v34, %v866_v15  ;;  %v854_v25 = vld [vmem:[#allocation6 + $0xbd8] sm:$0xff]  ;;  %v6981_v18 = vcombine.low %v862_v34, %v866_v15 }
 0x2cb   :  { %4241 = vmatpush1.bf16.msra.mxu1 %v7013_v43  ;;  %4199 = vmatprep.subr.bf16.mxu0 %v6878_v39  ;;  %v858_v42 = vld [vmem:[#allocation6 + $0xbf8] sm:$0xff] }
 0x2cc   :  { %4242 = vmatprep.subr.bf16.mxu1 %v7006_v54  ;;  %v982_v27 = vld [vmem:[#allocation6 + $0xfd8] sm:$0xff]  ;;  %v6974_v26 = vcombine.high %v854_v25, %v858_v42  ;;  %v6973_v54 = vcombine.low %v854_v25, %v858_v42 }
 0x2cd   :  { %v986_v28 = vld [vmem:[#allocation6 + $0xff8] sm:$0xff] }
 0x2ce   :  { %4200 = vmatpush1.bf16.msra.mxu0 %v6877_v2  ;;  %v7102_v33 = vcombine.high %v982_v27, %v986_v28  ;;  %v846_v44 = vld [vmem:[#allocation6 + $0xb98] sm:$0xff]  ;;  %v7101_v57 = vcombine.low %v982_v27, %v986_v28 }
 0x2cf   :  { %4243 = vmatpush1.bf16.msra.mxu1 %v7005_v3  ;;  %4201 = vmatprep.subr.bf16.mxu0 %v6870_v36  ;;  %v850_v35 = vld [vmem:[#allocation6 + $0xbb8] sm:$0xff] }
 0x2d0   :  { %4244 = vmatprep.subr.bf16.mxu1 %v6998_v37  ;;  %v974_v43 = vld [vmem:[#allocation6 + $0xf98] sm:$0xff]  ;;  %v6966_v11 = vcombine.high %v846_v44, %v850_v35  ;;  %v6965_v37 = vcombine.low %v846_v44, %v850_v35 }
 0x2d1   :  { %v978_v39 = vld [vmem:[#allocation6 + $0xfb8] sm:$0xff] }
 0x2d2   :  { %4202 = vmatpush1.bf16.msra.mxu0 %v6869_v10  ;;  %v7094_v0 = vcombine.high %v974_v43, %v978_v39  ;;  %v838_v1 = vld [vmem:[#allocation6 + $0xb58] sm:$0xff]  ;;  %v7093_v4 = vcombine.low %v974_v43, %v978_v39 }
 0x2d3   :  { %4245 = vmatpush1.bf16.msra.mxu1 %v6997_v12  ;;  %4203 = vmatprep.subr.bf16.mxu0 %v6862_v38  ;;  %v842_v2 = vld [vmem:[#allocation6 + $0xb78] sm:$0xff] }
 0x2d4   :  { %4246 = vmatprep.subr.bf16.mxu1 %v6990_v19  ;;  %v966_v3 = vld [vmem:[#allocation6 + $0xf58] sm:$0xff]  ;;  %v6958_v6 = vcombine.high %v838_v1, %v842_v2  ;;  %v6957_v19 = vcombine.low %v838_v1, %v842_v2 }
 0x2d5   :  { %v970_v36 = vld [vmem:[#allocation6 + $0xf78] sm:$0xff] }
 0x2d6   :  { %4204 = vmatpush1.bf16.msra.mxu0 %v6861_v5  ;;  %v7086_v7 = vcombine.high %v966_v3, %v970_v36  ;;  %v830_v9 = vld [vmem:[#allocation6 + $0xb18] sm:$0xff]  ;;  %v7085_v13 = vcombine.low %v966_v3, %v970_v36 }
 0x2d7   :  { %4247 = vmatpush1.bf16.msra.mxu1 %v6989_v16  ;;  %4205 = vmatprep.subr.bf16.mxu0 %v6854_v49  ;;  %v834_v10 = vld [vmem:[#allocation6 + $0xb38] sm:$0xff] }
 0x2d8   :  { %4248 = vmatprep.subr.bf16.mxu1 %v6982_v22  ;;  %v958_v12 = vld [vmem:[#allocation6 + $0xf18] sm:$0xff]  ;;  %v6950_v14 = vcombine.high %v830_v9, %v834_v10  ;;  %v6949_v22 = vcombine.low %v830_v9, %v834_v10 }
 0x2d9   :  { %v962_v38 = vld [vmem:[#allocation6 + $0xf38] sm:$0xff] }
 0x2da   :  { %4206 = vmatpush1.bf16.msra.mxu0 %v6853_v31  ;;  %v7078_v34 = vcombine.high %v958_v12, %v962_v38  ;;  %v822_v15 = vld [vmem:[#allocation6 + $0xad8] sm:$0xff]  ;;  %v7077_v25 = vcombine.low %v958_v12, %v962_v38 }
 0x2db   :  { %4249 = vmatpush1.bf16.msra.mxu1 %v6981_v18  ;;  %4207 = vmatprep.subr.bf16.mxu0 %v6974_v26  ;;  %v826_v5 = vld [vmem:[#allocation6 + $0xaf8] sm:$0xff]  ;;  %v8311_v18 = vld [vmem:[#allocation7] sm:$0xff] }
 0x2dc   :  { %4250 = vmatprep.subr.bf16.mxu1 %v7102_v33  ;;  %v950_v16 = vld [vmem:[#allocation6 + $0xed8] sm:$0xff]  ;;  %v6942_v42 = vcombine.high %v822_v15, %v826_v5  ;;  %v996_v26 = vrot.slane %v8311_v18, %v8160_v46  ;;  %v1004_v35 = vrot.slane %v8311_v18, %v8166_v48  ;;  %v6941_v43 = vcombine.low %v822_v15, %v826_v5 }
 0x2dd   :  { %v954_v49 = vld [vmem:[#allocation6 + $0xef8] sm:$0xff] }
 0x2de   :  { %4208 = vmatpush2.bf16.msra.mxu0 %v6973_v54  ;;  %v7070_v27 = vcombine.high %v950_v16, %v954_v49  ;;  %v814_v28 = vld [vmem:[#allocation6 + $0xa98] sm:$0xff]  ;;  %v3630_v39 = vadd.f32 %v8261_v21, %v996_v26  ;;  %v7069_v54 = vcombine.low %v950_v16, %v954_v49  ;;  %v3626_v3 = vadd.f32 %v8252_v24, %v996_v26 }
 0x2df   :  { %4251 = vmatpush2.bf16.msra.mxu1 %v7101_v57  ;;  %4209 = vmatprep.subr.bf16.mxu0 %v6966_v11  ;;  %v818_v31 = vld [vmem:[#allocation6 + $0xab8] sm:$0xff]  ;;  %v3802_v11 = vadd.f32 %v8295_v55, %v1004_v35 }
 0x2e0   :  { %4252 = vmatprep.subr.bf16.mxu1 %v7094_v0  ;;  %v942_v33 = vld [vmem:[#allocation6 + $0xe98] sm:$0xff]  ;;  %v6934_v57 = vcombine.high %v814_v28, %v818_v31  ;;  %v3673_v21 = vadd.f32 %v8263_v23, %v3630_v39  ;;  %v3669_v24 = vadd.f32 %v8257_v32, %v3626_v3 }
 0x2e1   :  { %v946_v44 = vld [vmem:[#allocation6 + $0xeb8] sm:$0xff]  ;;  %v3845_v55 = vadd.f32 %v8297_v62, %v3802_v11 }
 0x2e2   :  { %4210 = vmatpush2.bf16.msra.mxu0 %v6965_v37  ;;  %v7062_v0 = vcombine.high %v942_v33, %v946_v44  ;;  %v806_v1 = vld [vmem:[#allocation6 + $0xa58] sm:$0xff]  ;;  %v7061_v9 = vcombine.low %v942_v33, %v946_v44  ;;  %v3712_v5 = vadd.f32 %v8269_v52, %v3669_v24 }
 0x2e3   :  { %4253 = vmatpush2.bf16.msra.mxu1 %v7093_v4  ;;  %4211 = vmatprep.subr.bf16.mxu0 %v6958_v6  ;;  %v810_v2 = vld [vmem:[#allocation6 + $0xa78] sm:$0xff]  ;;  %v3798_v4 = vadd.f32 %v8286_v56, %v1004_v35  ;;  %v6933_v6 = vcombine.low %v814_v28, %v818_v31 }
 0x2e4   :  { %4254 = vmatprep.subr.bf16.mxu1 %v7086_v7  ;;  %v934_v36 = vld [vmem:[#allocation6 + $0xe58] sm:$0xff]  ;;  %v3887_v7 = vpop.f32.mrf.mxu0  ;;  %v6926_v10 = vcombine.high %v806_v1, %v810_v2  ;;  %v6925_v15 = vcombine.low %v806_v1, %v810_v2 }
 0x2e5   :  { %v938_v37 = vld [vmem:[#allocation6 + $0xe78] sm:$0xff]  ;;  %v3888_v23 = vadd.f32 %v3887_v7, %v3845_v55 }
 0x2e6   :  { %4212 = vmatpush2.bf16.msra.mxu0 %v6957_v19  ;;  %v7054_v12 = vcombine.high %v934_v36, %v938_v37  ;;  %v798_v38 = vld [vmem:[#allocation6 + $0xa18] sm:$0xff]  ;;  %v7053_v62 = vcombine.low %v934_v36, %v938_v37 }
 0x2e7   :  { %4255 = vmatpush2.bf16.msra.mxu1 %v7085_v13  ;;  %4213 = vmatprep.subr.bf16.mxu0 %v6950_v14  ;;  %v802_v19 = vld [vmem:[#allocation6 + $0xa38] sm:$0xff]  ;;  %v3716_v13 = vadd.f32 %v8279_v41, %v3673_v21  ;;  %v3930_v41 = vpop.f32.mrf.mxu1 }
 0x2e8   :  { %4256 = vmatprep.subr.bf16.mxu1 %v7078_v34  ;;  %v926_v56 = vld [vmem:[#allocation6 + $0xe18] sm:$0xff]  ;;  %v3841_v34 = vadd.f32 %v8291_v20, %v3798_v4  ;;  %v6918_v16 = vcombine.high %v798_v38, %v802_v19  ;;  %v3755_v20 = vadd.f32 %v8272_v60, %v3712_v5 }
 0x2e9   :  { %v930_v14 = vld [vmem:[#allocation6 + $0xe38] sm:$0xff]  ;;  %v3759_v32 = vadd.f32 %v8281_v40, %v3716_v13 }
 0x2ea   :  { %4214 = vmatpush2.bf16.msra.mxu0 %v6949_v22  ;;  %v3884_v49 = vadd.f32 %v8303_v8, %v3841_v34  ;;  %v7046_v22 = vcombine.high %v926_v56, %v930_v14  ;;  %v7453_v52 = vld [vmem:[#allocation9 + $0xe4] ss:$16 sps:$4 sm:$0xff]   ;;  %v7451_v33 = vld [vmem:[#allocation9 + $0xe0] ss:$16 sps:$4 sm:$0xff]   ;;  %v4278_v44 = vmax.f32 %v3755_v20, 0.0 }
 0x2eb   :  { %4257 = vmatpush2.bf16.msra.mxu1 %v7077_v25  ;;  %4215 = vmatprep.subr.bf16.mxu0 %v6942_v42  ;;  %v3931_v25 = vadd.f32 %v3930_v41, %v3888_v23  ;;  %v6917_v42 = vcombine.low %v798_v38, %v802_v19  ;;  %v7456_v31 = vld [vmem:[#allocation9 + $0x2e4] ss:$16 sps:$4 sm:$0xff]   ;;  %v4286_v26 = vmax.f32 %v3759_v32, 0.0  ;;  %v7454_v40 = vld [vmem:[#allocation9 + $0x2e0] ss:$16 sps:$4 sm:$0xff]  }
 0x2ec   :  { %4258 = vmatprep.subr.bf16.mxu1 %v7070_v27  ;;  %v7045_v27 = vcombine.low %v926_v56, %v930_v14  ;;  %v3927_v28 = vadd.f32 %v8306_v29, %v3884_v49  ;;  %v7462_v39 = vld [vmem:[#allocation9 + $0x2c4] ss:$16 sps:$4 sm:$0xff]   ;;  %v7457_v29 = vld [vmem:[#allocation9 + $0xc0] ss:$16 sps:$4 sm:$0xff]  }
 0x2ed   :  { %v4288_v8 = vmax.f32 %v3931_v25, 0.0  ;;  %v8331_v60 = vpack.c.bf16 %v4286_v26, %v4278_v44  ;;  %v7465_v11 = vld [vmem:[#allocation9 + $0xa4] ss:$16 sps:$4 sm:$0xff]   ;;  %v7463_v1 = vld [vmem:[#allocation9 + $0xa0] ss:$16 sps:$4 sm:$0xff]  }
 0x2ee   :  { %4216 = vmatpush2.bf16.msra.mxu0 %v6941_v43  ;;  %v4280_v35 = vmax.f32 %v3927_v28, 0.0  ;;  %v7459_v43 = vld [vmem:[#allocation9 + $0xc4] ss:$16 sps:$4 sm:$0xff]   ;;  %v7469_v3 = vld [vmem:[#allocation9 + $0x80] ss:$16 sps:$4 sm:$0xff]  }
 0x2ef   :  { %4259 = vmatpush2.bf16.msra.mxu1 %v7069_v54  ;;  %4217 = vmatprep.subr.bf16.mxu0 %v6934_v57  ;;  %v7460_v57 = vld [vmem:[#allocation9 + $0x2c0] ss:$16 sps:$4 sm:$0xff]   ;;  %v7471_v2 = vld [vmem:[#allocation9 + $0x84] ss:$16 sps:$4 sm:$0xff]  }
 0x2f0   :  { %4260 = vmatprep.subr.bf16.mxu1 %v7062_v0  ;;  %v8334_v54 = vpack.c.bf16 %v4288_v8, %v4280_v35  ;;  %v7468_v0 = vld [vmem:[#allocation9 + $0x2a4] ss:$16 sps:$4 sm:$0xff]   ;;  %v7472_v36 = vld [vmem:[#allocation9 + $0x280] ss:$16 sps:$4 sm:$0xff]  }
 0x2f1   :  { %v7477_v37 = vld [vmem:[#allocation9 + $0x64] ss:$16 sps:$4 sm:$0xff]   ;;  %v7478_v21 = vld [vmem:[#allocation9 + $0x260] ss:$16 sps:$4 sm:$0xff]  }
 0x2f2   :  { %4218 = vmatpush2.bf16.msra.mxu0 %v6933_v6  ;;  %v7480_v4 = vld [vmem:[#allocation9 + $0x264] ss:$16 sps:$4 sm:$0xff]   ;;  %v7475_v6 = vld [vmem:[#allocation9 + $0x60] ss:$16 sps:$4 sm:$0xff]  }
 0x2f3   :  { %4261 = vmatpush2.bf16.msra.mxu1 %v7061_v9  ;;  %4219 = vmatprep.subr.bf16.mxu0 %v6926_v10  ;;  %v7483_v7 = vld [vmem:[#allocation9 + $0x44] ss:$16 sps:$4 sm:$0xff]   ;;  %v7481_v10 = vld [vmem:[#allocation9 + $0x40] ss:$16 sps:$4 sm:$0xff]  }
 0x2f4   :  { %4262 = vmatprep.subr.bf16.mxu1 %v7054_v12  ;;  %v7486_v9 = vld [vmem:[#allocation9 + $0x244] ss:$16 sps:$4 sm:$0xff]   ;;  %v7484_v55 = vld [vmem:[#allocation9 + $0x240] ss:$16 sps:$4 sm:$0xff]  }
 0x2f5   :  { %v7489_v12 = vld [vmem:[#allocation9 + $0x24] ss:$16 sps:$4 sm:$0xff]   ;;  %v7487_v19 = vld [vmem:[#allocation9 + $0x20] ss:$16 sps:$4 sm:$0xff]  }
 0x2f6   :  { %4220 = vmatpush2.bf16.msra.mxu0 %v6925_v15  ;;  %v7492_v38 = vld [vmem:[#allocation9 + $0x224] ss:$16 sps:$4 sm:$0xff]   ;;  %v7490_v24 = vld [vmem:[#allocation9 + $0x220] ss:$16 sps:$4 sm:$0xff]  }
 0x2f7   :  { %4263 = vmatpush2.bf16.msra.mxu1 %v7053_v62  ;;  %4221 = vmatprep.subr.bf16.mxu0 %v6918_v16  ;;  %v7495_v13 = vld [vmem:[#allocation9 + $0x4] ss:$16 sps:$4 sm:$0xff]   ;;  %v7493_v14 = vld [vmem:[#allocation9] ss:$16 sps:$4 sm:$0xff]  }
 0x2f8   :  { %4264 = vmatprep.subr.bf16.mxu1 %v7046_v22  ;;  %v7498_v56 = vld [vmem:[#allocation9 + $0x204] ss:$16 sps:$4 sm:$0xff]   ;;  %v7496_v34 = vld [vmem:[#allocation9 + $0x200] ss:$16 sps:$4 sm:$0xff]  }
 0x2f9   :  { %v7501_v23 = vld [vmem:[#allocation9 + $0x1e4] ss:$16 sps:$4 sm:$0xff]   ;;  %v7499_v5 = vld [vmem:[#allocation9 + $0x1e0] ss:$16 sps:$4 sm:$0xff]  }
 0x2fa   :  { %4222 = vmatpush2.bf16.msra.mxu0 %v6917_v42  ;;  %v7504_v15 = vld [vmem:[#allocation9 + $0x3e4] ss:$16 sps:$4 sm:$0xff]   ;;  %v7502_v62 = vld [vmem:[#allocation9 + $0x3e0] ss:$16 sps:$4 sm:$0xff]  }
 0x2fb   :  { %4265 = vmatpush2.bf16.msra.mxu1 %v7045_v27  ;;  %5859 = vmatprep.subr.bf16.mxu0 %v7453_v52  ;;  %v7507_v16 = vld [vmem:[#allocation9 + $0x1c4] ss:$16 sps:$4 sm:$0xff]   ;;  %v7505_v22 = vld [vmem:[#allocation9 + $0x1c0] ss:$16 sps:$4 sm:$0xff]  }
 0x2fc   :  { %5902 = vmatprep.subr.bf16.mxu1 %v7456_v31  ;;  %v7510_v49 = vld [vmem:[#allocation9 + $0x3c4] ss:$16 sps:$4 sm:$0xff]   ;;  %v7508_v32 = vld [vmem:[#allocation9 + $0x3c0] ss:$16 sps:$4 sm:$0xff]  }
 0x2fd   :  { %4224 = vmatmul.mubr.bf16.vlgmr.msra.gmra.mxu0 %v8233_v51  ;;  %v7466_v51 = vld [vmem:[#allocation9 + $0x2a0] ss:$16 sps:$4 sm:$0xff]   ;;  %v7513_v41 = vld [vmem:[#allocation9 + $0x1a4] ss:$16 sps:$4 sm:$0xff]  }
 0x2fe   :  { %4267 = vmatmul.mubr.bf16.vlgmr.msra.gmra.mxu1 %v8235_v53  ;;  %5860 = vmatpush1.bf16.msra.mxu0 %v7451_v33  ;;  %v7474_v53 = vld [vmem:[#allocation9 + $0x284] ss:$16 sps:$4 sm:$0xff]   ;;  %v7511_v42 = vld [vmem:[#allocation9 + $0x1a0] ss:$16 sps:$4 sm:$0xff]  }
 0x2ff   :  { %5891 = vmatprep.mubr.bf16.mxu0 %v8331_v60  ;;  %5903 = vmatpush1.bf16.msra.mxu1 %v7454_v40  ;;  %v7516_v25 = vld [vmem:[#allocation9 + $0x3a4] ss:$16 sps:$4 sm:$0xff]   ;;  %v7514_v20 = vld [vmem:[#allocation9 + $0x3a0] ss:$16 sps:$4 sm:$0xff]  }
 0x300   :  { %5934 = vmatprep.mubr.bf16.mxu1 %v8334_v54  ;;  %5861 = vmatprep.subr.bf16.mxu0 %v7459_v43  ;;  %v7519_v27 = vld [vmem:[#allocation9 + $0x184] ss:$16 sps:$4 sm:$0xff]   ;;  %v7517_v28 = vld [vmem:[#allocation9 + $0x180] ss:$16 sps:$4 sm:$0xff]  }
 0x301   :  { %5904 = vmatprep.subr.bf16.mxu1 %v7462_v39  ;;  %v7522_v52 = vld [vmem:[#allocation9 + $0x384] ss:$16 sps:$4 sm:$0xff]   ;;  %v7520_v31 = vld [vmem:[#allocation9 + $0x380] ss:$16 sps:$4 sm:$0xff]   ;;  %v8339_v39 = vpop.f32.mrf.mxu0 }
 0x302   :  { %5862 = vmatpush1.bf16.msra.mxu0 %v7457_v29  ;;  %v7525_v26 = vld [vmem:[#allocation9 + $0x164] ss:$16 sps:$4 sm:$0xff]   ;;  %v7523_v33 = vld [vmem:[#allocation9 + $0x160] ss:$16 sps:$4 sm:$0xff]  }
 0x303   :  { %5905 = vmatpush1.bf16.msra.mxu1 %v7460_v57  ;;  %5863 = vmatprep.subr.bf16.mxu0 %v7465_v11  ;;  %v7528_v8 = vld [vmem:[#allocation9 + $0x364] ss:$16 sps:$4 sm:$0xff]   ;;  %v7526_v44 = vld [vmem:[#allocation9 + $0x360] ss:$16 sps:$4 sm:$0xff]   ;;  %v8341_v11 = vpop.f32.mrf.mxu1 }
 0x304   :  { %5906 = vmatprep.subr.bf16.mxu1 %v7468_v0  ;;  %v7531_v40 = vld [vmem:[#allocation9 + $0x144] ss:$16 sps:$4 sm:$0xff]   ;;  %v7529_v43 = vld [vmem:[#allocation9 + $0x140] ss:$16 sps:$4 sm:$0xff]  }
 0x305   :  { %v7534_v35 = vld [vmem:[#allocation9 + $0x344] ss:$16 sps:$4 sm:$0xff]   ;;  %v7532_v29 = vld [vmem:[#allocation9 + $0x340] ss:$16 sps:$4 sm:$0xff]  }
 0x306   :  { %5864 = vmatpush1.bf16.msra.mxu0 %v7463_v1  ;;  %v7537_v57 = vld [vmem:[#allocation9 + $0x124] ss:$16 sps:$4 sm:$0xff]   ;;  %v7535_v1 = vld [vmem:[#allocation9 + $0x120] ss:$16 sps:$4 sm:$0xff]  }
 0x307   :  { %5907 = vmatpush1.bf16.msra.mxu1 %v7466_v51  ;;  %5865 = vmatprep.subr.bf16.mxu0 %v7471_v2  ;;  %v7540_v0 = vld [vmem:[#allocation9 + $0x324] ss:$16 sps:$4 sm:$0xff]   ;;  %v3969_v51 = vpop.f32.mrf.mxu0  ;;  %v7538_v2 = vld [vmem:[#allocation9 + $0x320] ss:$16 sps:$4 sm:$0xff]  }
 0x308   :  { %5908 = vmatprep.subr.bf16.mxu1 %v7474_v53  ;;  %v7543_v53 = vld [vmem:[#allocation9 + $0x104] ss:$16 sps:$4 sm:$0xff]  }
 0x30a   :  { %5866 = vmatpush1.bf16.msra.mxu0 %v7469_v3  ;;  %v4012_v3 = vpop.f32.mrf.mxu1 }
 0x30b   :  { %5909 = vmatpush1.bf16.msra.mxu1 %v7472_v36  ;;  %5867 = vmatprep.subr.bf16.mxu0 %v7477_v37  ;;  %v7546_v36 = vld [vmem:[#allocation9 + $0x304] ss:$16 sps:$4 sm:$0xff]   ;;  %v1012_v37 = vrot.slane %v8311_v18, %v177_v59  ;;  %v7607_v59 = vld [vmem:[#allocation9 + $0x6e0] ss:$16 sps:$4 sm:$0xff]  }
 0x30c   :  { %5910 = vmatprep.subr.bf16.mxu1 %v7480_v4  ;;  %v7541_v4 = vld [vmem:[#allocation9 + $0x100] ss:$16 sps:$4 sm:$0xff]  }
 0x30e   :  { %5868 = vmatpush1.bf16.msra.mxu0 %v7475_v6  ;;  %v8346_v6 = vpop.f32.mrf.mxu0 }
 0x30f   :  { %5911 = vmatpush1.bf16.msra.mxu1 %v7478_v21  ;;  %5869 = vmatprep.subr.bf16.mxu0 %v7483_v7  ;;  %v7544_v21 = vld [vmem:[#allocation9 + $0x300] ss:$16 sps:$4 sm:$0xff]   ;;  %v7549_v7 = vld [vmem:[#allocation9 + $0x4e4] ss:$16 sps:$4 sm:$0xff]  }
 0x310   :  { %5912 = vmatprep.subr.bf16.mxu1 %v7486_v9  ;;  %v8348_v9 = vpop.f32.mrf.mxu1 }
 0x312   :  { %5870 = vmatpush1.bf16.msra.mxu0 %v7481_v10  ;;  %v7609_v10 = vld [vmem:[#allocation9 + $0x6e4] ss:$16 sps:$4 sm:$0xff]  }
 0x313   :  { %5913 = vmatpush1.bf16.msra.mxu1 %v7484_v55  ;;  %5871 = vmatprep.subr.bf16.mxu0 %v7489_v12  ;;  %v3970_v55 = vadd.f32 %v3969_v51, %v1012_v37  ;;  %v7547_v12 = vld [vmem:[#allocation9 + $0x4e0] ss:$16 sps:$4 sm:$0xff]  }
 0x314   :  { %5914 = vmatprep.subr.bf16.mxu1 %v7492_v38  ;;  %v3973_v38 = vpop.f32.mrf.mxu0  ;;  %v7559_v51 = vld [vmem:[#allocation9 + $0x460] ss:$16 sps:$4 sm:$0xff]  }
 0x316   :  { %5872 = vmatpush1.bf16.msra.mxu0 %v7487_v19  ;;  %v7552_v19 = vld [vmem:[#allocation9 + $0x4c4] ss:$16 sps:$4 sm:$0xff]  }
 0x317   :  { %5915 = vmatpush1.bf16.msra.mxu1 %v7490_v24  ;;  %5873 = vmatprep.subr.bf16.mxu0 %v7495_v13  ;;  %v4016_v24 = vpop.f32.mrf.mxu1  ;;  %v7615_v13 = vld [vmem:[#allocation9 + $0x6c4] ss:$16 sps:$4 sm:$0xff]  }
 0x318   :  { %5916 = vmatprep.subr.bf16.mxu1 %v7498_v56 }
 0x31a   :  { %5874 = vmatpush1.bf16.msra.mxu0 %v7493_v14  ;;  %v4013_v14 = vadd.f32 %v4012_v3, %v3970_v55  ;;  %v7639_v3 = vld [vmem:[#allocation9 + $0x644] ss:$16 sps:$4 sm:$0xff]   ;;  %v7643_v55 = vld [vmem:[#allocation9 + $0x620] ss:$16 sps:$4 sm:$0xff]  }
 0x31b   :  { %5917 = vmatpush1.bf16.msra.mxu1 %v7496_v34  ;;  %5875 = vmatprep.subr.bf16.mxu0 %v7501_v23  ;;  %v3974_v34 = vadd.f32 %v3973_v38, %v1012_v37  ;;  %v7567_v37 = vld [vmem:[#allocation9 + $0x424] ss:$16 sps:$4 sm:$0xff]   ;;  %v7568_v38 = vld [vmem:[#allocation9 + $0x400] ss:$16 sps:$4 sm:$0xff]  }
 0x31c   :  { %5918 = vmatprep.subr.bf16.mxu1 %v7504_v15  ;;  %v7550_v15 = vld [vmem:[#allocation9 + $0x4c0] ss:$16 sps:$4 sm:$0xff]  }
 0x31e   :  { %5876 = vmatpush2.bf16.msra.mxu0 %v7499_v5 }
 0x31f   :  { %5919 = vmatpush2.bf16.msra.mxu1 %v7502_v62  ;;  %5877 = vmatprep.subr.bf16.mxu0 %v7507_v16  ;;  %v7555_v62 = vld [vmem:[#allocation9 + $0x4a4] ss:$16 sps:$4 sm:$0xff]   ;;  %v7613_v16 = vld [vmem:[#allocation9 + $0x6c0] ss:$16 sps:$4 sm:$0xff]  }
 0x320   :  { %5920 = vmatprep.subr.bf16.mxu1 %v7510_v49 }
 0x322   :  { %5878 = vmatpush2.bf16.msra.mxu0 %v7505_v22 }
 0x323   :  { %5921 = vmatpush2.bf16.msra.mxu1 %v7508_v32  ;;  %5879 = vmatprep.subr.bf16.mxu0 %v7513_v41  ;;  %v7621_v32 = vld [vmem:[#allocation9 + $0x6a4] ss:$16 sps:$4 sm:$0xff]  }
 0x324   :  { %5922 = vmatprep.subr.bf16.mxu1 %v7516_v25  ;;  %v4017_v25 = vadd.f32 %v4016_v24, %v3974_v34  ;;  %v7657_v24 = vld [vmem:[#allocation9 + $0x7e4] ss:$16 sps:$4 sm:$0xff]   ;;  %v7655_v34 = vld [vmem:[#allocation9 + $0x7e0] ss:$16 sps:$4 sm:$0xff]  }
 0x326   :  { %5880 = vmatpush2.bf16.msra.mxu0 %v7511_v42 }
 0x327   :  { %5923 = vmatpush2.bf16.msra.mxu1 %v7514_v20  ;;  %5881 = vmatprep.subr.bf16.mxu0 %v7519_v27  ;;  %v7553_v20 = vld [vmem:[#allocation9 + $0x4a0] ss:$16 sps:$4 sm:$0xff]  }
 0x328   :  { %5924 = vmatprep.subr.bf16.mxu1 %v7522_v52  ;;  %v7558_v52 = vld [vmem:[#allocation9 + $0x484] ss:$16 sps:$4 sm:$0xff]  }
 0x32a   :  { %5882 = vmatpush2.bf16.msra.mxu0 %v7517_v28  ;;  %v7619_v28 = vld [vmem:[#allocation9 + $0x6a0] ss:$16 sps:$4 sm:$0xff]  }
 0x32b   :  { %5925 = vmatpush2.bf16.msra.mxu1 %v7520_v31  ;;  %5883 = vmatprep.subr.bf16.mxu0 %v7525_v26 }
 0x32c   :  { %5926 = vmatprep.subr.bf16.mxu1 %v7528_v8  ;;  %v7627_v8 = vld [vmem:[#allocation9 + $0x684] ss:$16 sps:$4 sm:$0xff]  }
 0x32e   :  { %5884 = vmatpush2.bf16.msra.mxu0 %v7523_v33 }
 0x32f   :  { %5927 = vmatpush2.bf16.msra.mxu1 %v7526_v44  ;;  %5885 = vmatprep.subr.bf16.mxu0 %v7531_v40  ;;  %v7556_v40 = vld [vmem:[#allocation9 + $0x480] ss:$16 sps:$4 sm:$0xff]  }
 0x330   :  { %5928 = vmatprep.subr.bf16.mxu1 %v7534_v35  ;;  %v7561_v35 = vld [vmem:[#allocation9 + $0x464] ss:$16 sps:$4 sm:$0xff]  }
 0x332   :  { %5886 = vmatpush2.bf16.msra.mxu0 %v7529_v43  ;;  %v7625_v43 = vld [vmem:[#allocation9 + $0x680] ss:$16 sps:$4 sm:$0xff]  }
 0x333   :  { %5929 = vmatpush2.bf16.msra.mxu1 %v7532_v29  ;;  %5887 = vmatprep.subr.bf16.mxu0 %v7537_v57 }
 0x334   :  { %5930 = vmatprep.subr.bf16.mxu1 %v7540_v0  ;;  %v7633_v0 = vld [vmem:[#allocation9 + $0x664] ss:$16 sps:$4 sm:$0xff]  }
 0x336   :  { %5888 = vmatpush2.bf16.msra.mxu0 %v7535_v1 }
 0x337   :  { %5931 = vmatpush2.bf16.msra.mxu1 %v7538_v2  ;;  %5889 = vmatprep.subr.bf16.mxu0 %v7543_v53  ;;  %v7564_v2 = vld [vmem:[#allocation9 + $0x444] ss:$16 sps:$4 sm:$0xff]   ;;  %v7631_v53 = vld [vmem:[#allocation9 + $0x660] ss:$16 sps:$4 sm:$0xff]  }
 0x338   :  { %5932 = vmatprep.subr.bf16.mxu1 %v7546_v36  ;;  %v7562_v36 = vld [vmem:[#allocation9 + $0x440] ss:$16 sps:$4 sm:$0xff]  }
 0x33a   :  { %5890 = vmatpush2.bf16.msra.mxu0 %v7541_v4  ;;  %v7637_v4 = vld [vmem:[#allocation9 + $0x640] ss:$16 sps:$4 sm:$0xff]  }
 0x33b   :  { %5933 = vmatpush2.bf16.msra.mxu1 %v7544_v21  ;;  %5945 = vmatprep.subr.bf16.mxu0 %v7549_v7  ;;  %v7645_v21 = vld [vmem:[#allocation9 + $0x624] ss:$16 sps:$4 sm:$0xff]   ;;  %v7565_v7 = vld [vmem:[#allocation9 + $0x420] ss:$16 sps:$4 sm:$0xff]  }
 0x33c   :  { %5988 = vmatprep.subr.bf16.mxu1 %v7609_v10  ;;  %v7570_v10 = vld [vmem:[#allocation9 + $0x404] ss:$16 sps:$4 sm:$0xff]  }
 0x33d   :  { %v8350_v56 = vpop.f32.mrf.mxu0  ;;  %5892 = vmatmul.mubr.bf16.vlgmr.msra.gmra.mxu0 %v8275_v17 }
 0x33e   :  { %v8353_v23 = vpop.f32.mrf.mxu1  ;;  %5935 = vmatmul.mubr.bf16.vlgmr.msra.gmra.mxu1 %v8309_v30  ;;  %5946 = vmatpush1.bf16.msra.mxu0 %v7547_v12  ;;  %v7651_v12 = vld [vmem:[#allocation9 + $0x604] ss:$16 sps:$4 sm:$0xff]  }
 0x33f   :  { %v4055_v5 = vpop.f32.mrf.mxu0  ;;  %5947 = vmatprep.subr.bf16.mxu0 %v7552_v19  ;;  %5989 = vmatpush1.bf16.msra.mxu1 %v7607_v59  ;;  %v7573_v19 = vld [vmem:[#allocation9 + $0x5e4] ss:$16 sps:$4 sm:$0xff]   ;;  %v7649_v59 = vld [vmem:[#allocation9 + $0x600] ss:$16 sps:$4 sm:$0xff]  }
 0x340   :  { %v4056_v49 = vadd.f32 %v4055_v5, %v4013_v14  ;;  %v4098_v22 = vpop.f32.mrf.mxu1  ;;  %5990 = vmatprep.subr.bf16.mxu1 %v7615_v13  ;;  %v7571_v13 = vld [vmem:[#allocation9 + $0x5e0] ss:$16 sps:$4 sm:$0xff]   ;;  %v7576_v14 = vld [vmem:[#allocation9 + $0x5c4] ss:$16 sps:$4 sm:$0xff]  }
 0x341   :  { %v8356_v41 = vpop.f32.mrf.mxu0  ;;  %v7574_v5 = vld [vmem:[#allocation9 + $0x5c0] ss:$16 sps:$4 sm:$0xff]  }
 0x342   :  { %v8358_v42 = vpop.f32.mrf.mxu1  ;;  %5948 = vmatpush1.bf16.msra.mxu0 %v7550_v15  ;;  %v4099_v31 = vadd.f32 %v4098_v22, %v4056_v49  ;;  %v7663_v15 = vld [vmem:[#allocation9 + $0x7c4] ss:$16 sps:$4 sm:$0xff]   ;;  %v7577_v22 = vld [vmem:[#allocation9 + $0x5a0] ss:$16 sps:$4 sm:$0xff]  }
 0x343   :  { %v4059_v27 = vpop.f32.mrf.mxu0  ;;  %5949 = vmatprep.subr.bf16.mxu0 %v7555_v62  ;;  %5991 = vmatpush1.bf16.msra.mxu1 %v7613_v16  ;;  %v7579_v62 = vld [vmem:[#allocation9 + $0x5a4] ss:$16 sps:$4 sm:$0xff]   ;;  %v7661_v16 = vld [vmem:[#allocation9 + $0x7c0] ss:$16 sps:$4 sm:$0xff]  }
 0x344   :  { %v4060_v26 = vadd.f32 %v4059_v27, %v4017_v25  ;;  %5992 = vmatprep.subr.bf16.mxu1 %v7621_v32  ;;  %v4102_v33 = vpop.f32.mrf.mxu1  ;;  %v4282_v29 = vmax.f32 %v4099_v31, 0.0  ;;  %v7669_v49 = vld [vmem:[#allocation9 + $0x7a4] ss:$16 sps:$4 sm:$0xff]   ;;  %v7667_v25 = vld [vmem:[#allocation9 + $0x7a0] ss:$16 sps:$4 sm:$0xff]  }
 0x345   :  { %v7582_v32 = vld [vmem:[#allocation9 + $0x584] ss:$16 sps:$4 sm:$0xff]   ;;  %v7580_v27 = vld [vmem:[#allocation9 + $0x580] ss:$16 sps:$4 sm:$0xff]  }
 0x346   :  { %v4103_v44 = vadd.f32 %v4102_v33, %v4060_v26  ;;  %5950 = vmatpush1.bf16.msra.mxu0 %v7553_v20  ;;  %v7675_v20 = vld [vmem:[#allocation9 + $0x784] ss:$16 sps:$4 sm:$0xff]   ;;  %v7673_v31 = vld [vmem:[#allocation9 + $0x780] ss:$16 sps:$4 sm:$0xff]  }
 0x347   :  { %5951 = vmatprep.subr.bf16.mxu0 %v7558_v52  ;;  %5993 = vmatpush1.bf16.msra.mxu1 %v7619_v28  ;;  %v1008_v52 = vrot.slane %v8311_v18, %v173_v58  ;;  %v7585_v28 = vld [vmem:[#allocation9 + $0x564] ss:$16 sps:$4 sm:$0xff]   ;;  %v7583_v33 = vld [vmem:[#allocation9 + $0x560] ss:$16 sps:$4 sm:$0xff]  }
 0x348   :  { %v4290_v57 = vmax.f32 %v4103_v44, 0.0  ;;  %5994 = vmatprep.subr.bf16.mxu1 %v7627_v8  ;;  %v7681_v26 = vld [vmem:[#allocation9 + $0x764] ss:$16 sps:$4 sm:$0xff]  }
 0x349   :  { %v3972_v8 = vadd.f32 %v8346_v6, %v1008_v52  ;;  %v3968_v44 = vadd.f32 %v8339_v39, %v1008_v52  ;;  %v7591_v6 = vld [vmem:[#allocation9 + $0x524] ss:$16 sps:$4 sm:$0xff]   ;;  %v7654_v52 = vld [vmem:[#allocation9 + $0x18c] ss:$16 sps:$4 sm:$0xff]  }
 0x34a   :  { %v8360_v1 = vpack.c.bf16 %v4290_v57, %v4282_v29  ;;  %5952 = vmatpush1.bf16.msra.mxu0 %v7556_v40  ;;  %v7588_v40 = vld [vmem:[#allocation9 + $0x544] ss:$16 sps:$4 sm:$0xff]   ;;  %v7586_v29 = vld [vmem:[#allocation9 + $0x540] ss:$16 sps:$4 sm:$0xff]  }
 0x34b   :  { %5953 = vmatprep.subr.bf16.mxu0 %v7561_v35  ;;  %5995 = vmatpush1.bf16.msra.mxu1 %v7625_v43  ;;  %v7679_v35 = vld [vmem:[#allocation9 + $0x760] ss:$16 sps:$4 sm:$0xff]   ;;  %v7687_v43 = vld [vmem:[#allocation9 + $0x744] ss:$16 sps:$4 sm:$0xff]   ;;  %v4015_v58 = vadd.f32 %v8348_v9, %v3972_v8  ;;  %v4011_v57 = vadd.f32 %v8341_v11, %v3968_v44  ;;  %v7666_v8 = vld [vmem:[#allocation9 + $0x14c] ss:$16 sps:$4 sm:$0xff]  }
 0x34c   :  { %5977 = vmatprep.mubr.bf16.mxu0 %v8360_v1  ;;  %5996 = vmatprep.subr.bf16.mxu1 %v7633_v0  ;;  %v7693_v39 = vld [vmem:[#allocation9 + $0x724] ss:$16 sps:$4 sm:$0xff]  }
 0x34d   :  { %v4058_v0 = vadd.f32 %v8356_v41, %v4015_v58  ;;  %v7594_v9 = vld [vmem:[#allocation9 + $0x504] ss:$16 sps:$4 sm:$0xff]  }
 0x34e   :  { %5954 = vmatpush1.bf16.msra.mxu0 %v7559_v51  ;;  %v7685_v51 = vld [vmem:[#allocation9 + $0x740] ss:$16 sps:$4 sm:$0xff]   ;;  %v7699_v11 = vld [vmem:[#allocation9 + $0x704] ss:$16 sps:$4 sm:$0xff]  }
 0x34f   :  { %5955 = vmatprep.subr.bf16.mxu0 %v7564_v2  ;;  %5997 = vmatpush1.bf16.msra.mxu1 %v7631_v53  ;;  %v4054_v2 = vadd.f32 %v8350_v56, %v4011_v57  ;;  %v7589_v53 = vld [vmem:[#allocation9 + $0x520] ss:$16 sps:$4 sm:$0xff]   ;;  %v7705_v56 = vld [vmem:[#allocation9 + $0x2ec] ss:$16 sps:$4 sm:$0xff]  }
 0x350   :  { %5998 = vmatprep.subr.bf16.mxu1 %v7639_v3  ;;  %v4101_v3 = vadd.f32 %v8358_v42, %v4058_v0  ;;  %v7595_v42 = vld [vmem:[#allocation9 + $0xe8] ss:$16 sps:$4 sm:$0xff]   ;;  %v1020_v0 = vrot.slane %v8311_v18, %v185_v61 }
 0x351   :  { %v4097_v41 = vadd.f32 %v8353_v23, %v4054_v2  ;;  %v7598_v23 = vld [vmem:[#allocation9 + $0xc8] ss:$16 sps:$4 sm:$0xff]   ;;  %v7684_v2 = vld [vmem:[#allocation9 + $0x4ec] ss:$16 sps:$4 sm:$0xff]  }
 0x352   :  { %5956 = vmatpush1.bf16.msra.mxu0 %v7562_v36  ;;  %v7691_v36 = vld [vmem:[#allocation9 + $0x720] ss:$16 sps:$4 sm:$0xff]  }
 0x353   :  { %5957 = vmatprep.subr.bf16.mxu0 %v7567_v37  ;;  %5999 = vmatpush1.bf16.msra.mxu1 %v7637_v4  ;;  %v7592_v37 = vld [vmem:[#allocation9 + $0x500] ss:$16 sps:$4 sm:$0xff]   ;;  %v4289_v4 = vmax.f32 %v4101_v3, 0.0 }
 0x354   :  { %6000 = vmatprep.subr.bf16.mxu1 %v7645_v21  ;;  %v7597_v21 = vld [vmem:[#allocation9 + $0xec] ss:$16 sps:$4 sm:$0xff]  }
 0x356   :  { %5958 = vmatpush1.bf16.msra.mxu0 %v7565_v7  ;;  %v7697_v7 = vld [vmem:[#allocation9 + $0x700] ss:$16 sps:$4 sm:$0xff]  }
 0x357   :  { %5959 = vmatprep.subr.bf16.mxu0 %v7570_v10  ;;  %6001 = vmatpush1.bf16.msra.mxu1 %v7643_v55  ;;  %v4281_v10 = vmax.f32 %v4097_v41, 0.0  ;;  %v7690_v41 = vld [vmem:[#allocation9 + $0x4cc] ss:$16 sps:$4 sm:$0xff]  }
 0x358   :  { %6002 = vmatprep.subr.bf16.mxu1 %v7651_v12  ;;  %v7600_v12 = vld [vmem:[#allocation9 + $0xcc] ss:$16 sps:$4 sm:$0xff]  }
 0x359   :  { %v8374_v55 = vpack.c.bf16 %v4289_v4, %v4281_v10  ;;  %v7696_v10 = vld [vmem:[#allocation9 + $0x4ac] ss:$16 sps:$4 sm:$0xff]  }
 0x35a   :  { %5960 = vmatpush1.bf16.msra.mxu0 %v7568_v38  ;;  %v7603_v38 = vld [vmem:[#allocation9 + $0xac] ss:$16 sps:$4 sm:$0xff]  }
 0x35b   :  { %5961 = vmatprep.subr.bf16.mxu0 %v7573_v19  ;;  %6003 = vmatpush1.bf16.msra.mxu1 %v7649_v59  ;;  %v7601_v19 = vld [vmem:[#allocation9 + $0xa8] ss:$16 sps:$4 sm:$0xff]   ;;  %v7606_v59 = vld [vmem:[#allocation9 + $0x8c] ss:$16 sps:$4 sm:$0xff]  }
 0x35c   :  { %6004 = vmatprep.subr.bf16.mxu1 %v7657_v24  ;;  %v7604_v24 = vld [vmem:[#allocation9 + $0x88] ss:$16 sps:$4 sm:$0xff]  }
 0x35e   :  { %5962 = vmatpush2.bf16.msra.mxu0 %v7571_v13  ;;  %v7612_v13 = vld [vmem:[#allocation9 + $0x6c] ss:$16 sps:$4 sm:$0xff]  }
 0x35f   :  { %5963 = vmatprep.subr.bf16.mxu0 %v7576_v14  ;;  %6005 = vmatpush2.bf16.msra.mxu1 %v7655_v34  ;;  %v7610_v14 = vld [vmem:[#allocation9 + $0x68] ss:$16 sps:$4 sm:$0xff]   ;;  %v7618_v34 = vld [vmem:[#allocation9 + $0x4c] ss:$16 sps:$4 sm:$0xff]  }
 0x360   :  { %6006 = vmatprep.subr.bf16.mxu1 %v7663_v15  ;;  %v7616_v15 = vld [vmem:[#allocation9 + $0x48] ss:$16 sps:$4 sm:$0xff]  }
 0x362   :  { %5964 = vmatpush2.bf16.msra.mxu0 %v7574_v5  ;;  %v7624_v5 = vld [vmem:[#allocation9 + $0x2c] ss:$16 sps:$4 sm:$0xff]  }
 0x363   :  { %5965 = vmatprep.subr.bf16.mxu0 %v7579_v62  ;;  %6007 = vmatpush2.bf16.msra.mxu1 %v7661_v16  ;;  %v7630_v62 = vld [vmem:[#allocation9 + $0xc] ss:$16 sps:$4 sm:$0xff]   ;;  %v7628_v16 = vld [vmem:[#allocation9 + $0x8] ss:$16 sps:$4 sm:$0xff]  }
 0x364   :  { %6008 = vmatprep.subr.bf16.mxu1 %v7669_v49  ;;  %v7636_v49 = vld [vmem:[#allocation9 + $0x1ec] ss:$16 sps:$4 sm:$0xff]  }
 0x366   :  { %5966 = vmatpush2.bf16.msra.mxu0 %v7577_v22  ;;  %v7634_v22 = vld [vmem:[#allocation9 + $0x1e8] ss:$16 sps:$4 sm:$0xff]  }
 0x367   :  { %5967 = vmatprep.subr.bf16.mxu0 %v7582_v32  ;;  %6009 = vmatpush2.bf16.msra.mxu1 %v7667_v25  ;;  %v7642_v32 = vld [vmem:[#allocation9 + $0x1cc] ss:$16 sps:$4 sm:$0xff]   ;;  %v7640_v25 = vld [vmem:[#allocation9 + $0x1c8] ss:$16 sps:$4 sm:$0xff]  }
 0x368   :  { %6010 = vmatprep.subr.bf16.mxu1 %v7675_v20  ;;  %v7648_v20 = vld [vmem:[#allocation9 + $0x1ac] ss:$16 sps:$4 sm:$0xff]  }
 0x36a   :  { %5968 = vmatpush2.bf16.msra.mxu0 %v7580_v27  ;;  %v7646_v27 = vld [vmem:[#allocation9 + $0x1a8] ss:$16 sps:$4 sm:$0xff]  }
 0x36b   :  { %5969 = vmatprep.subr.bf16.mxu0 %v7585_v28  ;;  %6011 = vmatpush2.bf16.msra.mxu1 %v7673_v31  ;;  %v7652_v28 = vld [vmem:[#allocation9 + $0x188] ss:$16 sps:$4 sm:$0xff]   ;;  %v7660_v31 = vld [vmem:[#allocation9 + $0x16c] ss:$16 sps:$4 sm:$0xff]  }
 0x36c   :  { %6012 = vmatprep.subr.bf16.mxu1 %v7681_v26  ;;  %v7658_v26 = vld [vmem:[#allocation9 + $0x168] ss:$16 sps:$4 sm:$0xff]  }
 0x36e   :  { %5970 = vmatpush2.bf16.msra.mxu0 %v7583_v33  ;;  %v7664_v33 = vld [vmem:[#allocation9 + $0x148] ss:$16 sps:$4 sm:$0xff]  }
 0x36f   :  { %5971 = vmatprep.subr.bf16.mxu0 %v7588_v40  ;;  %6013 = vmatpush2.bf16.msra.mxu1 %v7679_v35  ;;  %v7672_v40 = vld [vmem:[#allocation9 + $0x12c] ss:$16 sps:$4 sm:$0xff]  }
 0x370   :  { %6014 = vmatprep.subr.bf16.mxu1 %v7687_v43  ;;  %v7670_v43 = vld [vmem:[#allocation9 + $0x128] ss:$16 sps:$4 sm:$0xff]  }
 0x372   :  { %5972 = vmatpush2.bf16.msra.mxu0 %v7586_v29  ;;  %v7678_v29 = vld [vmem:[#allocation9 + $0x10c] ss:$16 sps:$4 sm:$0xff]  }
 0x373   :  { %5973 = vmatprep.subr.bf16.mxu0 %v7591_v6  ;;  %6015 = vmatpush2.bf16.msra.mxu1 %v7685_v51  ;;  %v7676_v6 = vld [vmem:[#allocation9 + $0x108] ss:$16 sps:$4 sm:$0xff]   ;;  %v1016_v51 = vrot.slane %v8311_v18, %v181_v63 }
 0x374   :  { %6016 = vmatprep.subr.bf16.mxu1 %v7693_v39  ;;  %v7688_v63 = vld [vmem:[#allocation9 + $0x4c8] ss:$16 sps:$4 sm:$0xff]  }
 0x376   :  { %5974 = vmatpush2.bf16.msra.mxu0 %v7589_v53 }
 0x377   :  { %5975 = vmatprep.subr.bf16.mxu0 %v7594_v9  ;;  %6017 = vmatpush2.bf16.msra.mxu1 %v7691_v36  ;;  %v7682_v9 = vld [vmem:[#allocation9 + $0x4e8] ss:$16 sps:$4 sm:$0xff]  }
 0x378   :  { %6018 = vmatprep.subr.bf16.mxu1 %v7699_v11 }
 0x37a   :  { %5976 = vmatpush2.bf16.msra.mxu0 %v7592_v37 }
 0x37b   :  { %6031 = vmatprep.subr.bf16.mxu0 %v7597_v21  ;;  %6019 = vmatpush2.bf16.msra.mxu1 %v7697_v7 }
 0x37c   :  { %6074 = vmatprep.subr.bf16.mxu1 %v7705_v56 }
 0x37d   :  { %5978 = vmatmul.mubr.bf16.vlgmr.msra.gmra.mxu0 %v8374_v55  ;;  %v4139_v44 = vpop.f32.mrf.mxu0 }
 0x37e   :  { %6032 = vmatpush1.bf16.msra.mxu0 %v7595_v42  ;;  %6063 = vmatprep.mubr.bf16.mxu0 %v8331_v60  ;;  %v7622_v60 = vld [vmem:[#allocation9 + $0x28] ss:$16 sps:$4 sm:$0xff]   ;;  %v4182_v35 = vpop.f32.mrf.mxu1  ;;  %v4140_v36 = vadd.f32 %v4139_v44, %v1016_v51 }
 0x37f   :  { %6033 = vmatprep.subr.bf16.mxu0 %v7600_v12  ;;  %v4141_v58 = vpop.f32.mrf.mxu0  ;;  %v7709_v44 = vld [vmem:[#allocation9 + $0x2c8] ss:$16 sps:$4 sm:$0xff]  }
 0x380   :  { %v4184_v57 = vpop.f32.mrf.mxu1  ;;  %v4142_v3 = vadd.f32 %v4141_v58, %v1020_v0  ;;  %v4183_v18 = vadd.f32 %v4182_v35, %v4140_v36  ;;  %v7717_v35 = vld [vmem:[#allocation9 + $0x2ac] ss:$16 sps:$4 sm:$0xff]   ;;  %v7715_v58 = vld [vmem:[#allocation9 + $0x2a8] ss:$16 sps:$4 sm:$0xff]  }
 0x381   :  { %v4143_v39 = vpop.f32.mrf.mxu0  ;;  %v7733_v36 = vld [vmem:[#allocation9 + $0x248] ss:$16 sps:$4 sm:$0xff]  }
 0x382   :  { %6034 = vmatpush1.bf16.msra.mxu0 %v7598_v23  ;;  %v4186_v53 = vpop.f32.mrf.mxu1  ;;  %v4144_v37 = vadd.f32 %v4143_v39, %v1016_v51  ;;  %v4185_v21 = vadd.f32 %v4184_v57, %v4142_v3  ;;  %v7723_v57 = vld [vmem:[#allocation9 + $0x28c] ss:$16 sps:$4 sm:$0xff]  }
 0x383   :  { %6035 = vmatprep.subr.bf16.mxu0 %v7603_v38  ;;  %v4145_v11 = vpop.f32.mrf.mxu0  ;;  %v7729_v51 = vld [vmem:[#allocation9 + $0x26c] ss:$16 sps:$4 sm:$0xff]  }
 0x384   :  { %v4188_v4 = vpop.f32.mrf.mxu1  ;;  %v4146_v45 = vadd.f32 %v4145_v11, %v1020_v0  ;;  %v4187_v42 = vadd.f32 %v4186_v53, %v4144_v37  ;;  %v7726_v0 = vld [vmem:[#allocation9 + $0x40c] ss:$16 sps:$4 sm:$0xff]   ;;  %v7730_v53 = vld [vmem:[#allocation9 + $0x5e8] ss:$16 sps:$4 sm:$0xff]  }
 0x385   :  { %v7732_v39 = vld [vmem:[#allocation9 + $0x5ec] ss:$16 sps:$4 sm:$0xff]   ;;  %v7736_v11 = vld [vmem:[#allocation9 + $0x5c8] ss:$16 sps:$4 sm:$0xff]  }
 0x386   :  { %6036 = vmatpush1.bf16.msra.mxu0 %v7601_v19  ;;  %v7735_v3 = vld [vmem:[#allocation9 + $0x24c] ss:$16 sps:$4 sm:$0xff]  }
 0x387   :  { %6037 = vmatprep.subr.bf16.mxu0 %v7606_v59  ;;  %v4189_v59 = vadd.f32 %v4188_v4, %v4146_v45  ;;  %v7744_v37 = vld [vmem:[#allocation9 + $0x5ac] ss:$16 sps:$4 sm:$0xff]   ;;  %v7739_v4 = vld [vmem:[#allocation9 + $0x228] ss:$16 sps:$4 sm:$0xff]  }
 0x388   :  { %v7750_v45 = vld [vmem:[#allocation9 + $0x58c] ss:$16 sps:$4 sm:$0xff]  }
 0x38a   :  { %6038 = vmatpush1.bf16.msra.mxu0 %v7604_v24 }
 0x38b   :  { %6039 = vmatprep.subr.bf16.mxu0 %v7612_v13 }
 0x38e   :  { %6040 = vmatpush1.bf16.msra.mxu0 %v7610_v14 }
 0x38f   :  { %6041 = vmatprep.subr.bf16.mxu0 %v7618_v34  ;;  %v7702_v34 = vld [vmem:[#allocation9 + $0x48c] ss:$16 sps:$4 sm:$0xff]  }
 0x392   :  { %6042 = vmatpush1.bf16.msra.mxu0 %v7616_v15 }
 0x393   :  { %6043 = vmatprep.subr.bf16.mxu0 %v7624_v5 }
 0x396   :  { %6044 = vmatpush1.bf16.msra.mxu0 %v7622_v60 }
 0x397   :  { %6045 = vmatprep.subr.bf16.mxu0 %v7630_v62 }
 0x39a   :  { %6046 = vmatpush1.bf16.msra.mxu0 %v7628_v16 }
 0x39b   :  { %6047 = vmatprep.subr.bf16.mxu0 %v7636_v49  ;;  %v7700_v49 = vld [vmem:[#allocation9 + $0x488] ss:$16 sps:$4 sm:$0xff]  }
 0x39e   :  { %6048 = vmatpush2.bf16.msra.mxu0 %v7634_v22 }
 0x39f   :  { %6049 = vmatprep.subr.bf16.mxu0 %v7642_v32  ;;  %v7708_v32 = vld [vmem:[#allocation9 + $0x46c] ss:$16 sps:$4 sm:$0xff]  }
 0x3a2   :  { %6050 = vmatpush2.bf16.msra.mxu0 %v7640_v25 }
 0x3a3   :  { %6051 = vmatprep.subr.bf16.mxu0 %v7648_v20 }
 0x3a6   :  { %6052 = vmatpush2.bf16.msra.mxu0 %v7646_v27 }
 0x3a7   :  { %6053 = vmatprep.subr.bf16.mxu0 %v7654_v52 }
 0x3aa   :  { %6054 = vmatpush2.bf16.msra.mxu0 %v7652_v28  ;;  %v7703_v28 = vld [vmem:[#allocation9 + $0x2e8] ss:$16 sps:$4 sm:$0xff]  }
 0x3ab   :  { %6055 = vmatprep.subr.bf16.mxu0 %v7660_v31 }
 0x3ae   :  { %6056 = vmatpush2.bf16.msra.mxu0 %v7658_v26  ;;  %v7706_v26 = vld [vmem:[#allocation9 + $0x468] ss:$16 sps:$4 sm:$0xff]  }
 0x3af   :  { %6057 = vmatprep.subr.bf16.mxu0 %v7666_v8  ;;  %v7711_v8 = vld [vmem:[#allocation9 + $0x2cc] ss:$16 sps:$4 sm:$0xff]  }
 0x3b2   :  { %6058 = vmatpush2.bf16.msra.mxu0 %v7664_v33  ;;  %v7714_v33 = vld [vmem:[#allocation9 + $0x44c] ss:$16 sps:$4 sm:$0xff]  }
 0x3b3   :  { %6059 = vmatprep.subr.bf16.mxu0 %v7672_v40  ;;  %v7712_v40 = vld [vmem:[#allocation9 + $0x448] ss:$16 sps:$4 sm:$0xff]  }
 0x3b6   :  { %6060 = vmatpush2.bf16.msra.mxu0 %v7670_v43  ;;  %v7720_v43 = vld [vmem:[#allocation9 + $0x42c] ss:$16 sps:$4 sm:$0xff]  }
 0x3b7   :  { %6061 = vmatprep.subr.bf16.mxu0 %v7678_v29  ;;  %v7718_v29 = vld [vmem:[#allocation9 + $0x428] ss:$16 sps:$4 sm:$0xff]  }
 0x3ba   :  { %6062 = vmatpush2.bf16.msra.mxu0 %v7676_v6  ;;  %v7721_v6 = vld [vmem:[#allocation9 + $0x288] ss:$16 sps:$4 sm:$0xff]  }
 0x3bb   :  { %6117 = vmatprep.subr.bf16.mxu0 %v7684_v2  ;;  %v7727_v2 = vld [vmem:[#allocation9 + $0x268] ss:$16 sps:$4 sm:$0xff]  }
 0x3bd   :  { %v4225_v61 = vpop.f32.mrf.mxu0  ;;  %6064 = vmatmul.mubr.bf16.vlgmr.msra.gmra.mxu0 %v8275_v17  ;;  %v7694_v17 = vld [vmem:[#allocation9 + $0x4a8] ss:$16 sps:$4 sm:$0xff]  }
 0x3be   :  { %v4268_v7 = vpop.f32.mrf.mxu1  ;;  %6118 = vmatpush1.bf16.msra.mxu0 %v7682_v9  ;;  %6149 = vmatprep.mubr.bf16.mxu0 %v8360_v1  ;;  %v4226_v38 = vadd.f32 %v4225_v61, %v4183_v18  ;;  %v7738_v9 = vld [vmem:[#allocation9 + $0x5cc] ss:$16 sps:$4 sm:$0xff]   ;;  %v7742_v61 = vld [vmem:[#allocation9 + $0x5a8] ss:$16 sps:$4 sm:$0xff]  }
 0x3bf   :  { %v4227_v56 = vpop.f32.mrf.mxu0  ;;  %6119 = vmatprep.subr.bf16.mxu0 %v7690_v41  ;;  %v7741_v41 = vld [vmem:[#allocation9 + $0x22c] ss:$16 sps:$4 sm:$0xff]  }
 0x3c0   :  { %v4228_v12 = vadd.f32 %v4227_v56, %v4185_v21  ;;  %v4270_v23 = vpop.f32.mrf.mxu1  ;;  %v4269_v60 = vadd.f32 %v4268_v7, %v4226_v38  ;;  %v7747_v21 = vld [vmem:[#allocation9 + $0x20c] ss:$16 sps:$4 sm:$0xff]   ;;  %v7745_v7 = vld [vmem:[#allocation9 + $0x208] ss:$16 sps:$4 sm:$0xff]  }
 0x3c1   :  { %v4229_v19 = vpop.f32.mrf.mxu0  ;;  %v7753_v18 = vld [vmem:[#allocation9 + $0x3ec] ss:$16 sps:$4 sm:$0xff]   ;;  %v7757_v38 = vld [vmem:[#allocation9 + $0x3c8] ss:$16 sps:$4 sm:$0xff]  }
 0x3c2   :  { %v4230_v24 = vadd.f32 %v4229_v19, %v4187_v42  ;;  %v4272_v13 = vpop.f32.mrf.mxu1  ;;  %6120 = vmatpush1.bf16.msra.mxu0 %v7688_v63  ;;  %v4271_v15 = vadd.f32 %v4270_v23, %v4228_v12  ;;  %v4283_v27 = vmax.f32 %v4269_v60, 0.0  ;;  %v7748_v63 = vld [vmem:[#allocation9 + $0x588] ss:$16 sps:$4 sm:$0xff]   ;;  %v7756_v56 = vld [vmem:[#allocation9 + $0x56c] ss:$16 sps:$4 sm:$0xff]  }
 0x3c3   :  { %v4231_v14 = vpop.f32.mrf.mxu0  ;;  %6121 = vmatprep.subr.bf16.mxu0 %v7696_v10  ;;  %v7751_v10 = vld [vmem:[#allocation9 + $0x3e8] ss:$16 sps:$4 sm:$0xff]   ;;  %v7759_v12 = vld [vmem:[#allocation9 + $0x3cc] ss:$16 sps:$4 sm:$0xff]  }
 0x3c4   :  { %v4273_v1 = vadd.f32 %v4272_v13, %v4230_v24  ;;  %v4232_v5 = vadd.f32 %v4231_v14, %v4189_v59  ;;  %v4274_v62 = vpop.f32.mrf.mxu1  ;;  %v4284_v25 = vmax.f32 %v4271_v15, 0.0  ;;  %v7754_v42 = vld [vmem:[#allocation9 + $0x568] ss:$16 sps:$4 sm:$0xff]   ;;  %v7762_v23 = vld [vmem:[#allocation9 + $0x54c] ss:$16 sps:$4 sm:$0xff]  }
 0x3c5   :  { %v7760_v19 = vld [vmem:[#allocation9 + $0x548] ss:$16 sps:$4 sm:$0xff]   ;;  %v7765_v59 = vld [vmem:[#allocation9 + $0x3ac] ss:$16 sps:$4 sm:$0xff]  }
 0x3c6   :  { %v4275_v16 = vadd.f32 %v4274_v62, %v4232_v5  ;;  %6122 = vmatpush1.bf16.msra.mxu0 %v7694_v17  ;;  %v4291_v22 = vmax.f32 %v4273_v1, 0.0  ;;  %v7768_v24 = vld [vmem:[#allocation9 + $0x52c] ss:$16 sps:$4 sm:$0xff]   ;;  %v7763_v13 = vld [vmem:[#allocation9 + $0x3a8] ss:$16 sps:$4 sm:$0xff]  }
 0x3c7   :  { %6123 = vmatprep.subr.bf16.mxu0 %v7702_v34  ;;  %v7766_v17 = vld [vmem:[#allocation9 + $0x528] ss:$16 sps:$4 sm:$0xff]   ;;  %v7771_v14 = vld [vmem:[#allocation9 + $0x38c] ss:$16 sps:$4 sm:$0xff]  }
 0x3c8   :  { %v4292_v20 = vmax.f32 %v4275_v16, 0.0  ;;  %v8388_v31 = vpack.c.bf16 %v4291_v22, %v4283_v27  ;;  %v7774_v34 = vld [vmem:[#allocation9 + $0x50c] ss:$16 sps:$4 sm:$0xff]   ;;  %v7769_v15 = vld [vmem:[#allocation9 + $0x388] ss:$16 sps:$4 sm:$0xff]  }
 0x3c9   :  { %v7772_v1 = vld [vmem:[#allocation9 + $0x508] ss:$16 sps:$4 sm:$0xff]   ;;  %v7777_v5 = vld [vmem:[#allocation9 + $0x36c] ss:$16 sps:$4 sm:$0xff]  }
 0x3ca   :  { %v8386_v52 = vpack.c.bf16 %v4292_v20, %v4284_v25  ;;  %6124 = vmatpush1.bf16.msra.mxu0 %v7700_v49  ;;  %v7835_v60 = vld [vmem:[#allocation12 + $0x78] sm:$0xff]   ;;  %v7775_v62 = vld [vmem:[#allocation9 + $0x368] ss:$16 sps:$4 sm:$0xff]  }
 0x3cb   :  { %6125 = vmatprep.subr.bf16.mxu0 %v7708_v32  ;;  %v7780_v16 = vld [vmem:[#allocation9 + $0x34c] ss:$16 sps:$4 sm:$0xff]   ;;  %v7778_v22 = vld [vmem:[#allocation9 + $0x348] ss:$16 sps:$4 sm:$0xff]  }
 0x3cc   :  { %6020 = vmatprep.mubr.bf16.mxu1 %v8386_v52  ;;  %v7836_v49 = vld [vmem:[#allocation12 + $0x38] sm:$0xff]   ;;  %v7837_v25 = vld [vmem:[#allocation12 + $0x70] sm:$0xff]  }
 0x3cd   :  { %6021 = vmatmul.mubr.bf16.vlgmr.msra.gmra.mxu1 %v8388_v31  ;;  %v7783_v32 = vld [vmem:[#allocation9 + $0x32c] ss:$16 sps:$4 sm:$0xff]   ;;  %v7838_v20 = vld [vmem:[#allocation12 + $0x30] sm:$0xff]  }
 0x3ce   :  { %6075 = vmatpush1.bf16.msra.mxu1 %v7703_v28  ;;  %6106 = vmatprep.mubr.bf16.mxu1 %v8334_v54  ;;  %v7724_v54 = vld [vmem:[#allocation9 + $0x408] ss:$16 sps:$4 sm:$0xff]   ;;  %v7786_v28 = vld [vmem:[#allocation9 + $0x30c] ss:$16 sps:$4 sm:$0xff]  }
 0x3cf   :  { %6126 = vmatpush1.bf16.msra.mxu0 %v7706_v26  ;;  %6076 = vmatprep.subr.bf16.mxu1 %v7711_v8  ;;  %v7781_v27 = vld [vmem:[#allocation9 + $0x328] ss:$16 sps:$4 sm:$0xff]   ;;  %v7839_v26 = vld [vmem:[#allocation12 + $0x68] sm:$0xff]  }
 0x3d0   :  { %6127 = vmatprep.subr.bf16.mxu0 %v7714_v33  ;;  %v7840_v8 = vld [vmem:[#allocation12 + $0x28] sm:$0xff]   ;;  %v7841_v33 = vld [vmem:[#allocation12 + $0x60] sm:$0xff]  }
 0x3d2   :  { %6077 = vmatpush1.bf16.msra.mxu1 %v7709_v44  ;;  %v7784_v44 = vld [vmem:[#allocation9 + $0x308] ss:$16 sps:$4 sm:$0xff]  }
 0x3d3   :  { %6128 = vmatpush1.bf16.msra.mxu0 %v7712_v40  ;;  %6078 = vmatprep.subr.bf16.mxu1 %v7717_v35  ;;  %v7842_v40 = vld [vmem:[#allocation12 + $0x20] sm:$0xff]   ;;  %v7843_v35 = vld [vmem:[#allocation12 + $0x58] sm:$0xff]  }
 0x3d4   :  { %6129 = vmatprep.subr.bf16.mxu0 %v7720_v43  ;;  %v7787_v43 = vld [vmem:[#allocation9 + $0x6e8] ss:$16 sps:$4 sm:$0xff]  }
 0x3d6   :  { %6079 = vmatpush1.bf16.msra.mxu1 %v7715_v58  ;;  %v7792_v58 = vld [vmem:[#allocation9 + $0x6cc] ss:$16 sps:$4 sm:$0xff]  }
 0x3d7   :  { %6130 = vmatpush1.bf16.msra.mxu0 %v7718_v29  ;;  %6080 = vmatprep.subr.bf16.mxu1 %v7723_v57  ;;  %v7844_v29 = vld [vmem:[#allocation12 + $0x18] sm:$0xff]   ;;  %v7790_v57 = vld [vmem:[#allocation9 + $0x6c8] ss:$16 sps:$4 sm:$0xff]  }
 0x3d8   :  { %6131 = vmatprep.subr.bf16.mxu0 %v7726_v0  ;;  %v7795_v0 = vld [vmem:[#allocation9 + $0x6ac] ss:$16 sps:$4 sm:$0xff]  }
 0x3da   :  { %6081 = vmatpush1.bf16.msra.mxu1 %v7721_v6  ;;  %v7845_v6 = vld [vmem:[#allocation12 + $0x50] sm:$0xff]  }
 0x3db   :  { %6132 = vmatpush1.bf16.msra.mxu0 %v7724_v54  ;;  %6082 = vmatprep.subr.bf16.mxu1 %v7729_v51  ;;  %v7846_v54 = vld [vmem:[#allocation12 + $0x10] sm:$0xff]  }
 0x3dc   :  { %6133 = vmatprep.subr.bf16.mxu0 %v7732_v39  ;;  %v7793_v51 = vld [vmem:[#allocation9 + $0x6a8] ss:$16 sps:$4 sm:$0xff]   ;;  %v7798_v39 = vld [vmem:[#allocation9 + $0x68c] ss:$16 sps:$4 sm:$0xff]  }
 0x3de   :  { %6083 = vmatpush1.bf16.msra.mxu1 %v7727_v2  ;;  %v7847_v2 = vld [vmem:[#allocation12 + $0x48] sm:$0xff]  }
 0x3df   :  { %6134 = vmatpush2.bf16.msra.mxu0 %v7730_v53  ;;  %6084 = vmatprep.subr.bf16.mxu1 %v7735_v3  ;;  %v7848_v53 = vld [vmem:[#allocation12 + $0x8] sm:$0xff]  }
 0x3e0   :  { %6135 = vmatprep.subr.bf16.mxu0 %v7738_v9  ;;  %v7801_v3 = vld [vmem:[#allocation9 + $0x66c] ss:$16 sps:$4 sm:$0xff]   ;;  %v7850_v9 = vld [vmem:[#allocation12] sm:$0xff]  }
 0x3e2   :  { %6085 = vmatpush1.bf16.msra.mxu1 %v7733_v36  ;;  %v7799_v36 = vld [vmem:[#allocation9 + $0x668] ss:$16 sps:$4 sm:$0xff]  }
 0x3e3   :  { %6136 = vmatpush2.bf16.msra.mxu0 %v7736_v11  ;;  %6086 = vmatprep.subr.bf16.mxu1 %v7741_v41  ;;  %v7804_v11 = vld [vmem:[#allocation9 + $0x64c] ss:$16 sps:$4 sm:$0xff]   ;;  %v7802_v41 = vld [vmem:[#allocation9 + $0x648] ss:$16 sps:$4 sm:$0xff]  }
 0x3e4   :  { %6137 = vmatprep.subr.bf16.mxu0 %v7744_v37  ;;  %v7807_v37 = vld [vmem:[#allocation9 + $0x62c] ss:$16 sps:$4 sm:$0xff]  }
 0x3e6   :  { %6087 = vmatpush1.bf16.msra.mxu1 %v7739_v4  ;;  %v7805_v4 = vld [vmem:[#allocation9 + $0x628] ss:$16 sps:$4 sm:$0xff]  }
 0x3e7   :  { %6138 = vmatpush2.bf16.msra.mxu0 %v7742_v61  ;;  %6088 = vmatprep.subr.bf16.mxu1 %v7747_v21  ;;  %v7810_v61 = vld [vmem:[#allocation9 + $0x60c] ss:$16 sps:$4 sm:$0xff]   ;;  %v7808_v21 = vld [vmem:[#allocation9 + $0x608] ss:$16 sps:$4 sm:$0xff]  }
 0x3e8   :  { %6139 = vmatprep.subr.bf16.mxu0 %v7750_v45  ;;  %v7813_v45 = vld [vmem:[#allocation9 + $0x7ec] ss:$16 sps:$4 sm:$0xff]  }
 0x3ea   :  { %6089 = vmatpush1.bf16.msra.mxu1 %v7745_v7  ;;  %v7811_v7 = vld [vmem:[#allocation9 + $0x7e8] ss:$16 sps:$4 sm:$0xff]  }
 0x3eb   :  { %6140 = vmatpush2.bf16.msra.mxu0 %v7748_v63  ;;  %6090 = vmatprep.subr.bf16.mxu1 %v7753_v18  ;;  %v7816_v63 = vld [vmem:[#allocation9 + $0x7cc] ss:$16 sps:$4 sm:$0xff]   ;;  %v7814_v18 = vld [vmem:[#allocation9 + $0x7c8] ss:$16 sps:$4 sm:$0xff]  }
 0x3ec   :  { %6141 = vmatprep.subr.bf16.mxu0 %v7756_v56  ;;  %v7819_v56 = vld [vmem:[#allocation9 + $0x7ac] ss:$16 sps:$4 sm:$0xff]  }
 0x3ee   :  { %6091 = vmatpush2.bf16.msra.mxu1 %v7751_v10  ;;  %v7817_v10 = vld [vmem:[#allocation9 + $0x7a8] ss:$16 sps:$4 sm:$0xff]  }
 0x3ef   :  { %6142 = vmatpush2.bf16.msra.mxu0 %v7754_v42  ;;  %6092 = vmatprep.subr.bf16.mxu1 %v7759_v12  ;;  %v7822_v42 = vld [vmem:[#allocation9 + $0x78c] ss:$16 sps:$4 sm:$0xff]   ;;  %v7820_v12 = vld [vmem:[#allocation9 + $0x788] ss:$16 sps:$4 sm:$0xff]  }
 0x3f0   :  { %6143 = vmatprep.subr.bf16.mxu0 %v7762_v23  ;;  %v7825_v23 = vld [vmem:[#allocation9 + $0x76c] ss:$16 sps:$4 sm:$0xff]  }
 0x3f2   :  { %6093 = vmatpush2.bf16.msra.mxu1 %v7757_v38  ;;  %v7823_v38 = vld [vmem:[#allocation9 + $0x768] ss:$16 sps:$4 sm:$0xff]  }
 0x3f3   :  { %6144 = vmatpush2.bf16.msra.mxu0 %v7760_v19  ;;  %6094 = vmatprep.subr.bf16.mxu1 %v7765_v59  ;;  %v7828_v19 = vld [vmem:[#allocation9 + $0x74c] ss:$16 sps:$4 sm:$0xff]   ;;  %v7826_v59 = vld [vmem:[#allocation9 + $0x748] ss:$16 sps:$4 sm:$0xff]  }
 0x3f4   :  { %6145 = vmatprep.subr.bf16.mxu0 %v7768_v24  ;;  %v7831_v24 = vld [vmem:[#allocation9 + $0x72c] ss:$16 sps:$4 sm:$0xff]  }
 0x3f6   :  { %6095 = vmatpush2.bf16.msra.mxu1 %v7763_v13  ;;  %v7829_v13 = vld [vmem:[#allocation9 + $0x728] ss:$16 sps:$4 sm:$0xff]  }
 0x3f7   :  { %6146 = vmatpush2.bf16.msra.mxu0 %v7766_v17  ;;  %6096 = vmatprep.subr.bf16.mxu1 %v7771_v14  ;;  %v7834_v17 = vld [vmem:[#allocation9 + $0x70c] ss:$16 sps:$4 sm:$0xff]   ;;  %v7832_v14 = vld [vmem:[#allocation9 + $0x708] ss:$16 sps:$4 sm:$0xff]  }
 0x3f8   :  { %6147 = vmatprep.subr.bf16.mxu0 %v7774_v34  ;;  %v7851_v34 = vld [vmem:[#allocation12 + $0xf8] sm:$0xff]  }
 0x3fa   :  { %6097 = vmatpush2.bf16.msra.mxu1 %v7769_v15  ;;  %v7852_v15 = vld [vmem:[#allocation12 + $0xb8] sm:$0xff]  }
 0x3fb   :  { %6148 = vmatpush2.bf16.msra.mxu0 %v7772_v1  ;;  %6098 = vmatprep.subr.bf16.mxu1 %v7777_v5  ;;  %v7853_v1 = vld [vmem:[#allocation12 + $0xf0] sm:$0xff]  }
 0x3fc   :  { %7392 = vmatprep.subr.bf16.mxu0 %v7835_v60  ;;  %v7854_v5 = vld [vmem:[#allocation12 + $0xb0] sm:$0xff]   ;;  %v7855_v60 = vld [vmem:[#allocation12 + $0xe8] sm:$0xff]  }
 0x3fe   :  { %6099 = vmatpush2.bf16.msra.mxu1 %v7775_v62  ;;  %6150 = vmatmul.mubr.bf16.vlgmr.msra.gmra.mxu0 %v8374_v55  ;;  %v7789_v55 = vld [vmem:[#allocation9 + $0x6ec] ss:$16 sps:$4 sm:$0xff]  }
 0x3ff   :  { %6100 = vmatprep.subr.bf16.mxu1 %v7780_v16  ;;  %7393 = vmatpush3.bf16.msra.mxu0 %v7836_v49  ;;  %v7856_v62 = vld [vmem:[#allocation12 + $0xa8] sm:$0xff]   ;;  %v7857_v16 = vld [vmem:[#allocation12 + $0xe0] sm:$0xff]  }
 0x400   :  { %7394 = vmatprep.subr.bf16.mxu0 %v7837_v25  ;;  %v7858_v49 = vld [vmem:[#allocation12 + $0xa0] sm:$0xff]  }
 0x402   :  { %6101 = vmatpush2.bf16.msra.mxu1 %v7778_v22  ;;  %v7859_v22 = vld [vmem:[#allocation12 + $0xd8] sm:$0xff]  }
 0x403   :  { %6102 = vmatprep.subr.bf16.mxu1 %v7783_v32  ;;  %7395 = vmatpush3.bf16.msra.mxu0 %v7838_v20  ;;  %v7860_v32 = vld [vmem:[#allocation12 + $0x98] sm:$0xff]  }
 0x404   :  { %7396 = vmatprep.subr.bf16.mxu0 %v7839_v26 }
 0x406   :  { %6103 = vmatpush2.bf16.msra.mxu1 %v7781_v27  ;;  %v5936_v27 = vpop.f32.mrf.mxu1 }
 0x407   :  { %6104 = vmatprep.subr.bf16.mxu1 %v7786_v28  ;;  %7397 = vmatpush3.bf16.msra.mxu0 %v7840_v8 }
 0x408   :  { %7398 = vmatprep.subr.bf16.mxu0 %v7841_v33  ;;  %v5938_v26 = vpop.f32.mrf.mxu1  ;;  %v4557_v33 = vld [vmem:[#allocation10] sm:$0xf] }
 0x40a   :  { %6105 = vmatpush2.bf16.msra.mxu1 %v7784_v44  ;;  %v4566_v44 = vrot.slane %v4557_v33, %v8160_v46 }
 0x40b   :  { %6160 = vmatprep.subr.bf16.mxu1 %v7789_v55  ;;  %7399 = vmatpush3.bf16.msra.mxu0 %v7842_v40  ;;  %v4562_v55 = vrot.slane %v4557_v33, %v8163_v47  ;;  %v5940_v40 = vpop.f32.mrf.mxu1 }
 0x40c   :  { %7400 = vmatprep.subr.bf16.mxu0 %v7843_v35 }
 0x40d   :  { %6107 = vmatmul.mubr.bf16.vlgmr.msra.gmra.mxu1 %v8309_v30  ;;  %v7796_v30 = vld [vmem:[#allocation9 + $0x688] ss:$16 sps:$4 sm:$0xff]  }
 0x40e   :  { %6161 = vmatpush1.bf16.msra.mxu1 %v7787_v43  ;;  %6192 = vmatprep.mubr.bf16.mxu1 %v8386_v52  ;;  %v7849_v52 = vld [vmem:[#allocation12 + $0x40] sm:$0xff]  }
 0x40f   :  { %6162 = vmatprep.subr.bf16.mxu1 %v7792_v58  ;;  %7401 = vmatpush3.bf16.msra.mxu0 %v7844_v29 }
 0x410   :  { %7402 = vmatprep.subr.bf16.mxu0 %v7845_v6 }
 0x412   :  { %6163 = vmatpush1.bf16.msra.mxu1 %v7790_v57  ;;  %v5942_v57 = vpop.f32.mrf.mxu1 }
 0x413   :  { %6164 = vmatprep.subr.bf16.mxu1 %v7795_v0  ;;  %7403 = vmatpush3.bf16.msra.mxu0 %v7846_v54 }
 0x414   :  { %7404 = vmatprep.subr.bf16.mxu0 %v7847_v2  ;;  %v7861_v2 = vld [vmem:[#allocation12 + $0xd0] sm:$0xff]  }
 0x416   :  { %6165 = vmatpush1.bf16.msra.mxu1 %v7793_v51 }
 0x417   :  { %6166 = vmatprep.subr.bf16.mxu1 %v7798_v39  ;;  %7405 = vmatpush3.bf16.msra.mxu0 %v7848_v53 }
 0x418   :  { %7406 = vmatprep.subr.bf16.mxu0 %v7849_v52  ;;  %v7862_v52 = vld [vmem:[#allocation12 + $0x90] sm:$0xff]  }
 0x41a   :  { %6167 = vmatpush1.bf16.msra.mxu1 %v7796_v30 }
 0x41b   :  { %6168 = vmatprep.subr.bf16.mxu1 %v7801_v3  ;;  %7407 = vmatpush3.bf16.msra.mxu0 %v7850_v9 }
 0x41e   :  { %6169 = vmatpush1.bf16.msra.mxu1 %v7799_v36 }
 0x41f   :  { %6170 = vmatprep.subr.bf16.mxu1 %v7804_v11 }
 0x422   :  { %6171 = vmatpush1.bf16.msra.mxu1 %v7802_v41 }
 0x423   :  { %6172 = vmatprep.subr.bf16.mxu1 %v7807_v37 }
 0x426   :  { %6173 = vmatpush1.bf16.msra.mxu1 %v7805_v4 }
 0x427   :  { %6174 = vmatprep.subr.bf16.mxu1 %v7810_v61  ;;  %v7863_v61 = vld [vmem:[#allocation12 + $0xc8] sm:$0xff]  }
 0x42a   :  { %6175 = vmatpush1.bf16.msra.mxu1 %v7808_v21 }
 0x42b   :  { %6176 = vmatprep.subr.bf16.mxu1 %v7813_v45 }
 0x42e   :  { %6177 = vmatpush2.bf16.msra.mxu1 %v7811_v7  ;;  %v7864_v7 = vld [vmem:[#allocation12 + $0x88] sm:$0xff]  }
 0x42f   :  { %6178 = vmatprep.subr.bf16.mxu1 %v7816_v63 }
 0x432   :  { %6179 = vmatpush2.bf16.msra.mxu1 %v7814_v18 }
 0x433   :  { %6180 = vmatprep.subr.bf16.mxu1 %v7819_v56 }
 0x436   :  { %6181 = vmatpush2.bf16.msra.mxu1 %v7817_v10 }
 0x437   :  { %6182 = vmatprep.subr.bf16.mxu1 %v7822_v42  ;;  %v7865_v42 = vld [vmem:[#allocation12 + $0xc0] sm:$0xff]  }
 0x43a   :  { %6183 = vmatpush2.bf16.msra.mxu1 %v7820_v12 }
 0x43b   :  { %6184 = vmatprep.subr.bf16.mxu1 %v7825_v23  ;;  %v7866_v23 = vld [vmem:[#allocation12 + $0x80] sm:$0xff]  }
 0x43e   :  { %6185 = vmatpush2.bf16.msra.mxu1 %v7823_v38 }
 0x43f   :  { %6186 = vmatprep.subr.bf16.mxu1 %v7828_v19 }
 0x442   :  { %6187 = vmatpush2.bf16.msra.mxu1 %v7826_v59 }
 0x443   :  { %6188 = vmatprep.subr.bf16.mxu1 %v7831_v24 }
 0x446   :  { %6189 = vmatpush2.bf16.msra.mxu1 %v7829_v13 }
 0x447   :  { %6190 = vmatprep.subr.bf16.mxu1 %v7834_v17 }
 0x44a   :  { %6191 = vmatpush2.bf16.msra.mxu1 %v7832_v14 }
 0x44b   :  { %7414 = vmatprep.subr.bf16.mxu1 %v7851_v34 }
 0x44d   :  { %6193 = vmatmul.mubr.bf16.vlgmr.msra.gmra.mxu1 %v8388_v31  ;;  %v5893_v31 = vpop.f32.mrf.mxu0 }
 0x44e   :  { %7415 = vmatpush3.bf16.msra.mxu1 %v7852_v15  ;;  %v5894_v29 = vadd.f32 %v5893_v31, %v4562_v55 }
 0x44f   :  { %7416 = vmatprep.subr.bf16.mxu1 %v7853_v1  ;;  %v5895_v25 = vpop.f32.mrf.mxu0  ;;  %v4574_v1 = vrot.slane %v4557_v33, %v8166_v48 }
 0x450   :  { %v5896_v43 = vadd.f32 %v5895_v25, %v4566_v44  ;;  %v5937_v53 = vadd.f32 %v5936_v27, %v5894_v29 }
 0x451   :  { %v5897_v20 = vpop.f32.mrf.mxu0 }
 0x452   :  { %7417 = vmatpush3.bf16.msra.mxu1 %v7854_v5  ;;  %v5898_v58 = vadd.f32 %v5897_v20, %v4562_v55  ;;  %v5939_v51 = vadd.f32 %v5938_v26, %v5896_v43  ;;  %v4570_v5 = vrot.slane %v4557_v33, %v8171_v50 }
 0x453   :  { %7418 = vmatprep.subr.bf16.mxu1 %v7855_v60  ;;  %v5899_v28 = vpop.f32.mrf.mxu0 }
 0x454   :  { %v5900_v6 = vadd.f32 %v5899_v28, %v4566_v44  ;;  %v5941_v39 = vadd.f32 %v5940_v40, %v5898_v58 }
 0x455   :  { %v5979_v8 = vpop.f32.mrf.mxu0 }
 0x456   :  { %7419 = vmatpush3.bf16.msra.mxu1 %v7856_v62  ;;  %v5943_v9 = vadd.f32 %v5942_v57, %v5900_v6  ;;  %v5980_v47 = vadd.f32 %v5979_v8, %v5937_v53 }
 0x457   :  { %7420 = vmatprep.subr.bf16.mxu1 %v7857_v16  ;;  %v5981_v35 = vpop.f32.mrf.mxu0 }
 0x458   :  { %v5982_v46 = vadd.f32 %v5981_v35, %v5939_v51 }
 0x459   :  { %v5983_v0 = vpop.f32.mrf.mxu0 }
 0x45a   :  { %7421 = vmatpush3.bf16.msra.mxu1 %v7858_v49  ;;  %v5984_v36 = vadd.f32 %v5983_v0, %v5941_v39 }
 0x45b   :  { %7422 = vmatprep.subr.bf16.mxu1 %v7859_v22  ;;  %v5985_v30 = vpop.f32.mrf.mxu0 }
 0x45c   :  { %v5986_v41 = vadd.f32 %v5985_v30, %v5943_v9 }
 0x45e   :  { %7423 = vmatpush3.bf16.msra.mxu1 %v7860_v32 }
 0x45f   :  { %7424 = vmatprep.subr.bf16.mxu1 %v7861_v2 }
 0x462   :  { %7425 = vmatpush3.bf16.msra.mxu1 %v7862_v52 }
 0x463   :  { %7426 = vmatprep.subr.bf16.mxu1 %v7863_v61 }
 0x466   :  { %7427 = vmatpush3.bf16.msra.mxu1 %v7864_v7 }
 0x467   :  { %7428 = vmatprep.subr.bf16.mxu1 %v7865_v42 }
 0x46a   :  { %7429 = vmatpush3.bf16.msra.mxu1 %v7866_v23 }
 0x47d   :  { %v6065_v59 = vpop.f32.mrf.mxu0 }
 0x47e   :  { %v6066_v22 = vadd.f32 %v6065_v59, %v4570_v5 }
 0x47f   :  { %v6067_v24 = vpop.f32.mrf.mxu0 }
 0x480   :  { %v6068_v16 = vadd.f32 %v6067_v24, %v4574_v1 }
 0x481   :  { %v6069_v13 = vpop.f32.mrf.mxu0 }
 0x482   :  { %v6070_v49 = vadd.f32 %v6069_v13, %v4570_v5 }
 0x483   :  { %v6071_v14 = vpop.f32.mrf.mxu0 }
 0x484   :  { %v6072_v31 = vadd.f32 %v6071_v14, %v4574_v1 }
 0x48d   :  { %v6022_v54 = vpop.f32.mrf.mxu1 }
 0x48e   :  { %v6023_v21 = vadd.f32 %v6022_v54, %v5980_v47 }
 0x48f   :  { %v6024_v3 = vpop.f32.mrf.mxu1 }
 0x490   :  { %v6025_v37 = vadd.f32 %v6024_v3, %v5982_v46  ;;  %v6203_v12 = vmax.f32 %v6023_v21, 0.0  ;;  %v7359_v46 = vld [vmem:[#allocation13] ss:$0 sm:$0xff] }
 0x491   :  { %v6026_v11 = vpop.f32.mrf.mxu1 }
 0x492   :  { %v6027_v4 = vadd.f32 %v6026_v11, %v5984_v36  ;;  %v6204_v56 = vmax.f32 %v6025_v37, 0.0 }
 0x493   :  { %v6028_v45 = vpop.f32.mrf.mxu1 }
 0x494   :  { %v6029_v63 = vadd.f32 %v6028_v45, %v5986_v41  ;;  %v6207_v18 = vmax.f32 %v6027_v4, 0.0 }
 0x496   :  { %v6208_v10 = vmax.f32 %v6029_v63, 0.0  ;;  %v6211_v19 = vpack.c.bf16 %v6207_v18, %v6203_v12 }
 0x498   :  { %v6212_v38 = vpack.c.bf16 %v6208_v10, %v6204_v56 }
 0x49a   :  { %6510 = vmatprep.mubr.bf16.mxu0 %v6212_v38 }
 0x49b   :  { %6511 = vmatmul.mubr.bf16.vlgmr.msra.gmra.mxu0 %v6211_v19 }
 0x4be   :  { %v6151_v15 = vpop.f32.mrf.mxu0 }
 0x4c0   :  { %v6153_v62 = vpop.f32.mrf.mxu0 }
 0x4c2   :  { %v6155_v27 = vpop.f32.mrf.mxu0 }
 0x4c4   :  { %v6157_v35 = vpop.f32.mrf.mxu0 }
 0x4cd   :  { %v6108_v17 = vpop.f32.mrf.mxu1 }
 0x4ce   :  { %v6109_v28 = vadd.f32 %v6108_v17, %v6066_v22 }
 0x4cf   :  { %v6110_v34 = vpop.f32.mrf.mxu1 }
 0x4d0   :  { %v6111_v25 = vadd.f32 %v6110_v34, %v6068_v16  ;;  %v6152_v48 = vadd.f32 %v6151_v15, %v6109_v28 }
 0x4d1   :  { %v6112_v60 = vpop.f32.mrf.mxu1 }
 0x4d2   :  { %v6113_v20 = vadd.f32 %v6112_v60, %v6070_v49  ;;  %v6154_v55 = vadd.f32 %v6153_v62, %v6111_v25 }
 0x4d3   :  { %v6114_v32 = vpop.f32.mrf.mxu1 }
 0x4d4   :  { %v6115_v8 = vadd.f32 %v6114_v32, %v6072_v31  ;;  %v6156_v40 = vadd.f32 %v6155_v27, %v6113_v20 }
 0x4d6   :  { %v6158_v58 = vadd.f32 %v6157_v35, %v6115_v8 }
 0x50d   :  { %v6194_v26 = vpop.f32.mrf.mxu1 }
 0x50e   :  { %v6195_v29 = vadd.f32 %v6194_v26, %v6152_v48 }
 0x50f   :  { %v6196_v44 = vpop.f32.mrf.mxu1 }
 0x510   :  { %v6197_v50 = vadd.f32 %v6196_v44, %v6154_v55  ;;  %v6205_v39 = vmax.f32 %v6195_v29, 0.0 }
 0x511   :  { %v6198_v43 = vpop.f32.mrf.mxu1 }
 0x512   :  { %v6199_v33 = vadd.f32 %v6198_v43, %v6156_v40  ;;  %v6206_v54 = vmax.f32 %v6197_v50, 0.0 }
 0x513   :  { %v6200_v57 = vpop.f32.mrf.mxu1 }
 0x514   :  { %v6201_v0 = vadd.f32 %v6200_v57, %v6158_v58  ;;  %v6209_v6 = vmax.f32 %v6199_v33, 0.0 }
 0x516   :  { %v6210_v51 = vmax.f32 %v6201_v0, 0.0  ;;  %v6213_v53 = vpack.c.bf16 %v6209_v6, %v6205_v39 }
 0x518   :  { %v6214_v2 = vpack.c.bf16 %v6210_v51, %v6206_v54 }
 0x51a   :  { %6551 = vmatprep.mubr.bf16.mxu1 %v6214_v2 }
 0x51b   :  { %6552 = vmatmul.mubr.bf16.vlgmr.msra.gmra.mxu1 %v6213_v53 }
 0x55b   :  { %v7408_v30 = vpop.f32.mrf.mxu0 }
 0x55d   :  { %v7409_v3 = vpop.f32.mrf.mxu0 }
 0x55e   :  { %v7410_v9 = vadd.f32 %v7409_v3, %v7408_v30 }
 0x55f   :  { %v7411_v52 = vpop.f32.mrf.mxu0 }
 0x560   :  { %v6513_v41 = vadd.f32 %v7410_v9, %v7359_v46 }
 0x561   :  { %v7412_v36 = vpop.f32.mrf.mxu0 }
 0x562   :  { %v7413_v37 = vadd.f32 %v7412_v36, %v7411_v52 }
 0x564   :  { %v6516_v7 = vadd.f32 %v7413_v37, %v7359_v46 }
 0x5db   :  { %v7430_v47 = vpop.f32.mrf.mxu1 }
 0x5dd   :  { %v7431_v11 = vpop.f32.mrf.mxu1 }
 0x5de   :  { %v7432_v4 = vadd.f32 %v7431_v11, %v7430_v47 }
 0x5df   :  { %v7433_v61 = vpop.f32.mrf.mxu1 }
 0x5e0   :  { %v6554_v21 = vadd.f32 %v7432_v4, %v6513_v41 }
 0x5e1   :  { %v7434_v45 = vpop.f32.mrf.mxu1 }
 0x5e2   :  { %6560 = vst [vmem:[%s8416_s9] sm:$0xff] %v6554_v21  ;;  %v7435_v63 = vadd.f32 %v7434_v45, %v7433_v61 }
 0x5e4   :  { %v6557_v18 = vadd.f32 %v7435_v63, %v6516_v7 }
 0x5e6   :  { %6561 = vst [vmem:[%s8416_s9 + $0x8] sm:$0xff] %v6557_v18 }
 0x5e7   :  { %6566 = vsyncpa [#allocation3], 1 }
 0x5e8   :  { %6567 = vsyncpa [#allocation5], 1 }
 0x5e9   :  { %6568 = vsyncpa [#allocation8], 1 }
 0x5ea   :  { %6569 = vsyncpa [#allocation11], 1 }
 0x5eb   :  { %6570 = vsyncpa [#allocation14], 1 }

</bundles_post_ra>
